<compile_context>
chip_gen: v7x
topology: tpu7x:2x2x1
jax: 0.10.0
libtpu: 0.0.40
codegen_flags: <defaults>
</compile_context>

<pallas_src>
import functools

import jax
import jax.numpy as jnp
import numpy as np
from jax import lax
from jax.experimental import pallas as pl
from jax.experimental.pallas import tpu as pltpu

EPS = 1e-5


# ----------------------------------------------------------------------------
# Fused kernel body (runs over a 1-D reduction grid on C1 chunks).
# ----------------------------------------------------------------------------
def fused_block_kernel(x_ref, w1_ref, g1_ref, b1_ref, g2_ref, b2_ref,
                       w2_ref, masks_ref, o_ref, acc_ref, hext_ref, *, H, W):
    """All refs are channel-major.

    x_ref    : (TC1, M)   f32, M = H*W       channel-major image chunk
    w1_ref   : (TC1, C2)  bf16               1x1 conv weight chunk (C1-major!)
    g1/b1    : (TC1, 1)   f32                BN1 affine chunk (column vectors)
    g2/b2    : (C2, 1)    f32                BN2 affine
    w2_ref   : (9*C3, C2) bf16, row (ky*3+kx)*C3 + c3   3x3 conv taps
    masks_ref: (2, M)     f32; row0 zeros x==0 cols, row1 zeros x==W-1 cols
    o_ref    : (C3, M)    f32                output (resident across the grid)
    acc_ref  : (C2, M)    f32 VMEM scratch   conv1x1 accumulator
    hext_ref : (C2, M+2*PAD) bf16 VMEM scratch (zero-extended flat image)
    """
    i = pl.program_id(0)
    n_steps = pl.num_programs(0)
    M = H * W
    PAD = W + 2                      # >= max |tap offset| = W + 1
    C2 = acc_ref.shape[0]
    C3 = o_ref.shape[0]
    inv_m = 1.0 / M

    @pl.when(i == 0)
    def _():
        acc_ref[...] = jnp.zeros_like(acc_ref)

    # ---- BatchNorm #125 (per-channel batch stats over H*W -> exact per C1
    #      chunk), biased variance, single pass, then ReLU -------------------
    x = x_ref[...]                                       # (TC1, M) f32
    s1 = jnp.sum(x, axis=1, keepdims=True)
    s2 = jnp.sum(x * x, axis=1, keepdims=True)
    mu1 = s1 * inv_m
    var1 = s2 * inv_m - mu1 * mu1
    sc1 = g1_ref[...] * lax.rsqrt(var1 + EPS)            # fold BN into scale/shift
    sh1 = b1_ref[...] - mu1 * sc1
    xh = jnp.maximum(x * sc1 + sh1, 0.0).astype(jnp.bfloat16)

    # ---- Partial Conv2d 1x1 (no bias): contract the chunk's C1 dim ---------
    # w1 chunk is (TC1, C2); contracting dim 0 of both keeps the weight DMA a
    # clean rectangular block (lane dim = 128 full).
    acc_ref[...] += lax.dot_general(
        w1_ref[...], xh,
        dimension_numbers=(((0,), (0,)), ((), ())),
        preferred_element_type=jnp.float32)              # (C2, M)

    # ---- Final step: BN #126 + ReLU + Conv2d 3x3 ----------------------------
    @pl.when(i == n_steps - 1)
    def _():
        y = acc_ref[...]                                 # (C2, M) f32
        t1 = jnp.sum(y, axis=1, keepdims=True)
        t2 = jnp.sum(y * y, axis=1, keepdims=True)
        mu2 = t1 * inv_m
        var2 = t2 * inv_m - mu2 * mu2
        sc2 = g2_ref[...] * lax.rsqrt(var2 + EPS)
        sh2 = b2_ref[...] - mu2 * sc2
        h = jnp.maximum(y * sc2 + sh2, 0.0).astype(jnp.bfloat16)       # (C2, M)

        # Zero-extend the flat image so every shifted tap slice stays in
        # bounds; out-of-image rows (y == -1 / y == H) then read real zeros.
        # Only the two pad strips are zeroed; the middle is written once.
        hext_ref[:, :PAD] = jnp.zeros((C2, PAD), jnp.bfloat16)
        hext_ref[:, PAD + M:] = jnp.zeros((C2, PAD), jnp.bfloat16)
        hext_ref[:, PAD:PAD + M] = h

        # One wide MXU matmul for all 9 taps: (9*C3, C2) @ (C2, M + 2*PAD).
        taps = jnp.dot(w2_ref[...], hext_ref[...],
                       preferred_element_type=jnp.float32)             # (9*C3, ·)

        mask_l = masks_ref[0:1, :]   # zero where x == 0      (kx == 0 taps)
        mask_r = masks_ref[1:2, :]   # zero where x == W - 1  (kx == 2 taps)

        def tap(ky, kx):
            t = ky * 3 + kx
            off = PAD + (ky - 1) * W + (kx - 1)
            return taps[t * C3:(t + 1) * C3, off:off + M]

        # Group the shifted-column taps so each edge mask is applied once.
        # (multiplying by 0.0 would propagate NaN if h were non-finite; fine
        #  for BN/ReLU activations.)
        mid = tap(1, 1) + tap(0, 1) + tap(2, 1)
        left = tap(0, 0) + tap(1, 0) + tap(2, 0)
        right = tap(0, 2) + tap(1, 2) + tap(2, 2)
        o_ref[...] = mid + left * mask_l + right * mask_r


def _pick_chunk(C1):
    """Largest chunk giving <=~6 pipeline steps, divisible by 8 (sublanes)."""
    for n in (4, 6, 3, 8, 2):
        if C1 % n == 0 and (C1 // n) % 8 == 0:
            return C1 // n
    return C1


# ----------------------------------------------------------------------------
# Wrapper: NCHW in / NCHW out, matching the PyTorch module semantics.
# ----------------------------------------------------------------------------
def densenet_block_forward(x_nchw, params):
    g1, b1, w1_conv, g2, b2, w2_conv = params
    N, C1, H, W = x_nchw.shape
    assert N == 1, "fused channel-major kernel assumes a single image (module spec)"
    C2 = w1_conv.shape[0]       # 128
    C3 = w2_conv.shape[0]       # 32
    M = H * W
    PAD = W + 2

    TC1 = _pick_chunk(C1)       # 408 for C1 = 1632 -> 4 pipelined steps
    n_steps = C1 // TC1

    # Free reshapes for N == 1 (no NCHW<->NHWC transposes, no HBM repack).
    x2d = x_nchw.reshape(C1, M)                                        # (C1, M)
    # Store w1 input-channel-major so the C1 grid blocks its *sublane* dim
    # (1632 % 128 != 0 would make lane-dim blocking of (C2, C1) illegal).
    w1 = jnp.transpose(w1_conv.reshape(C2, C1)).astype(jnp.bfloat16)   # (C1, C2)
    w2 = jnp.transpose(w2_conv, (2, 3, 0, 1)).reshape(9 * C3, C2)      # tap-major
    w2 = w2.astype(jnp.bfloat16)

    # Column-validity masks for the flat-shift 3x3 conv (kill row wrap-around).
    xs = jnp.arange(M, dtype=jnp.int32) % W
    masks = jnp.stack([(xs != 0), (xs != W - 1)]).astype(jnp.float32)  # (2, M)

    cost = pl.CostEstimate(
        flops=(2 * C1 * C2 * M                       # conv1x1
               + 2 * 9 * C3 * C2 * (M + 2 * PAD)     # conv3x3 (wide matmul)
               + 10 * (C1 + C2) * M),                # BN/ReLU elementwise
        transcendentals=C1 + C2,                     # rsqrt per channel
        bytes_accessed=(x2d.size * 4 + w1.size * 2 + w2.size * 2
                        + masks.size * 4 + C3 * M * 4 + (C1 + C2) * 8),
    )

    out_flat = pl.pallas_call(
        functools.partial(fused_block_kernel, H=H, W=W),
        out_shape=jax.ShapeDtypeStruct((C3, M), jnp.float32),
        grid_spec=pltpu.PrefetchScalarGridSpec(
            num_scalar_prefetch=0,
            grid=(n_steps,),
            in_specs=[
                pl.BlockSpec((TC1, M), lambda i: (i, 0)),       # x chunk
                pl.BlockSpec((TC1, C2), lambda i: (i, 0)),      # w1 chunk
                pl.BlockSpec((TC1, 1), lambda i: (i, 0)),       # g1 chunk
                pl.BlockSpec((TC1, 1), lambda i: (i, 0)),       # b1 chunk
                pl.BlockSpec((C2, 1), lambda i: (0, 0)),        # g2
                pl.BlockSpec((C2, 1), lambda i: (0, 0)),        # b2
                pl.BlockSpec((9 * C3, C2), lambda i: (0, 0)),   # w2
                pl.BlockSpec((2, M), lambda i: (0, 0)),         # masks
            ],
            out_specs=pl.BlockSpec((C3, M), lambda i: (0, 0)),
            scratch_shapes=[
                pltpu.VMEM((C2, M), jnp.float32),               # conv1x1 acc
                pltpu.VMEM((C2, M + 2 * PAD), jnp.bfloat16),    # padded image
            ],
        ),
        compiler_params=pltpu.CompilerParams(
            dimension_semantics=("arbitrary",),                 # C1 reduction
            vmem_limit_bytes=32 * 1024 * 1024),
        cost_estimate=cost,
        # TODO(synk): on v7x, split the spatial/lane dim across the 2 Tensor-
        # Cores with a two-pass BN (or CMEM cross-core stat reduction) and a
        # "parallel" axis; single-TC is accepted at this problem size.
    )(x2d, w1,
      g1.reshape(C1, 1), b1.reshape(C1, 1),
      g2.reshape(C2, 1), b2.reshape(C2, 1),
      w2, masks)

    return out_flat.reshape(1, C3, H, W)


# ----------------------------------------------------------------------------
# Pure-JAX reference (same semantics as the PyTorch module in training mode)
# ----------------------------------------------------------------------------
def reference(x, params):
    g1, b1, w1_conv, g2, b2, w2_conv = params

    def bn(x, g, b):
        mu = jnp.mean(x, axis=(0, 2, 3), keepdims=True)
        var = jnp.mean((x - mu) ** 2, axis=(0, 2, 3), keepdims=True)
        return (x - mu) / jnp.sqrt(var + EPS) * g.reshape(1, -1, 1, 1) + \
               b.reshape(1, -1, 1, 1)

    x = jnp.maximum(bn(x, g1, b1), 0.0)
    x = lax.conv_general_dilated(x, w1_conv, (1, 1), 'VALID',
                                 dimension_numbers=('NCHW', 'OIHW', 'NCHW'),
                                 precision=lax.Precision.HIGHEST)
    x = jnp.maximum(bn(x, g2, b2), 0.0)
    x = lax.conv_general_dilated(x, w2_conv, (1, 1), ((1, 1), (1, 1)),
                                 dimension_numbers=('NCHW', 'OIHW', 'NCHW'),
                                 precision=lax.Precision.HIGHEST)
    return x


if __name__ == "__main__":
    key = jax.random.PRNGKey(0)
    k = jax.random.split(key, 7)

    N, C1, H, W = 1, 1632, 14, 14
    C2, C3 = 128, 32

    x = jax.random.normal(k[0], (N, C1, H, W), jnp.float32)

    # Deterministic synthetic parameters (shapes from the module __init__).
    g1 = 1.0 + 0.1 * jax.random.normal(k[1], (C1,), jnp.float32)
    b1 = 0.1 * jax.random.normal(k[2], (C1,), jnp.float32)
    w1_conv = jax.random.normal(k[3], (C2, C1, 1, 1), jnp.float32) * (1.0 / np.sqrt(C1))
    g2 = 1.0 + 0.1 * jax.random.normal(k[4], (C2,), jnp.float32)
    b2 = 0.1 * jax.random.normal(k[5], (C2,), jnp.float32)
    w2_conv = jax.random.normal(k[6], (C3, C2, 3, 3), jnp.float32) * (1.0 / np.sqrt(C2 * 9))

    params = (g1, b1, w1_conv, g2, b2, w2_conv)

    out = jax.block_until_ready(jax.jit(densenet_block_forward)(x, params))
    ref = jax.block_until_ready(reference(x, params))

    assert out.shape == (N, C3, H, W), out.shape
    np.testing.assert_allclose(np.asarray(out), np.asarray(ref), rtol=2e-2, atol=2e-2)
    print("KERNEL_OK")
</pallas_src>

<mosaic_0001>
module attributes {stable_mosaic.version = 11 : i64} {
  func.func @fused_block_kernel(%arg0: i32, %arg1: memref<408x196xf32, #tpu.memory_space<vmem>>, %arg2: memref<408x128xbf16, #tpu.memory_space<vmem>>, %arg3: memref<408x1xf32, #tpu.memory_space<vmem>>, %arg4: memref<408x1xf32, #tpu.memory_space<vmem>>, %arg5: memref<128x1xf32, #tpu.memory_space<vmem>>, %arg6: memref<128x1xf32, #tpu.memory_space<vmem>>, %arg7: memref<288x128xbf16, #tpu.memory_space<vmem>>, %arg8: memref<2x196xf32, #tpu.memory_space<vmem>>, %arg9: memref<32x196xf32, #tpu.memory_space<vmem>>, %arg10: memref<128x196xf32, #tpu.memory_space<vmem>>, %arg11: memref<128x228xbf16, #tpu.memory_space<vmem>>) attributes {dimension_semantics = [#tpu.dimension_semantics<arbitrary>], iteration_bounds = array<i64: 4>, scalar_prefetch = 0 : i64, scratch_operands = 2 : i64, tpu.core_type = #tpu.core_type<tc>, window_params = [{transform_indices = @transform_0, window_bounds = array<i64: 408, 196>}, {transform_indices = @transform_1, window_bounds = array<i64: 408, 128>}, {transform_indices = @transform_2, window_bounds = array<i64: 408, 1>}, {transform_indices = @transform_3, window_bounds = array<i64: 408, 1>}, {pipeline_mode = #tpu.pipeline_mode<synchronous>, transform_indices = @transform_4, window_bounds = array<i64: 128, 1>}, {pipeline_mode = #tpu.pipeline_mode<synchronous>, transform_indices = @transform_5, window_bounds = array<i64: 128, 1>}, {pipeline_mode = #tpu.pipeline_mode<synchronous>, transform_indices = @transform_6, window_bounds = array<i64: 288, 128>}, {pipeline_mode = #tpu.pipeline_mode<synchronous>, transform_indices = @transform_7, window_bounds = array<i64: 2, 196>}, {pipeline_mode = #tpu.pipeline_mode<synchronous>, transform_indices = @transform_8, window_bounds = array<i64: 32, 196>}]} {
    %c0_i32 = arith.constant 0 : i32
    %0 = arith.cmpi eq, %arg0, %c0_i32 : i32
    %1 = arith.extui %0 : i1 to i32
    %c0_i32_0 = arith.constant 0 : i32
    %2 = arith.cmpi ne, %1, %c0_i32_0 : i32
    scf.if %2 {
      %cst_19 = arith.constant 0.000000e+00 : f32
      %38 = vector.broadcast %cst_19 : f32 to vector<128x196xf32>
      %c0_20 = arith.constant 0 : index
      %c0_21 = arith.constant 0 : index
      %39 = vector.load %arg10[%c0_20, %c0_21] : memref<128x196xf32, #tpu.memory_space<vmem>>, vector<128x196xf32>
      tpu.vector_store %arg10[%c0_20, %c0_21], %38 {strides = array<i32>} : memref<128x196xf32, #tpu.memory_space<vmem>>, vector<128x196xf32>,
    } else {
    }
    %c0 = arith.constant 0 : index
    %c0_1 = arith.constant 0 : index
    %3 = vector.load %arg1[%c0, %c0_1] : memref<408x196xf32, #tpu.memory_space<vmem>>, vector<408x196xf32>
    %cst = arith.constant dense<0.000000e+00> : vector<408xf32>
    %4 = vector.multi_reduction <add>, %3, %cst [1] : vector<408x196xf32> to vector<408xf32>
    %5 = vector.shape_cast %4 : vector<408xf32> to vector<408x1xf32>
    %6 = arith.mulf %3, %3 : vector<408x196xf32>
    %cst_2 = arith.constant dense<0.000000e+00> : vector<408xf32>
    %7 = vector.multi_reduction <add>, %6, %cst_2 [1] : vector<408x196xf32> to vector<408xf32>
    %8 = vector.shape_cast %7 : vector<408xf32> to vector<408x1xf32>
    %cst_3 = arith.constant 0.00510204071 : f32
    %9 = vector.broadcast %cst_3 : f32 to vector<408x1xf32>
    %10 = arith.mulf %5, %9 : vector<408x1xf32>
    %cst_4 = arith.constant 0.00510204071 : f32
    %11 = vector.broadcast %cst_4 : f32 to vector<408x1xf32>
    %12 = arith.mulf %8, %11 : vector<408x1xf32>
    %13 = arith.mulf %10, %10 : vector<408x1xf32>
    %14 = arith.subf %12, %13 : vector<408x1xf32>
    %c0_5 = arith.constant 0 : index
    %c0_6 = arith.constant 0 : index
    %15 = vector.load %arg3[%c0_5, %c0_6] : memref<408x1xf32, #tpu.memory_space<vmem>>, vector<408x1xf32>
    %cst_7 = arith.constant 9.99999974E-6 : f32
    %16 = vector.broadcast %cst_7 : f32 to vector<408x1xf32>
    %17 = arith.addf %14, %16 : vector<408x1xf32>
    %18 = math.rsqrt %17 : vector<408x1xf32>
    %19 = arith.mulf %15, %18 : vector<408x1xf32>
    %c0_8 = arith.constant 0 : index
    %c0_9 = arith.constant 0 : index
    %20 = vector.load %arg4[%c0_8, %c0_9] : memref<408x1xf32, #tpu.memory_space<vmem>>, vector<408x1xf32>
    %21 = arith.mulf %10, %19 : vector<408x1xf32>
    %22 = arith.subf %20, %21 : vector<408x1xf32>
    %23 = vector.broadcast %19 : vector<408x1xf32> to vector<408x196xf32>
    %24 = arith.mulf %3, %23 : vector<408x196xf32>
    %25 = vector.broadcast %22 : vector<408x1xf32> to vector<408x196xf32>
    %26 = arith.addf %24, %25 : vector<408x196xf32>
    %cst_10 = arith.constant 0.000000e+00 : f32
    %27 = vector.broadcast %cst_10 : f32 to vector<408x196xf32>
    %28 = arith.maximumf %26, %27 : vector<408x196xf32>
    %29 = arith.truncf %28 : vector<408x196xf32> to vector<408x196xbf16>
    %c0_11 = arith.constant 0 : index
    %c0_12 = arith.constant 0 : index
    %30 = vector.load %arg10[%c0_11, %c0_12] : memref<128x196xf32, #tpu.memory_space<vmem>>, vector<128x196xf32>
    %c0_13 = arith.constant 0 : index
    %c0_14 = arith.constant 0 : index
    %31 = vector.load %arg2[%c0_13, %c0_14] : memref<408x128xbf16, #tpu.memory_space<vmem>>, vector<408x128xbf16>
    %cst_15 = arith.constant dense<0.000000e+00> : vector<128x196xf32>
    %32 = tpu.matmul %31, %29, %cst_15 {dimension_numbers = #tpu.dot_dimension_numbers<[0], [0], [1], [1], [0, 1, 1, 1], [], []>} : vector<408x128xbf16>, vector<408x196xbf16>, vector<128x196xf32> -> vector<128x196xf32>
    %33 = arith.addf %30, %32 : vector<128x196xf32>
    %c0_16 = arith.constant 0 : index
    %c0_17 = arith.constant 0 : index
    %34 = vector.load %arg10[%c0_16, %c0_17] : memref<128x196xf32, #tpu.memory_space<vmem>>, vector<128x196xf32>
    tpu.vector_store %arg10[%c0_16, %c0_17], %33 {strides = array<i32>} : memref<128x196xf32, #tpu.memory_space<vmem>>, vector<128x196xf32>,
    %c3_i32 = arith.constant 3 : i32
    %35 = arith.cmpi eq, %arg0, %c3_i32 : i32
    %36 = arith.extui %35 : i1 to i32
    %c0_i32_18 = arith.constant 0 : i32
    %37 = arith.cmpi ne, %36, %c0_i32_18 : i32
    scf.if %37 {
      %c0_19 = arith.constant 0 : index
      %c0_20 = arith.constant 0 : index
      %38 = vector.load %arg10[%c0_19, %c0_20] : memref<128x196xf32, #tpu.memory_space<vmem>>, vector<128x196xf32>
      %cst_21 = arith.constant dense<0.000000e+00> : vector<128xf32>
      %39 = vector.multi_reduction <add>, %38, %cst_21 [1] : vector<128x196xf32> to vector<128xf32>
      %40 = vector.shape_cast %39 : vector<128xf32> to vector<128x1xf32>
      %41 = arith.mulf %38, %38 : vector<128x196xf32>
      %cst_22 = arith.constant dense<0.000000e+00> : vector<128xf32>
      %42 = vector.multi_reduction <add>, %41, %cst_22 [1] : vector<128x196xf32> to vector<128xf32>
      %43 = vector.shape_cast %42 : vector<128xf32> to vector<128x1xf32>
      %cst_23 = arith.constant 0.00510204071 : f32
      %44 = vector.broadcast %cst_23 : f32 to vector<128x1xf32>
      %45 = arith.mulf %40, %44 : vector<128x1xf32>
      %cst_24 = arith.constant 0.00510204071 : f32
      %46 = vector.broadcast %cst_24 : f32 to vector<128x1xf32>
      %47 = arith.mulf %43, %46 : vector<128x1xf32>
      %48 = arith.mulf %45, %45 : vector<128x1xf32>
      %49 = arith.subf %47, %48 : vector<128x1xf32>
      %c0_25 = arith.constant 0 : index
      %c0_26 = arith.constant 0 : index
      %50 = vector.load %arg5[%c0_25, %c0_26] : memref<128x1xf32, #tpu.memory_space<vmem>>, vector<128x1xf32>
      %cst_27 = arith.constant 9.99999974E-6 : f32
      %51 = vector.broadcast %cst_27 : f32 to vector<128x1xf32>
      %52 = arith.addf %49, %51 : vector<128x1xf32>
      %53 = math.rsqrt %52 : vector<128x1xf32>
      %54 = arith.mulf %50, %53 : vector<128x1xf32>
      %c0_28 = arith.constant 0 : index
      %c0_29 = arith.constant 0 : index
      %55 = vector.load %arg6[%c0_28, %c0_29] : memref<128x1xf32, #tpu.memory_space<vmem>>, vector<128x1xf32>
      %56 = arith.mulf %45, %54 : vector<128x1xf32>
      %57 = arith.subf %55, %56 : vector<128x1xf32>
      %58 = vector.broadcast %54 : vector<128x1xf32> to vector<128x196xf32>
      %59 = arith.mulf %38, %58 : vector<128x196xf32>
      %60 = vector.broadcast %57 : vector<128x1xf32> to vector<128x196xf32>
      %61 = arith.addf %59, %60 : vector<128x196xf32>
      %cst_30 = arith.constant 0.000000e+00 : f32
      %62 = vector.broadcast %cst_30 : f32 to vector<128x196xf32>
      %63 = arith.maximumf %61, %62 : vector<128x196xf32>
      %64 = arith.truncf %63 : vector<128x196xf32> to vector<128x196xbf16>
      %cst_31 = arith.constant 0.000000e+00 : bf16
      %65 = vector.broadcast %cst_31 : bf16 to vector<128x16xbf16>
      %c0_32 = arith.constant 0 : index
      %c0_33 = arith.constant 0 : index
      %66 = vector.load %arg11[%c0_32, %c0_33] : memref<128x228xbf16, #tpu.memory_space<vmem>>, vector<128x16xbf16>
      tpu.vector_store %arg11[%c0_32, %c0_33], %65 {strides = array<i32>} : memref<128x228xbf16, #tpu.memory_space<vmem>>, vector<128x16xbf16>,
      %cst_34 = arith.constant 0.000000e+00 : bf16
      %67 = vector.broadcast %cst_34 : bf16 to vector<128x16xbf16>
      %c0_35 = arith.constant 0 : index
      %c212 = arith.constant 212 : index
      %68 = vector.load %arg11[%c0_35, %c212] : memref<128x228xbf16, #tpu.memory_space<vmem>>, vector<128x16xbf16>
      tpu.vector_store %arg11[%c0_35, %c212], %67 {strides = array<i32>} : memref<128x228xbf16, #tpu.memory_space<vmem>>, vector<128x16xbf16>,
      %c0_36 = arith.constant 0 : index
      %c16 = arith.constant 16 : index
      %69 = vector.load %arg11[%c0_36, %c16] : memref<128x228xbf16, #tpu.memory_space<vmem>>, vector<128x196xbf16>
      tpu.vector_store %arg11[%c0_36, %c16], %64 {strides = array<i32>} : memref<128x228xbf16, #tpu.memory_space<vmem>>, vector<128x196xbf16>,
      %c0_37 = arith.constant 0 : index
      %c0_38 = arith.constant 0 : index
      %70 = vector.load %arg7[%c0_37, %c0_38] : memref<288x128xbf16, #tpu.memory_space<vmem>>, vector<288x128xbf16>
      %c0_39 = arith.constant 0 : index
      %c0_40 = arith.constant 0 : index
      %71 = vector.load %arg11[%c0_39, %c0_40] : memref<128x228xbf16, #tpu.memory_space<vmem>>, vector<128x228xbf16>
      %cst_41 = arith.constant dense<0.000000e+00> : vector<288x228xf32>
      %72 = tpu.matmul %70, %71, %cst_41 {dimension_numbers = #tpu.dot_dimension_numbers<[1], [0], [0], [1], [0, 0, 1, 1], [], []>} : vector<288x128xbf16>, vector<128x228xbf16>, vector<288x228xf32> -> vector<288x228xf32>
      %c0_42 = arith.constant 0 : index
      %c0_43 = arith.constant 0 : index
      %73 = vector.load %arg8[%c0_42, %c0_43] : memref<2x196xf32, #tpu.memory_space<vmem>>, vector<1x196xf32>
      %c1 = arith.constant 1 : index
      %c0_44 = arith.constant 0 : index
      %74 = vector.load %arg8[%c1, %c0_44] : memref<2x196xf32, #tpu.memory_space<vmem>>, vector<1x196xf32>
      %75 = vector.extract_strided_slice %72 {offsets = [128, 16], sizes = [32, 196], strides = [1, 1]} : vector<288x228xf32> to vector<32x196xf32>
      %76 = vector.extract_strided_slice %72 {offsets = [32, 2], sizes = [32, 196], strides = [1, 1]} : vector<288x228xf32> to vector<32x196xf32>
      %77 = arith.addf %75, %76 : vector<32x196xf32>
      %78 = vector.extract_strided_slice %72 {offsets = [224, 30], sizes = [32, 196], strides = [1, 1]} : vector<288x228xf32> to vector<32x196xf32>
      %79 = arith.addf %77, %78 : vector<32x196xf32>
      %80 = vector.extract_strided_slice %72 {offsets = [0, 1], sizes = [32, 196], strides = [1, 1]} : vector<288x228xf32> to vector<32x196xf32>
      %81 = vector.extract_strided_slice %72 {offsets = [96, 15], sizes = [32, 196], strides = [1, 1]} : vector<288x228xf32> to vector<32x196xf32>
      %82 = arith.addf %80, %81 : vector<32x196xf32>
      %83 = vector.extract_strided_slice %72 {offsets = [192, 29], sizes = [32, 196], strides = [1, 1]} : vector<288x228xf32> to vector<32x196xf32>
      %84 = arith.addf %82, %83 : vector<32x196xf32>
      %85 = vector.extract_strided_slice %72 {offsets = [64, 3], sizes = [32, 196], strides = [1, 1]} : vector<288x228xf32> to vector<32x196xf32>
      %86 = vector.extract_strided_slice %72 {offsets = [160, 17], sizes = [32, 196], strides = [1, 1]} : vector<288x228xf32> to vector<32x196xf32>
      %87 = arith.addf %85, %86 : vector<32x196xf32>
      %88 = vector.extract_strided_slice %72 {offsets = [256, 31], sizes = [32, 196], strides = [1, 1]} : vector<288x228xf32> to vector<32x196xf32>
      %89 = arith.addf %87, %88 : vector<32x196xf32>
      %90 = vector.broadcast %73 : vector<1x196xf32> to vector<32x196xf32>
      %91 = arith.mulf %84, %90 : vector<32x196xf32>
      %92 = arith.addf %79, %91 : vector<32x196xf32>
      %93 = vector.broadcast %74 : vector<1x196xf32> to vector<32x196xf32>
      %94 = arith.mulf %89, %93 : vector<32x196xf32>
      %95 = arith.addf %92, %94 : vector<32x196xf32>
      %c0_45 = arith.constant 0 : index
      %c0_46 = arith.constant 0 : index
      %96 = vector.load %arg9[%c0_45, %c0_46] : memref<32x196xf32, #tpu.memory_space<vmem>>, vector<32x196xf32>
      tpu.vector_store %arg9[%c0_45, %c0_46], %95 {strides = array<i32>} : memref<32x196xf32, #tpu.memory_space<vmem>>, vector<32x196xf32>,
    } else {
    }
    return
  }
  func.func @transform_0(%arg0: i32) -> (i32, i32) {
    %c0_i32 = arith.constant 0 : i32
    %c0_i32_0 = arith.constant 0 : i32
    return %arg0, %c0_i32 : i32, i32
  }
  func.func @transform_1(%arg0: i32) -> (i32, i32) {
    %c0_i32 = arith.constant 0 : i32
    %c0_i32_0 = arith.constant 0 : i32
    return %arg0, %c0_i32 : i32, i32
  }
  func.func @transform_2(%arg0: i32) -> (i32, i32) {
    %c0_i32 = arith.constant 0 : i32
    %c0_i32_0 = arith.constant 0 : i32
    return %arg0, %c0_i32 : i32, i32
  }
  func.func @transform_3(%arg0: i32) -> (i32, i32) {
    %c0_i32 = arith.constant 0 : i32
    %c0_i32_0 = arith.constant 0 : i32
    return %arg0, %c0_i32 : i32, i32
  }
  func.func @transform_4(%arg0: i32) -> (i32, i32) {
    %c0_i32 = arith.constant 0 : i32
    %c0_i32_0 = arith.constant 0 : i32
    %c0_i32_1 = arith.constant 0 : i32
    return %c0_i32, %c0_i32_0 : i32, i32
  }
  func.func @transform_5(%arg0: i32) -> (i32, i32) {
    %c0_i32 = arith.constant 0 : i32
    %c0_i32_0 = arith.constant 0 : i32
    %c0_i32_1 = arith.constant 0 : i32
    return %c0_i32, %c0_i32_0 : i32, i32
  }
  func.func @transform_6(%arg0: i32) -> (i32, i32) {
    %c0_i32 = arith.constant 0 : i32
    %c0_i32_0 = arith.constant 0 : i32
    %c0_i32_1 = arith.constant 0 : i32
    return %c0_i32, %c0_i32_0 : i32, i32
  }
  func.func @transform_7(%arg0: i32) -> (i32, i32) {
    %c0_i32 = arith.constant 0 : i32
    %c0_i32_0 = arith.constant 0 : i32
    %c0_i32_1 = arith.constant 0 : i32
    return %c0_i32, %c0_i32_0 : i32, i32
  }
  func.func @transform_8(%arg0: i32) -> (i32, i32) {
    %c0_i32 = arith.constant 0 : i32
    %c0_i32_0 = arith.constant 0 : i32
    %c0_i32_1 = arith.constant 0 : i32
    return %c0_i32, %c0_i32_0 : i32, i32
  }
}

</mosaic_0001>

<bundles_post_ra>
// kernel: densenet_block_forward.1
= control target key start
LH: loop header
LB: loop body
LE: loop exit
PB: predicated region body
PF: predicated region fallthrough
CT: control target
= control target key end

     0   :  { %s5195_s27 = smov 0   ;;  %s7779_s0 = inlined_call_operand.vmem [shape: f32[1632,196], index: 0, kind: input, shape index: {}]   ;;  %s7780_s1 = inlined_call_operand.vmem [shape: bf16[1632,128], index: 1, kind: input, shape index: {}]   ;;  %s7781_s2 = inlined_call_operand.vmem [shape: f32[1632,1], index: 2, kind: input, shape index: {}]   ;;  %s7782_s3 = inlined_call_operand.vmem [shape: f32[1632,1], index: 3, kind: input, shape index: {}]   ;;  %s7783_s4 = inlined_call_operand.vmem [shape: f32[128,1], index: 4, kind: input, shape index: {}]   ;;  %s7784_s5 = inlined_call_operand.vmem [shape: f32[128,1], index: 5, kind: input, shape index: {}]   ;;  %s7785_s6 = inlined_call_operand.vmem [shape: bf16[288,128], index: 6, kind: input, shape index: {}]   ;;  %s7786_s7 = inlined_call_operand.vmem [shape: f32[2,196], index: 7, kind: input, shape index: {}]   ;;  %s7787_s8 = inlined_call_operand.vmem [shape: f32[32,196], index: 8, kind: output, shape index: {}]  }
   0x1 LB: > { %s5201_s28 = sadd.s32 4294967295, %s5136_s27   ;;  %p4713_p0 = scmp.ge.s32.totalorder %s5136_s27, 1  ;;  %s5136_s27 = sphi %s5195_s27, %s18_s27  }
   0x2   : > { %p292_p1 = scmp.lt.s32.totalorder %s5136_s27, 5 }
   0x4   : > { %p293_p2 = pnand %p4713_p0, %p292_p1 }
   0x6   : > { %296 = sbr.rel (%p293_p2) target bundleno = 2134 (0x856), region = 52 }
   0xd   : > { %s337_s29 = smul.u32 51, %s5201_s28  ;;  %p4719_p4 = scmp.ne.s32.totalorder %s5201_s28, 0 }
   0xe   : > { %vm368_vm0 = vcmask (!%p4719_p4), 556032   ;;  %v5138_v0 = vmov (!%p4719_p4), 0.0  }
   0xf   : > { %p338_p3 = scmp.lt.s32.totalorder %s337_s29, 203  ;;  %366 = sbr.rel (%p4719_p4) target bundleno = 31 (0x1f), region = 56  ;;  %367 = vst [vmem:[#allocation2] sm:$0xff] (!%p4719_p4), %v5138_v0  ;;  %370 = vst [vmem:[#allocation2 + $0x10] sm:$0xff] (!%p4719_p4), %v5138_v0 }
  0x10   : > { %372 = vst [vmem:[#allocation2 + $0x20] sm:$0xff] (!%p4719_p4), %v5138_v0  ;;  %374 = vst [vmem:[#allocation2 + $0x30] sm:$0xff] (!%p4719_p4), %v5138_v0 }
  0x11   : > { %s8020_s29 = smov (!%p338_p3, %s337_s29), 203  ;;  %376 = vst [vmem:[#allocation2 + $0x40] sm:$0xff] (!%p4719_p4), %v5138_v0  ;;  %378 = vst [vmem:[#allocation2 + $0x50] sm:$0xff] (!%p4719_p4), %v5138_v0 }
  0x12   : > { %s4777_s30 = sshll.u32 %s8020_s29, 4  ;;  %s4716_s9 = sshll.u32 %s8020_s29, 2  ;;  %380 = vst [vmem:[#allocation2 + $0x60] sm:$0xff] (!%p4719_p4), %v5138_v0  ;;  %382 = vst [vmem:[#allocation2 + $0x70] sm:$0xff] (!%p4719_p4), %v5138_v0 }
  0x13   : > { %s5209_s12 = scalar_lea.vmem %s7779_s0, %s4777_s30  ;;  %s5214_s15 = scalar_lea.vmem %s7780_s1, %s4716_s9  ;;  %384 = vst [vmem:[#allocation2 + $0x80] sm:$0xff] (!%p4719_p4), %v5138_v0  ;;  %386 = vst [vmem:[#allocation2 + $0x90] sm:$0xff] (!%p4719_p4), %v5138_v0 }
  0x14   : > { %s4717_s16 = sshll.u32 %s8020_s29, 3  ;;  %388 = vst [vmem:[#allocation2 + $0xa0] sm:$0xff] (!%p4719_p4), %v5138_v0  ;;  %390 = vst [vmem:[#allocation2 + $0xb0] sm:$0xff] (!%p4719_p4), %v5138_v0 }
  0x15   : > { %s5219_s19 = scalar_lea.vmem %s7781_s2, %s4717_s16  ;;  %s5224_s22 = scalar_lea.vmem %s7782_s3, %s4717_s16  ;;  %392 = vst [vmem:[#allocation2 + $0xc0] sm:$0xff] (!%p4719_p4), %v5138_v0  ;;  %394 = vst [vmem:[#allocation2 + $0xd0] sm:$0xff] (!%p4719_p4), %v5138_v0 }
  0x16   : > { %396 = vst [vmem:[#allocation2 + $0xe0] sm:$0xff] %v5138_v0  ;;  %398 = vst [vmem:[#allocation2 + $0xf0] sm:$0xff] %v5138_v0 }
  0x17   : > { %369 = vst.msk [vmem:[#allocation2 + $0x8] sm:$0xff] %vm368_vm0, %v5138_v0  ;;  %371 = vst.msk [vmem:[#allocation2 + $0x18] sm:$0xff] %vm368_vm0, %v5138_v0 }
  0x18   : > { %373 = vst.msk [vmem:[#allocation2 + $0x28] sm:$0xff] %vm368_vm0, %v5138_v0  ;;  %375 = vst.msk [vmem:[#allocation2 + $0x38] sm:$0xff] %vm368_vm0, %v5138_v0 }
  0x19   : > { %377 = vst.msk [vmem:[#allocation2 + $0x48] sm:$0xff] %vm368_vm0, %v5138_v0  ;;  %379 = vst.msk [vmem:[#allocation2 + $0x58] sm:$0xff] %vm368_vm0, %v5138_v0 }
  0x1a   : > { %381 = vst.msk [vmem:[#allocation2 + $0x68] sm:$0xff] %vm368_vm0, %v5138_v0  ;;  %383 = vst.msk [vmem:[#allocation2 + $0x78] sm:$0xff] %vm368_vm0, %v5138_v0 }
  0x1b   : > { %385 = vst.msk [vmem:[#allocation2 + $0x88] sm:$0xff] %vm368_vm0, %v5138_v0  ;;  %387 = vst.msk [vmem:[#allocation2 + $0x98] sm:$0xff] %vm368_vm0, %v5138_v0 }
  0x1c   : > { %389 = vst.msk [vmem:[#allocation2 + $0xa8] sm:$0xff] %vm368_vm0, %v5138_v0  ;;  %391 = vst.msk [vmem:[#allocation2 + $0xb8] sm:$0xff] %vm368_vm0, %v5138_v0 }
  0x1d   : > { %393 = vst.msk [vmem:[#allocation2 + $0xc8] sm:$0xff] %vm368_vm0, %v5138_v0  ;;  %395 = vst.msk [vmem:[#allocation2 + $0xd8] sm:$0xff] %vm368_vm0, %v5138_v0 }
  0x1e   : > { %397 = vst.msk [vmem:[#allocation2 + $0xe8] sm:$0xff] %vm368_vm0, %v5138_v0  ;;  %399 = vst.msk [vmem:[#allocation2 + $0xf8] sm:$0xff] %vm368_vm0, %v5138_v0 }
  0x1f PF: > { %v5244_v1 = vld [vmem:[%s5209_s12 + $0x20] sm:$0xff]  ;;  %v5247_v2 = vld [vmem:[%s5209_s12 + $0x28] sm:$0xff]  ;;  %vm502_vm1 = vcmask 556032   ;;  %v5258_v6 = vld [vmem:[%s5209_s12 + $0x30] sm:$0xff]  ;;  %vm2743_vm2 = vcmask 195584   ;;  %vm2768_vm3 = vcmask 1043456  }
  0x20   : > { %v5250_v3 = vld [vmem:[%s5209_s12] sm:$0xff]  ;;  %v511_v4 = vsel %vm502_vm1, %v5247_v2, 0.0  ;;  %v5255_v5 = vld [vmem:[%s5209_s12 + $0x8] sm:$0xff]  ;;  %v5261_v7 = vld [vmem:[%s5209_s12 + $0x38] sm:$0xff]  ;;  %p4755_p5 = scmp.ne.s32.totalorder %s5201_s28, 3 }
  0x21   : > { %v512_v8 = vadd.f32 %v511_v4, %v5244_v1  ;;  %v503_v9 = vsel %vm502_vm1, %v5255_v5, 0.0  ;;  %v515_v10 = vsel %vm502_vm1, %v5261_v7, 0.0  ;;  %v5269_v11 = vld [vmem:[%s5209_s12 + $0x10] sm:$0xff]  ;;  %v5272_v12 = vld [vmem:[%s5209_s12 + $0x18] sm:$0xff]  ;;  %v5281_v16 = vld [vmem:[%s5209_s12 + $0x48] sm:$0xff] }
  0x22   : > { %v504_v13 = vadd.f32 %v503_v9, %v5250_v3  ;;  %v507_v14 = vsel %vm502_vm1, %v5272_v12, 0.0  ;;  %v5278_v15 = vld [vmem:[%s5209_s12 + $0x58] sm:$0xff]  ;;  %v516_v17 = vadd.f32 %v515_v10, %v5258_v6  ;;  %v5286_v19 = vld [vmem:[%s5209_s12 + $0x50] sm:$0xff]  ;;  %v5291_v21 = vld [vmem:[%s5209_s12 + $0x40] sm:$0xff]  ;;  %v519_v22 = vsel %vm502_vm1, %v5281_v16, 0.0 }
  0x23   : > { %513 = vadd.xlane.f32.xlu1 %v512_v8  ;;  %v508_v18 = vadd.f32 %v507_v14, %v5269_v11  ;;  %v523_v20 = vsel %vm502_vm1, %v5278_v15, 0.0  ;;  %v5296_v23 = vld [vmem:[%s5209_s12 + $0x78] sm:$0xff]  ;;  %v5299_v24 = vld [vmem:[%s5209_s12 + $0x68] sm:$0xff]  ;;  %v520_v26 = vadd.f32 %v519_v22, %v5291_v21  ;;  %v5304_v27 = vld [vmem:[%s5209_s12 + $0x70] sm:$0xff] }
  0x24   : > { %505 = vadd.xlane.f32.xlu0 %v504_v13  ;;  %v524_v25 = vadd.f32 %v523_v20, %v5286_v19  ;;  %v531_v28 = vsel %vm502_vm1, %v5296_v23, 0.0  ;;  %v5309_v29 = vld [vmem:[%s5209_s12 + $0x60] sm:$0xff]  ;;  %v527_v30 = vsel %vm502_vm1, %v5299_v24, 0.0  ;;  %v5314_v31 = vld [vmem:[%s5209_s12 + $0x98] sm:$0xff]  ;;  %v5317_v32 = vld [vmem:[%s5209_s12 + $0x88] sm:$0xff] }
  0x25   : > { %v532_v33 = vadd.f32 %v531_v28, %v5304_v27  ;;  %v528_v34 = vadd.f32 %v527_v30, %v5309_v29  ;;  %v5322_v35 = vld [vmem:[%s5209_s12 + $0x90] sm:$0xff]  ;;  %v539_v36 = vsel %vm502_vm1, %v5314_v31, 0.0  ;;  %v5327_v37 = vld [vmem:[%s5209_s12 + $0x80] sm:$0xff]  ;;  %v535_v38 = vsel %vm502_vm1, %v5317_v32, 0.0  ;;  %v5332_v39 = vld [vmem:[%s5209_s12 + $0xb8] sm:$0xff] }
  0x26   : > { %v5335_v40 = vld [vmem:[%s5209_s12 + $0xa8] sm:$0xff]  ;;  %v540_v41 = vadd.f32 %v539_v36, %v5322_v35  ;;  %v536_v42 = vadd.f32 %v535_v38, %v5327_v37  ;;  %v5340_v43 = vld [vmem:[%s5209_s12 + $0xb0] sm:$0xff]  ;;  %v547_v44 = vsel %vm502_vm1, %v5332_v39, 0.0  ;;  %v5345_v45 = vld [vmem:[%s5209_s12 + $0xa0] sm:$0xff] }
  0x27   : > { %517 = vadd.xlane.f32.xlu1 %v516_v17  ;;  %v543_v46 = vsel %vm502_vm1, %v5335_v40, 0.0  ;;  %v5350_v47 = vld [vmem:[%s5209_s12 + $0xd8] sm:$0xff]  ;;  %v5353_v48 = vld [vmem:[%s5209_s12 + $0xc8] sm:$0xff]  ;;  %v548_v49 = vadd.f32 %v547_v44, %v5340_v43  ;;  %v5358_v51 = vld [vmem:[%s5209_s12 + $0xd0] sm:$0xff] }
  0x28   : > { %509 = vadd.xlane.f32.xlu0 %v508_v18  ;;  %v544_v50 = vadd.f32 %v543_v46, %v5345_v45  ;;  %v555_v52 = vsel %vm502_vm1, %v5350_v47, 0.0  ;;  %v5363_v53 = vld [vmem:[%s5209_s12 + $0xc0] sm:$0xff]  ;;  %v551_v54 = vsel %vm502_vm1, %v5353_v48, 0.0  ;;  %v5368_v55 = vld [vmem:[%s5209_s12 + $0xf8] sm:$0xff]  ;;  %v5371_v56 = vld [vmem:[%s5209_s12 + $0xe8] sm:$0xff] }
  0x29   : > { %v556_v57 = vadd.f32 %v555_v52, %v5358_v51  ;;  %v552_v58 = vadd.f32 %v551_v54, %v5363_v53  ;;  %v5376_v59 = vld [vmem:[%s5209_s12 + $0xf0] sm:$0xff]  ;;  %v563_v60 = vsel %vm502_vm1, %v5368_v55, 0.0  ;;  %v5381_v61 = vld [vmem:[%s5209_s12 + $0xe0] sm:$0xff]  ;;  %v559_v62 = vsel %vm502_vm1, %v5371_v56, 0.0  ;;  %v5386_v63 = vld [vmem:[%s5209_s12 + $0x118] sm:$0xff] }
  0x2a   : > { %v5389_v0 = vld [vmem:[%s5209_s12 + $0x108] sm:$0xff]  ;;  %v564_v4 = vadd.f32 %v563_v60, %v5376_v59  ;;  %v560_v8 = vadd.f32 %v559_v62, %v5381_v61  ;;  %v5394_v9 = vld [vmem:[%s5209_s12 + $0x110] sm:$0xff]  ;;  %v571_v10 = vsel %vm502_vm1, %v5386_v63, 0.0  ;;  %v5399_v13 = vld [vmem:[%s5209_s12 + $0x100] sm:$0xff] }
  0x2b   : > { %525 = vadd.xlane.f32.xlu1 %v524_v25  ;;  %v567_v14 = vsel %vm502_vm1, %v5389_v0, 0.0  ;;  %v5404_v17 = vld [vmem:[%s5209_s12 + $0x138] sm:$0xff]  ;;  %v5407_v18 = vld [vmem:[%s5209_s12 + $0x128] sm:$0xff]  ;;  %v572_v20 = vadd.f32 %v571_v10, %v5394_v9  ;;  %v5412_v25 = vld [vmem:[%s5209_s12 + $0x130] sm:$0xff] }
  0x2c   : > { %521 = vadd.xlane.f32.xlu0 %v520_v26  ;;  %v568_v22 = vadd.f32 %v567_v14, %v5399_v13  ;;  %v579_v26 = vsel %vm502_vm1, %v5404_v17, 0.0  ;;  %v5417_v28 = vld [vmem:[%s5209_s12 + $0x120] sm:$0xff]  ;;  %v575_v30 = vsel %vm502_vm1, %v5407_v18, 0.0  ;;  %v5428_v36 = vld [vmem:[%s5209_s12 + $0x150] sm:$0xff]  ;;  %v5435_v44 = vld [vmem:[%s5209_s12 + $0x178] sm:$0xff] }
  0x2d   : > { %v580_v38 = vadd.f32 %v579_v26, %v5412_v25  ;;  %v5438_v46 = vld [vmem:[%s5209_s12 + $0x140] sm:$0xff]  ;;  %v5446_v52 = vld [vmem:[%s5209_s12 + $0x168] sm:$0xff]  ;;  %v5455_v60 = vld [vmem:[%s5209_s12 + $0x198] sm:$0xff] }
  0x2e   : > { %7851 = vst [vmem:[#allocation5_spill] sm:$0xff] %v5455_v60  ;;  %v5464_v10 = vld [vmem:[%s5209_s12 + $0x190] sm:$0xff] }
  0x2f   : > { %533 = vadd.xlane.f32.xlu1 %v532_v33  ;;  %v5422_v33 = vld [vmem:[%s5209_s12 + $0x158] sm:$0xff]  ;;  %7852 = vst [vmem:[#allocation6_spill] sm:$0xff] %v5464_v10 }
  0x30   : > { %529 = vadd.xlane.f32.xlu0 %v528_v34  ;;  %v5425_v34 = vld [vmem:[%s5209_s12 + $0x148] sm:$0xff] }
  0x33   : > { %541 = vadd.xlane.f32.xlu1 %v540_v41  ;;  %v576_v41 = vadd.f32 %v575_v30, %v5417_v28 }
  0x34   : > { %537 = vadd.xlane.f32.xlu0 %v536_v42  ;;  %v587_v42 = vsel %vm502_vm1, %v5422_v33, 0.0 }
  0x35   : > { %v588_v54 = vadd.f32 %v587_v42, %v5428_v36  ;;  %v5482_v42 = vld [vmem:[%s5209_s12 + $0x1a8] sm:$0xff] }
  0x36   : > { %7855 = vst [vmem:[#allocation9_spill] sm:$0xff] %v5482_v42 }
  0x37   : > { %549 = vadd.xlane.f32.xlu1 %v548_v49  ;;  %v583_v49 = vsel %vm502_vm1, %v5425_v34, 0.0 }
  0x38   : > { %545 = vadd.xlane.f32.xlu0 %v544_v50  ;;  %v5443_v50 = vld [vmem:[%s5209_s12 + $0x170] sm:$0xff]  ;;  %v584_v62 = vadd.f32 %v583_v49, %v5438_v46 }
  0x39   : > { %7850 = vst [vmem:[#allocation4_spill] sm:$0xff] %v5443_v50 }
  0x3b   : > { %557 = vadd.xlane.f32.xlu1 %v556_v57  ;;  %v595_v57 = vsel %vm502_vm1, %v5435_v44, 0.0 }
  0x3c   : > { %553 = vadd.xlane.f32.xlu0 %v552_v58  ;;  %v5452_v58 = vld [vmem:[%s5209_s12 + $0x160] sm:$0xff]  ;;  %v596_v14 = vadd.f32 %v595_v57, %v5443_v50  ;;  %v5497_v50 = vld [vmem:[%s5209_s12 + $0x1c8] sm:$0xff] }
  0x3d   : > { %7858 = vst [vmem:[#allocation12_spill] sm:$0xff] %v5497_v50 }
  0x3f   : > { %565 = vadd.xlane.f32.xlu1 %v564_v4  ;;  %v591_v4 = vsel %vm502_vm1, %v5446_v52, 0.0 }
  0x40   : > { %561 = vadd.xlane.f32.xlu0 %v560_v8  ;;  %v5461_v8 = vld [vmem:[%s5209_s12 + $0x188] sm:$0xff]  ;;  %v592_v26 = vadd.f32 %v591_v4, %v5452_v58  ;;  %v5492_v4 = vld [vmem:[%s5209_s12 + $0x1d8] sm:$0xff] }
  0x41   : > { %v599_v30 = vsel %vm502_vm1, %v5461_v8, 0.0  ;;  %7857 = vst [vmem:[#allocation11_spill] sm:$0xff] %v5492_v4 }
  0x43   : > { %573 = vadd.xlane.f32.xlu1 %v572_v20  ;;  %v603_v20 = vsel %vm502_vm1, %v5455_v60, 0.0  ;;  %v607_v60 = vsel %vm502_vm1, %v5482_v42, 0.0  ;;  %v5512_v42 = vld [vmem:[%s5209_s12 + $0x1f8] sm:$0xff] }
  0x44   : > { %569 = vadd.xlane.f32.xlu0 %v568_v22  ;;  %v5470_v22 = vld [vmem:[%s5209_s12 + $0x180] sm:$0xff]  ;;  %v604_v49 = vadd.f32 %v603_v20, %v5464_v10  ;;  %v5501_v20 = vld [vmem:[%s5209_s12 + $0x1d0] sm:$0xff]  ;;  %v615_v10 = vsel %vm502_vm1, %v5497_v50, 0.0  ;;  %7861 = vst [vmem:[#allocation15_spill] sm:$0xff] %v5512_v42 }
  0x45   : > { %v600_v57 = vadd.f32 %v599_v30, %v5470_v22  ;;  %7859 = vst [vmem:[#allocation13_spill] sm:$0xff] %v5501_v20  ;;  %v619_v30 = vsel %vm502_vm1, %v5492_v4, 0.0  ;;  %v627_v4 = vsel %vm502_vm1, %v5512_v42, 0.0 }
  0x47   : > { %581 = vadd.xlane.f32.xlu1 %v580_v38  ;;  %v5476_v38 = vld [vmem:[%s5209_s12 + $0x1b8] sm:$0xff] }
  0x48   : > { %577 = vadd.xlane.f32.xlu0 %v576_v41  ;;  %7853 = vst [vmem:[#allocation7_spill] sm:$0xff] %v5476_v38  ;;  %v5479_v41 = vld [vmem:[%s5209_s12 + $0x1b0] sm:$0xff] }
  0x49   : > { %7854 = vst [vmem:[#allocation8_spill] sm:$0xff] %v5479_v41 }
  0x4b   : > { %589 = vadd.xlane.f32.xlu1 %v588_v54  ;;  %v5486_v54 = vld [vmem:[%s5209_s12 + $0x1a0] sm:$0xff] }
  0x4c   : > { %585 = vadd.xlane.f32.xlu0 %v584_v62  ;;  %7856 = vst [vmem:[#allocation10_spill] sm:$0xff] %v5486_v54  ;;  %v611_v62 = vsel %vm502_vm1, %v5476_v38, 0.0  ;;  %v5507_v38 = vld [vmem:[%s5209_s12 + $0x1c0] sm:$0xff] }
  0x4d   : > { %7860 = vst [vmem:[#allocation14_spill] sm:$0xff] %v5507_v38 }
  0x4f   : > { %597 = vadd.xlane.f32.xlu1 %v596_v14  ;;  %v612_v14 = vadd.f32 %v611_v62, %v5479_v41  ;;  %v5520_v62 = vld [vmem:[%s5209_s12 + $0x1f0] sm:$0xff]  ;;  %v5525_v41 = vld [vmem:[%s5209_s12 + $0x1e0] sm:$0xff] }
  0x50   : > { %593 = vadd.xlane.f32.xlu0 %v592_v26  ;;  %v608_v26 = vadd.f32 %v607_v60, %v5486_v54  ;;  %v616_v60 = vadd.f32 %v615_v10, %v5507_v38  ;;  %7863 = vst [vmem:[#allocation17_spill] sm:$0xff] %v5520_v62  ;;  %7864 = vst [vmem:[#allocation18_spill] sm:$0xff] %v5525_v41  ;;  %v5530_v54 = vld [vmem:[%s5209_s12 + $0x218] sm:$0xff]  ;;  %v628_v10 = vadd.f32 %v627_v4, %v5520_v62  ;;  %v5561_v62 = vld [vmem:[%s5209_s12 + $0x220] sm:$0xff] }
  0x51   : > { %7865 = vst [vmem:[#allocation19_spill] sm:$0xff] %v5530_v54  ;;  %v635_v42 = vsel %vm502_vm1, %v5530_v54, 0.0  ;;  %v5548_v38 = vld [vmem:[%s5209_s12 + $0x238] sm:$0xff]  ;;  %7872 = vst [vmem:[#allocation26_spill] sm:$0xff] %v5561_v62 }
  0x52   : > { %7869 = vst [vmem:[#allocation23_spill] sm:$0xff] %v5548_v38  ;;  %v643_v54 = vsel %vm502_vm1, %v5548_v38, 0.0 }
  0x53   : > { %605 = vadd.xlane.f32.xlu1 %v604_v49  ;;  %v5515_v49 = vld [vmem:[%s5209_s12 + $0x1e8] sm:$0xff] }
  0x54   : > { %601 = vadd.xlane.f32.xlu0 %v600_v57  ;;  %7862 = vst [vmem:[#allocation16_spill] sm:$0xff] %v5515_v49  ;;  %v620_v57 = vadd.f32 %v619_v30, %v5501_v20  ;;  %v623_v50 = vsel %vm502_vm1, %v5515_v49, 0.0  ;;  %v5538_v30 = vld [vmem:[%s5209_s12 + $0x210] sm:$0xff]  ;;  %v5543_v20 = vld [vmem:[%s5209_s12 + $0x200] sm:$0xff] }
  0x55   : > { %7867 = vst [vmem:[#allocation21_spill] sm:$0xff] %v5538_v30  ;;  %7868 = vst [vmem:[#allocation22_spill] sm:$0xff] %v5543_v20 }
  0x57   : > { %613 = vadd.xlane.f32.xlu1 %v612_v14  ;;  %v5533_v14 = vld [vmem:[%s5209_s12 + $0x208] sm:$0xff] }
  0x58   : > { %609 = vadd.xlane.f32.xlu0 %v608_v26  ;;  %7866 = vst [vmem:[#allocation20_spill] sm:$0xff] %v5533_v14  ;;  %v624_v26 = vadd.f32 %v623_v50, %v5525_v41  ;;  %v631_v49 = vsel %vm502_vm1, %v5533_v14, 0.0  ;;  %v636_v50 = vadd.f32 %v635_v42, %v5538_v30  ;;  %v5566_v41 = vld [vmem:[%s5209_s12 + $0x258] sm:$0xff]  ;;  %v5579_v30 = vld [vmem:[%s5209_s12 + $0x240] sm:$0xff] }
  0x59   : > { %v632_v4 = vadd.f32 %v631_v49, %v5543_v20  ;;  %7873 = vst [vmem:[#allocation27_spill] sm:$0xff] %v5566_v41  ;;  %v651_v38 = vsel %vm502_vm1, %v5566_v41, 0.0  ;;  %7876 = vst [vmem:[#allocation30_spill] sm:$0xff] %v5579_v30  ;;  %v5584_v20 = vld [vmem:[%s5209_s12 + $0x278] sm:$0xff] }
  0x5a   : > { %7877 = vst [vmem:[#allocation31_spill] sm:$0xff] %v5584_v20  ;;  %v659_v41 = vsel %vm502_vm1, %v5584_v20, 0.0 }
  0x5b   : > { %621 = vadd.xlane.f32.xlu1 %v620_v57  ;;  %v5551_v57 = vld [vmem:[%s5209_s12 + $0x228] sm:$0xff] }
  0x5c   : > { %617 = vadd.xlane.f32.xlu0 %v616_v60  ;;  %7870 = vst [vmem:[#allocation24_spill] sm:$0xff] %v5551_v57  ;;  %v5556_v60 = vld [vmem:[%s5209_s12 + $0x230] sm:$0xff]  ;;  %v639_v14 = vsel %vm502_vm1, %v5551_v57, 0.0 }
  0x5d   : > { %7871 = vst [vmem:[#allocation25_spill] sm:$0xff] %v5556_v60  ;;  %v644_v42 = vadd.f32 %v643_v54, %v5556_v60  ;;  %v640_v49 = vadd.f32 %v639_v14, %v5561_v62  ;;  %v5597_v60 = vld [vmem:[%s5209_s12 + $0x260] sm:$0xff]  ;;  %v5602_v62 = vld [vmem:[%s5209_s12 + $0x298] sm:$0xff] }
  0x5e   : > { %7880 = vst [vmem:[#allocation34_spill] sm:$0xff] %v5597_v60  ;;  %7881 = vst [vmem:[#allocation35_spill] sm:$0xff] %v5602_v62  ;;  %v667_v20 = vsel %vm502_vm1, %v5602_v62, 0.0 }
  0x5f   : > { %629 = vadd.xlane.f32.xlu1 %v628_v10  ;;  %v5569_v10 = vld [vmem:[%s5209_s12 + $0x248] sm:$0xff] }
  0x60   : > { %625 = vadd.xlane.f32.xlu0 %v624_v26  ;;  %7874 = vst [vmem:[#allocation28_spill] sm:$0xff] %v5569_v10  ;;  %v5574_v26 = vld [vmem:[%s5209_s12 + $0x250] sm:$0xff]  ;;  %v647_v57 = vsel %vm502_vm1, %v5569_v10, 0.0 }
  0x61   : > { %7875 = vst [vmem:[#allocation29_spill] sm:$0xff] %v5574_v26  ;;  %v652_v54 = vadd.f32 %v651_v38, %v5574_v26  ;;  %v648_v14 = vadd.f32 %v647_v57, %v5579_v30  ;;  %v5615_v26 = vld [vmem:[%s5209_s12 + $0x280] sm:$0xff]  ;;  %v5620_v30 = vld [vmem:[%s5209_s12 + $0x2b8] sm:$0xff] }
  0x62   : > { %7884 = vst [vmem:[#allocation38_spill] sm:$0xff] %v5615_v26  ;;  %7885 = vst [vmem:[#allocation39_spill] sm:$0xff] %v5620_v30  ;;  %v675_v62 = vsel %vm502_vm1, %v5620_v30, 0.0 }
  0x63   : > { %637 = vadd.xlane.f32.xlu1 %v636_v50  ;;  %v5587_v50 = vld [vmem:[%s5209_s12 + $0x268] sm:$0xff] }
  0x64   : > { %633 = vadd.xlane.f32.xlu0 %v632_v4  ;;  %7878 = vst [vmem:[#allocation32_spill] sm:$0xff] %v5587_v50  ;;  %v5592_v4 = vld [vmem:[%s5209_s12 + $0x270] sm:$0xff]  ;;  %v655_v10 = vsel %vm502_vm1, %v5587_v50, 0.0 }
  0x65   : > { %7879 = vst [vmem:[#allocation33_spill] sm:$0xff] %v5592_v4  ;;  %v660_v38 = vadd.f32 %v659_v41, %v5592_v4  ;;  %v656_v57 = vadd.f32 %v655_v10, %v5597_v60  ;;  %v5633_v4 = vld [vmem:[%s5209_s12 + $0x2a0] sm:$0xff]  ;;  %v5638_v60 = vld [vmem:[%s5209_s12 + $0x2d8] sm:$0xff] }
  0x66   : > { %7888 = vst [vmem:[#allocation42_spill] sm:$0xff] %v5633_v4  ;;  %7889 = vst [vmem:[#allocation43_spill] sm:$0xff] %v5638_v60  ;;  %v683_v30 = vsel %vm502_vm1, %v5638_v60, 0.0 }
  0x67   : > { %645 = vadd.xlane.f32.xlu1 %v644_v42  ;;  %v5605_v42 = vld [vmem:[%s5209_s12 + $0x288] sm:$0xff] }
  0x68   : > { %641 = vadd.xlane.f32.xlu0 %v640_v49  ;;  %7882 = vst [vmem:[#allocation36_spill] sm:$0xff] %v5605_v42  ;;  %v5610_v49 = vld [vmem:[%s5209_s12 + $0x290] sm:$0xff]  ;;  %v663_v50 = vsel %vm502_vm1, %v5605_v42, 0.0 }
  0x69   : > { %7883 = vst [vmem:[#allocation37_spill] sm:$0xff] %v5610_v49  ;;  %v668_v41 = vadd.f32 %v667_v20, %v5610_v49  ;;  %v664_v10 = vadd.f32 %v663_v50, %v5615_v26  ;;  %v5651_v49 = vld [vmem:[%s5209_s12 + $0x2c0] sm:$0xff]  ;;  %v5656_v26 = vld [vmem:[%s5209_s12 + $0x2f8] sm:$0xff] }
  0x6a   : > { %7892 = vst [vmem:[#allocation46_spill] sm:$0xff] %v5651_v49  ;;  %7893 = vst [vmem:[#allocation47_spill] sm:$0xff] %v5656_v26  ;;  %v691_v60 = vsel %vm502_vm1, %v5656_v26, 0.0 }
  0x6b   : > { %653 = vadd.xlane.f32.xlu1 %v652_v54  ;;  %v5623_v54 = vld [vmem:[%s5209_s12 + $0x2a8] sm:$0xff] }
  0x6c   : > { %649 = vadd.xlane.f32.xlu0 %v648_v14  ;;  %7886 = vst [vmem:[#allocation40_spill] sm:$0xff] %v5623_v54  ;;  %v5628_v14 = vld [vmem:[%s5209_s12 + $0x2b0] sm:$0xff]  ;;  %v671_v42 = vsel %vm502_vm1, %v5623_v54, 0.0 }
  0x6d   : > { %7887 = vst [vmem:[#allocation41_spill] sm:$0xff] %v5628_v14  ;;  %v676_v20 = vadd.f32 %v675_v62, %v5628_v14  ;;  %v672_v50 = vadd.f32 %v671_v42, %v5633_v4  ;;  %v5669_v14 = vld [vmem:[%s5209_s12 + $0x2e0] sm:$0xff]  ;;  %v5674_v4 = vld [vmem:[%s5209_s12 + $0x318] sm:$0xff] }
  0x6e   : > { %7896 = vst [vmem:[#allocation50_spill] sm:$0xff] %v5674_v4  ;;  %v699_v26 = vsel %vm502_vm1, %v5674_v4, 0.0 }
  0x6f   : > { %661 = vadd.xlane.f32.xlu1 %v660_v38  ;;  %v5641_v38 = vld [vmem:[%s5209_s12 + $0x2c8] sm:$0xff] }
  0x70   : > { %657 = vadd.xlane.f32.xlu0 %v656_v57  ;;  %7890 = vst [vmem:[#allocation44_spill] sm:$0xff] %v5641_v38  ;;  %v5646_v57 = vld [vmem:[%s5209_s12 + $0x2d0] sm:$0xff]  ;;  %v679_v54 = vsel %vm502_vm1, %v5641_v38, 0.0 }
  0x71   : > { %7891 = vst [vmem:[#allocation45_spill] sm:$0xff] %v5646_v57  ;;  %v684_v62 = vadd.f32 %v683_v30, %v5646_v57  ;;  %v680_v42 = vadd.f32 %v679_v54, %v5651_v49  ;;  %v708_v57 = vmul.f32 %v5255_v5, %v5255_v5  ;;  %v712_v5 = vmul.f32 %v5247_v2, %v5247_v2 }
  0x72   : > { %v709_v2 = vmul.f32 %v5269_v11, %v5269_v11  ;;  %v713_v11 = vmul.f32 %v5258_v6, %v5258_v6  ;;  %v717_v6 = vmul.f32 %v5286_v19, %v5286_v19  ;;  %v721_v19 = vmul.f32 %v5304_v27, %v5304_v27 }
  0x73   : > { %669 = vadd.xlane.f32.xlu1 %v668_v41  ;;  %v5659_v41 = vld [vmem:[%s5209_s12 + $0x2e8] sm:$0xff]  ;;  %v809_v4 = vsel %vm502_vm1, %v708_v57, 0.0  ;;  %v817_v57 = vsel %vm502_vm1, %v712_v5, 0.0  ;;  %v725_v27 = vmul.f32 %v5322_v35, %v5322_v35  ;;  %v729_v35 = vmul.f32 %v5340_v43, %v5340_v43 }
  0x74   : > { %665 = vadd.xlane.f32.xlu0 %v664_v10  ;;  %7894 = vst [vmem:[#allocation48_spill] sm:$0xff] %v5659_v41  ;;  %v5664_v10 = vld [vmem:[%s5209_s12 + $0x2f0] sm:$0xff]  ;;  %v687_v38 = vsel %vm502_vm1, %v5659_v41, 0.0  ;;  %v5689_v41 = vld [vmem:[%s5209_s12 + $0x300] sm:$0xff]  ;;  %v733_v43 = vmul.f32 %v5358_v51, %v5358_v51  ;;  %v737_v51 = vmul.f32 %v5376_v59, %v5376_v59  ;;  %v741_v59 = vmul.f32 %v5394_v9, %v5394_v9 }
  0x75   : > { %7895 = vst [vmem:[#allocation49_spill] sm:$0xff] %v5664_v10  ;;  %v692_v30 = vadd.f32 %v691_v60, %v5664_v10  ;;  %v688_v54 = vadd.f32 %v687_v38, %v5669_v14  ;;  %v707_v38 = vmul.f32 %v5250_v3, %v5250_v3  ;;  %v5704_v10 = vld [vmem:[%s5209_s12 + $0x320] sm:$0xff]  ;;  %v711_v3 = vmul.f32 %v5244_v1, %v5244_v1 }
  0x76   : > { %v715_v1 = vmul.f32 %v5291_v21, %v5291_v21  ;;  %v719_v21 = vmul.f32 %v5309_v29, %v5309_v29  ;;  %v723_v29 = vmul.f32 %v5327_v37, %v5327_v37  ;;  %v727_v37 = vmul.f32 %v5345_v45, %v5345_v45 }
  0x77   : > { %677 = vadd.xlane.f32.xlu1 %v676_v20  ;;  %v5677_v20 = vld [vmem:[%s5209_s12 + $0x308] sm:$0xff]  ;;  %v731_v45 = vmul.f32 %v5363_v53, %v5363_v53  ;;  %v735_v53 = vmul.f32 %v5381_v61, %v5381_v61  ;;  %v739_v61 = vmul.f32 %v5399_v13, %v5399_v13  ;;  %v743_v13 = vmul.f32 %v5417_v28, %v5417_v28 }
  0x78   : > { %673 = vadd.xlane.f32.xlu0 %v672_v50  ;;  %7897 = vst [vmem:[#allocation51_spill] sm:$0xff] %v5677_v20  ;;  %v5682_v50 = vld [vmem:[%s5209_s12 + $0x310] sm:$0xff]  ;;  %v695_v49 = vsel %vm502_vm1, %v5677_v20, 0.0  ;;  %v747_v28 = vmul.f32 %v5438_v46, %v5438_v46  ;;  %v745_v9 = vmul.f32 %v5412_v25, %v5412_v25 }
  0x79   : > { %7898 = vst [vmem:[#allocation52_spill] sm:$0xff] %v5682_v50  ;;  %v700_v60 = vadd.f32 %v699_v26, %v5682_v50  ;;  %v810_v26 = vadd.f32 %v809_v4, %v707_v38  ;;  %v818_v4 = vadd.f32 %v817_v57, %v711_v3 }
  0x7b   : > { %685 = vadd.xlane.f32.xlu1 %v684_v62  ;;  %v5694_v62 = vld [vmem:[%s5209_s12 + $0x328] sm:$0xff] }
  0x7c   : > { %681 = vadd.xlane.f32.xlu0 %v680_v42  ;;  %v696_v42 = vadd.f32 %v695_v49, %v5689_v41  ;;  %v703_v20 = vsel %vm502_vm1, %v5694_v62, 0.0 }
  0x7d   : > { %v704_v49 = vadd.f32 %v703_v20, %v5704_v10 }
  0x7f   : > { %693 = vadd.xlane.f32.xlu1 %v692_v30  ;;  %v710_v30 = vmul.f32 %v5272_v12, %v5272_v12  ;;  %v714_v12 = vmul.f32 %v5261_v7, %v5261_v7  ;;  %v718_v7 = vmul.f32 %v5278_v15, %v5278_v15  ;;  %v722_v15 = vmul.f32 %v5296_v23, %v5296_v23 }
  0x80   : > { %689 = vadd.xlane.f32.xlu0 %v688_v54  ;;  %v716_v54 = vmul.f32 %v5281_v16, %v5281_v16  ;;  %v720_v16 = vmul.f32 %v5299_v24, %v5299_v24  ;;  %v724_v24 = vmul.f32 %v5317_v32, %v5317_v32  ;;  %v728_v32 = vmul.f32 %v5335_v40, %v5335_v40 }
  0x81   : > { %v813_v50 = vsel %vm502_vm1, %v710_v30, 0.0  ;;  %v821_v38 = vsel %vm502_vm1, %v714_v12, 0.0  ;;  %v829_v30 = vsel %vm502_vm1, %v718_v7, 0.0  ;;  %v837_v57 = vsel %vm502_vm1, %v722_v15, 0.0 }
  0x82   : > { %v814_v20 = vadd.f32 %v813_v50, %v709_v2  ;;  %v822_v50 = vadd.f32 %v821_v38, %v713_v11  ;;  %v833_v5 = vsel %vm502_vm1, %v720_v16, 0.0  ;;  %v830_v3 = vadd.f32 %v829_v30, %v717_v6 }
  0x83   : > { %701 = vadd.xlane.f32.xlu1 %v700_v60  ;;  %v825_v60 = vsel %vm502_vm1, %v716_v54, 0.0  ;;  %v726_v23 = vmul.f32 %v5314_v31, %v5314_v31  ;;  %v838_v54 = vadd.f32 %v837_v57, %v721_v19  ;;  %v849_v12 = vsel %vm502_vm1, %v728_v32, 0.0 }
  0x84   : > { %697 = vadd.xlane.f32.xlu0 %v696_v42  ;;  %v826_v42 = vadd.f32 %v825_v60, %v715_v1  ;;  %v732_v40 = vmul.f32 %v5353_v48, %v5353_v48  ;;  %v730_v31 = vmul.f32 %v5332_v39, %v5332_v39  ;;  %v850_v1 = vadd.f32 %v849_v12, %v727_v37 }
  0x85   : > { %v736_v48 = vmul.f32 %v5371_v56, %v5371_v56  ;;  %v734_v39 = vmul.f32 %v5350_v47, %v5350_v47  ;;  %v740_v56 = vmul.f32 %v5389_v0, %v5389_v0  ;;  %v738_v47 = vmul.f32 %v5368_v55, %v5368_v55 }
  0x86   : > { %v857_v60 = vsel %vm502_vm1, %v732_v40, 0.0  ;;  %v853_v11 = vsel %vm502_vm1, %v730_v31, 0.0  ;;  %v744_v0 = vmul.f32 %v5407_v18, %v5407_v18  ;;  %v742_v55 = vmul.f32 %v5386_v63, %v5386_v63 }
  0x87   : > { %811 = vadd.xlane.f32.xlu1 %v810_v26  ;;  %v834_v26 = vadd.f32 %v833_v5, %v719_v21  ;;  %v858_v16 = vadd.f32 %v857_v60, %v731_v45  ;;  %v854_v38 = vadd.f32 %v853_v11, %v729_v35  ;;  %v865_v7 = vsel %vm502_vm1, %v736_v48, 0.0  ;;  %v7901_v45 = vld [vmem:[#allocation5_spill] sm:$0xff]  ;;  %v7902_v60 = vld [vmem:[#allocation10_spill] sm:$0xff] }
  0x88   : > { %705 = vadd.xlane.f32.xlu0 %v704_v49  ;;  %v841_v49 = vsel %vm502_vm1, %v724_v24, 0.0  ;;  %v866_v21 = vadd.f32 %v865_v7, %v735_v53  ;;  %v873_v5 = vsel %vm502_vm1, %v740_v56, 0.0  ;;  %v869_v6 = vsel %vm502_vm1, %v738_v47, 0.0 }
  0x89   : > { %v842_v2 = vadd.f32 %v841_v49, %v723_v29  ;;  %v874_v24 = vadd.f32 %v873_v5, %v739_v61  ;;  %v870_v30 = vadd.f32 %v869_v6, %v737_v51  ;;  %v881_v15 = vsel %vm502_vm1, %v744_v0, 0.0  ;;  %v7906_v61 = vld [vmem:[#allocation14_spill] sm:$0xff]  ;;  %v7907_v6 = vld [vmem:[#allocation8_spill] sm:$0xff] }
  0x8a   : > { %v748_v18 = vmul.f32 %v5425_v34, %v5425_v34  ;;  %v746_v63 = vmul.f32 %v5404_v17, %v5404_v17  ;;  %v882_v29 = vadd.f32 %v881_v15, %v743_v13  ;;  %v752_v34 = vmul.f32 %v5446_v52, %v5446_v52 }
  0x8b   : > { %819 = vadd.xlane.f32.xlu1 %v818_v4  ;;  %v845_v4 = vsel %vm502_vm1, %v726_v23, 0.0  ;;  %v5139_v19 = vmov 0   ;;  %v750_v17 = vmul.f32 %v5422_v33, %v5422_v33  ;;  %v751_v57 = vmul.f32 %v5452_v58, %v5452_v58 }
  0x8c   : > { %815 = vadd.xlane.f32.xlu0 %v814_v20  ;;  %v846_v20 = vadd.f32 %v845_v4, %v725_v27  ;;  %v889_v49 = vsel %vm502_vm1, %v748_v18, 0.0  ;;  %4847 = vset.pattern.permute.xlu1 %v5139_v19  ;;  %v885_v32 = vsel %vm502_vm1, %v746_v63, 0.0  ;;  %v897_v25 = vsel %vm502_vm1, %v752_v34, 0.0  ;;  %v7910_v63 = vld [vmem:[#allocation18_spill] sm:$0xff] }
  0x8d   : > { %4846 = vset.pattern.permute.xlu0 %v5139_v19  ;;  %v890_v46 = vadd.f32 %v889_v49, %v747_v28  ;;  %v886_v23 = vadd.f32 %v885_v32, %v745_v9  ;;  %v749_v52 = vmul.f32 %v5428_v36, %v5428_v36  ;;  %v893_v37 = vsel %vm502_vm1, %v750_v17, 0.0  ;;  %v7899_v36 = vld [vmem:[#allocation4_spill] sm:$0xff]  ;;  %v7911_v9 = vld [vmem:[#allocation13_spill] sm:$0xff] }
  0x8e   : > { %v754_v33 = vmul.f32 %v5435_v44, %v5435_v44  ;;  %v755_v58 = vmul.f32 %v5470_v22, %v5470_v22  ;;  %v753_v4 = vmul.f32 %v7899_v36, %v7899_v36  ;;  %v759_v35 = vmul.f32 %v7902_v60, %v7902_v60  ;;  %v7912_v19 = vld [vmem:[#allocation20_spill] sm:$0xff] }
  0x8f   : > { %827 = vadd.xlane.f32.xlu1 %v826_v42  ;;  %v861_v42 = vsel %vm502_vm1, %v734_v39, 0.0  ;;  %v894_v27 = vadd.f32 %v893_v37, %v749_v52  ;;  %v765_v34 = vmul.f32 %v7911_v9, %v7911_v9  ;;  %v772_v32 = vmul.f32 %v7912_v19, %v7912_v19  ;;  %v7914_v52 = vld [vmem:[#allocation22_spill] sm:$0xff] }
  0x90   : > { %823 = vadd.xlane.f32.xlu0 %v822_v50  ;;  %v862_v50 = vadd.f32 %v861_v42, %v733_v43  ;;  %v901_v44 = vsel %vm502_vm1, %v754_v33, 0.0  ;;  %v7905_v42 = vld [vmem:[#allocation7_spill] sm:$0xff] }
  0x91   : > { %v902_v11 = vadd.f32 %v901_v44, %v753_v4  ;;  %v762_v47 = vmul.f32 %v7905_v42, %v7905_v42  ;;  %v7921_v42 = vld [vmem:[#allocation23_spill] sm:$0xff] }
  0x93   : > { %835 = vadd.xlane.f32.xlu1 %v834_v26  ;;  %v877_v26 = vsel %vm502_vm1, %v742_v55, 0.0  ;;  %v761_v55 = vmul.f32 %v7907_v6, %v7907_v6  ;;  %v917_v15 = vsel %vm502_vm1, %v762_v47, 0.0  ;;  %v778_v47 = vmul.f32 %v7921_v42, %v7921_v42 }
  0x94   : > { %831 = vadd.xlane.f32.xlu0 %v830_v3  ;;  %v878_v3 = vadd.f32 %v877_v26, %v741_v59  ;;  %v7909_v59 = vld [vmem:[#allocation11_spill] sm:$0xff] }
  0x95   : > { %v766_v18 = vmul.f32 %v7909_v59, %v7909_v59 }
  0x97   : > { %843 = vadd.xlane.f32.xlu1 %v842_v2  ;;  %v756_v2 = vmul.f32 %v5461_v8, %v5461_v8  ;;  %v7900_v8 = vld [vmem:[#allocation9_spill] sm:$0xff] }
  0x98   : > { %839 = vadd.xlane.f32.xlu0 %v838_v54  ;;  %v898_v54 = vadd.f32 %v897_v25, %v751_v57  ;;  %v760_v31 = vmul.f32 %v7900_v8, %v7900_v8  ;;  %v7913_v57 = vld [vmem:[#allocation15_spill] sm:$0xff] }
  0x99   : > { %v905_v40 = vsel %vm502_vm1, %v756_v2, 0.0  ;;  %v771_v2 = vmul.f32 %v7914_v52, %v7914_v52 }
  0x9a   : > { %v906_v22 = vadd.f32 %v905_v40, %v755_v58  ;;  %v913_v39 = vsel %vm502_vm1, %v760_v31, 0.0  ;;  %v7915_v58 = vld [vmem:[#allocation17_spill] sm:$0xff]  ;;  %v7916_v40 = vld [vmem:[#allocation24_spill] sm:$0xff]  ;;  %v7917_v31 = vld [vmem:[#allocation19_spill] sm:$0xff] }
  0x9b   : > { %851 = vadd.xlane.f32.xlu1 %v850_v1  ;;  %v776_v36 = vmul.f32 %v7916_v40, %v7916_v40  ;;  %v774_v44 = vmul.f32 %v7917_v31, %v7917_v31  ;;  %v7931_v31 = vld [vmem:[#allocation33_spill] sm:$0xff] }
  0x9c   : > { %847 = vadd.xlane.f32.xlu0 %v846_v20  ;;  %v758_v20 = vmul.f32 %v7901_v45, %v7901_v45 }
  0x9e   : > { %v909_v56 = vsel %vm502_vm1, %v758_v20, 0.0  ;;  %v7918_v20 = vld [vmem:[#allocation26_spill] sm:$0xff] }
  0x9f   : > { %859 = vadd.xlane.f32.xlu1 %v858_v16  ;;  %v7903_v16 = vld [vmem:[#allocation6_spill] sm:$0xff] }
  0xa0   : > { %855 = vadd.xlane.f32.xlu0 %v854_v38  ;;  %v757_v53 = vmul.f32 %v7903_v16, %v7903_v16  ;;  %v7904_v38 = vld [vmem:[#allocation12_spill] sm:$0xff] }
  0xa1   : > { %v764_v7 = vmul.f32 %v7904_v38, %v7904_v38 }
  0xa2   : > { %v910_v51 = vadd.f32 %v909_v56, %v757_v53  ;;  %v7920_v53 = vld [vmem:[#allocation28_spill] sm:$0xff]  ;;  %v941_v56 = vsel %vm502_vm1, %v774_v44, 0.0  ;;  %v785_v44 = vmul.f32 %v7931_v31, %v7931_v31  ;;  %v7943_v31 = vld [vmem:[#allocation51_spill] sm:$0xff] }
  0xa3   : > { %867 = vadd.xlane.f32.xlu1 %v866_v21  ;;  %v914_v21 = vadd.f32 %v913_v39, %v759_v35  ;;  %v921_v0 = vsel %vm502_vm1, %v764_v7, 0.0  ;;  %v7919_v39 = vld [vmem:[#allocation21_spill] sm:$0xff]  ;;  %v780_v38 = vmul.f32 %v7920_v53, %v7920_v53  ;;  %v7934_v53 = vld [vmem:[#allocation42_spill] sm:$0xff] }
  0xa4   : > { %863 = vadd.xlane.f32.xlu0 %v862_v50  ;;  %v763_v50 = vmul.f32 %v7906_v61, %v7906_v61  ;;  %v773_v16 = vmul.f32 %v7919_v39, %v7919_v39  ;;  %v7922_v61 = vld [vmem:[#allocation30_spill] sm:$0xff] }
  0xa5   : > { %v953_v6 = vsel %vm502_vm1, %v780_v38, 0.0  ;;  %v791_v38 = vmul.f32 %v7934_v53, %v7934_v53 }
  0xa6   : > { %v922_v26 = vadd.f32 %v921_v0, %v763_v50  ;;  %v779_v50 = vmul.f32 %v7922_v61, %v7922_v61  ;;  %v942_v0 = vadd.f32 %v941_v56, %v773_v16 }
  0xa7   : > { %875 = vadd.xlane.f32.xlu1 %v874_v24  ;;  %v7908_v24 = vld [vmem:[#allocation16_spill] sm:$0xff] }
  0xa8   : > { %871 = vadd.xlane.f32.xlu0 %v870_v30  ;;  %v768_v13 = vmul.f32 %v7908_v24, %v7908_v24 }
  0xaa   : > { %v929_v49 = vsel %vm502_vm1, %v768_v13, 0.0  ;;  %v7924_v13 = vld [vmem:[#allocation32_spill] sm:$0xff] }
  0xab   : > { %883 = vadd.xlane.f32.xlu1 %v882_v29  ;;  %v767_v29 = vmul.f32 %v7910_v63, %v7910_v63 }
  0xac   : > { %879 = vadd.xlane.f32.xlu0 %v878_v3  ;;  %v918_v3 = vadd.f32 %v917_v15, %v761_v55  ;;  %v7923_v55 = vld [vmem:[#allocation25_spill] sm:$0xff]  ;;  %v784_v15 = vmul.f32 %v7924_v13, %v7924_v13 }
  0xad   : > { %v930_v25 = vadd.f32 %v929_v49, %v767_v29  ;;  %v777_v24 = vmul.f32 %v7923_v55, %v7923_v55  ;;  %v954_v29 = vadd.f32 %v953_v6, %v779_v50  ;;  %v7936_v50 = vld [vmem:[#allocation44_spill] sm:$0xff] }
  0xae   : > { %v961_v19 = vsel %vm502_vm1, %v784_v15, 0.0 }
  0xaf   : > { %891 = vadd.xlane.f32.xlu1 %v890_v46  ;;  %v925_v46 = vsel %vm502_vm1, %v766_v18, 0.0  ;;  %v949_v18 = vsel %vm502_vm1, %v778_v47, 0.0 }
  0xb0   : > { %887 = vadd.xlane.f32.xlu0 %v886_v23  ;;  %v5823_v12 = vpop.xlane.xlu1 %513  ;;  %v770_v23 = vmul.f32 %v7913_v57, %v7913_v57  ;;  %v926_v33 = vadd.f32 %v925_v46, %v765_v34  ;;  %v950_v34 = vadd.f32 %v949_v18, %v777_v24  ;;  %v7928_v57 = vld [vmem:[#allocation36_spill] sm:$0xff]  ;;  %v7937_v24 = vld [vmem:[#allocation39_spill] sm:$0xff]  ;;  %v7938_v18 = vld [vmem:[#allocation46_spill] sm:$0xff] }
  0xb1   : > { %v5830_v1 = vpop.xlane.xlu0 %505  ;;  %v794_v13 = vmul.f32 %v7937_v24, %v7937_v24  ;;  %v807_v24 = vmul.f32 %v5704_v10, %v5704_v10 }
  0xb2   : > { %v933_v8 = vsel %vm502_vm1, %v770_v23, 0.0  ;;  %v788_v23 = vmul.f32 %v7928_v57, %v7928_v57 }
  0xb3   : > { %899 = vadd.xlane.f32.xlu1 %v898_v54  ;;  %v937_v54 = vsel %vm502_vm1, %v772_v32, 0.0  ;;  %v7927_v32 = vld [vmem:[#allocation29_spill] sm:$0xff]  ;;  %v981_v57 = vsel %vm502_vm1, %v794_v13, 0.0 }
  0xb4   : > { %895 = vadd.xlane.f32.xlu0 %v894_v27  ;;  %v5837_v48 = vpop.xlane.xlu1 %517  ;;  %v769_v27 = vmul.f32 %v7915_v58, %v7915_v58  ;;  %v938_v45 = vadd.f32 %v937_v54, %v771_v2  ;;  %v781_v46 = vmul.f32 %v7927_v32, %v7927_v32  ;;  %v7929_v2 = vld [vmem:[#allocation31_spill] sm:$0xff]  ;;  %v7930_v58 = vld [vmem:[#allocation38_spill] sm:$0xff] }
  0xb5   : > { %v5844_v43 = vpop.xlane.xlu0 %509 }
  0xb6   : > { %v934_v35 = vadd.f32 %v933_v8, %v769_v27  ;;  %v787_v27 = vmul.f32 %v7930_v58, %v7930_v58  ;;  %v969_v8 = vsel %vm502_vm1, %v788_v23, 0.0  ;;  %v7941_v23 = vld [vmem:[#allocation43_spill] sm:$0xff] }
  0xb7   : > { %907 = vadd.xlane.f32.xlu1 %v906_v22  ;;  %v775_v22 = vmul.f32 %v7918_v20, %v7918_v20 }
  0xb8   : > { %903 = vadd.xlane.f32.xlu0 %v902_v11  ;;  %v5851_v5 = vpop.xlane.xlu1 %525  ;;  %v945_v11 = vsel %vm502_vm1, %v776_v36, 0.0  ;;  %v970_v16 = vadd.f32 %v969_v8, %v787_v27 }
  0xb9   : > { %v5858_v30 = vpop.xlane.xlu0 %521 }
  0xbb   : > { %915 = vadd.xlane.f32.xlu1 %v914_v21  ;;  %v946_v21 = vadd.f32 %v945_v11, %v775_v22  ;;  %v7933_v11 = vld [vmem:[#allocation35_spill] sm:$0xff] }
  0xbc   : > { %911 = vadd.xlane.f32.xlu0 %v910_v51  ;;  %v5865_v28 = vpop.xlane.xlu1 %533  ;;  %v790_v39 = vmul.f32 %v7933_v11, %v7933_v11 }
  0xbd   : > { %v5872_v17 = vpop.xlane.xlu0 %529 }
  0xbe   : > { %v973_v55 = vsel %vm502_vm1, %v790_v39, 0.0  ;;  %v803_v39 = vmul.f32 %v5689_v41, %v5689_v41 }
  0xbf   : > { %923 = vadd.xlane.f32.xlu1 %v922_v26  ;;  %v7925_v26 = vld [vmem:[#allocation27_spill] sm:$0xff] }
  0xc0   : > { %919 = vadd.xlane.f32.xlu0 %v918_v3  ;;  %v5879_v37 = vpop.xlane.xlu1 %541  ;;  %v782_v63 = vmul.f32 %v7925_v26, %v7925_v26  ;;  %v7926_v3 = vld [vmem:[#allocation34_spill] sm:$0xff]  ;;  %v795_v26 = vmul.f32 %v7938_v18, %v7938_v18 }
  0xc1   : > { %v5886_v4 = vpop.xlane.xlu0 %537  ;;  %v783_v49 = vmul.f32 %v7926_v3, %v7926_v3 }
  0xc2   : > { %v957_v52 = vsel %vm502_vm1, %v782_v63, 0.0 }
  0xc3   : > { %931 = vadd.xlane.f32.xlu1 %v930_v25  ;;  %v962_v54 = vadd.f32 %v961_v19, %v783_v49  ;;  %v958_v36 = vadd.f32 %v957_v52, %v781_v46  ;;  %v7939_v49 = vld [vmem:[#allocation41_spill] sm:$0xff]  ;;  %v7940_v19 = vld [vmem:[#allocation48_spill] sm:$0xff]  ;;  %v798_v52 = vmul.f32 %v7941_v23, %v7941_v23 }
  0xc4   : > { %927 = vadd.xlane.f32.xlu0 %v926_v33  ;;  %v5893_v60 = vpop.xlane.xlu1 %549  ;;  %v786_v33 = vmul.f32 %v7929_v2, %v7929_v2  ;;  %v800_v32 = vmul.f32 %v7940_v19, %v7940_v19 }
  0xc5   : > { %v5900_v7 = vpop.xlane.xlu0 %545 }
  0xc6   : > { %v993_v27 = vsel %vm502_vm1, %v800_v32, 0.0 }
  0xc7   : > { %939 = vadd.xlane.f32.xlu1 %v938_v45  ;;  %v7932_v45 = vld [vmem:[#allocation40_spill] sm:$0xff] }
  0xc8   : > { %935 = vadd.xlane.f32.xlu0 %v934_v35  ;;  %v5907_v51 = vpop.xlane.xlu1 %557  ;;  %v792_v20 = vmul.f32 %v7932_v45, %v7932_v45  ;;  %v965_v35 = vsel %vm502_vm1, %v786_v33, 0.0  ;;  %v799_v33 = vmul.f32 %v5669_v14, %v5669_v14 }
  0xc9   : > { %v5914_v59 = vpop.xlane.xlu0 %553  ;;  %v966_v42 = vadd.f32 %v965_v35, %v785_v44  ;;  %v804_v44 = vmul.f32 %v7943_v31, %v7943_v31  ;;  %v7944_v35 = vld [vmem:[#allocation47_spill] sm:$0xff] }
  0xca   : > { %v977_v47 = vsel %vm502_vm1, %v792_v20, 0.0  ;;  %v989_v20 = vsel %vm502_vm1, %v798_v52, 0.0  ;;  %v802_v11 = vmul.f32 %v7944_v35, %v7944_v35  ;;  %v994_v14 = vadd.f32 %v993_v27, %v799_v33 }
  0xcb   : > { %947 = vadd.xlane.f32.xlu1 %v946_v21  ;;  %v7935_v21 = vld [vmem:[#allocation37_spill] sm:$0xff]  ;;  %v978_v15 = vadd.f32 %v977_v47, %v791_v38  ;;  %v1001_v38 = vsel %vm502_vm1, %v804_v44, 0.0 }
  0xcc   : > { %943 = vadd.xlane.f32.xlu0 %v942_v0  ;;  %v5921_v9 = vpop.xlane.xlu1 %565  ;;  %v789_v61 = vmul.f32 %v7935_v21, %v7935_v21  ;;  %v796_v0 = vmul.f32 %v7936_v50, %v7936_v50  ;;  %v808_v21 = vmul.f32 %v5694_v62, %v5694_v62  ;;  %v997_v50 = vsel %vm502_vm1, %v802_v11, 0.0 }
  0xcd   : > { %v5928_v25 = vpop.xlane.xlu0 %561  ;;  %v1002_v41 = vadd.f32 %v1001_v38, %v803_v39 }
  0xce   : > { %v985_v3 = vsel %vm502_vm1, %v796_v0, 0.0  ;;  %v7948_v0 = vld [vmem:[#allocation50_spill] sm:$0xff]  ;;  %v1009_v18 = vsel %vm502_vm1, %v808_v21, 0.0 }
  0xcf   : > { %955 = vadd.xlane.f32.xlu1 %v954_v29  ;;  %v974_v29 = vadd.f32 %v973_v55, %v789_v61  ;;  %v986_v2 = vadd.f32 %v985_v3, %v795_v26  ;;  %v806_v55 = vmul.f32 %v7948_v0, %v7948_v0  ;;  %v7950_v26 = vld [vmem:[#allocation52_spill] sm:$0xff] }
  0xd0   : > { %951 = vadd.xlane.f32.xlu0 %v950_v34  ;;  %v5935_v40 = vpop.xlane.xlu1 %573  ;;  %v793_v34 = vmul.f32 %v7939_v49, %v7939_v49  ;;  %v805_v62 = vmul.f32 %v7950_v26, %v7950_v26  ;;  %v1010_v49 = vadd.f32 %v1009_v18, %v807_v24  ;;  %v6064_v24 = vmul.f32 0.0051020407, %v5844_v43 }
  0xd1   : > { %v5942_v22 = vpop.xlane.xlu0 %569  ;;  %v1005_v3 = vsel %vm502_vm1, %v806_v55, 0.0  ;;  %v6074_v43 = vmul.f32 0.0051020407, %v5858_v30 }
  0xd2   : > { %v982_v58 = vadd.f32 %v981_v57, %v793_v34  ;;  %v1006_v19 = vadd.f32 %v1005_v3, %v805_v62 }
  0xd3   : > { %963 = vadd.xlane.f32.xlu1 %v962_v54 }
  0xd4   : > { %959 = vadd.xlane.f32.xlu0 %v958_v36  ;;  %v5949_v56 = vpop.xlane.xlu1 %581  ;;  %v7942_v36 = vld [vmem:[#allocation45_spill] sm:$0xff] }
  0xd5   : > { %v5956_v6 = vpop.xlane.xlu0 %577  ;;  %v797_v8 = vmul.f32 %v7942_v36, %v7942_v36 }
  0xd7   : > { %971 = vadd.xlane.f32.xlu1 %v970_v16  ;;  %v990_v53 = vadd.f32 %v989_v20, %v797_v8 }
  0xd8   : > { %967 = vadd.xlane.f32.xlu0 %v966_v42  ;;  %v5963_v63 = vpop.xlane.xlu1 %589  ;;  %v7946_v42 = vld [vmem:[#allocation49_spill] sm:$0xff] }
  0xd9   : > { %v5970_v46 = vpop.xlane.xlu0 %585  ;;  %v801_v47 = vmul.f32 %v7946_v42, %v7946_v42  ;;  %v1013_v42 = vmul.f32 0.0051020407, %v5830_v1 }
  0xdb   : > { %979 = vadd.xlane.f32.xlu1 %v978_v15  ;;  %v998_v15 = vadd.f32 %v997_v50, %v801_v47  ;;  %v6059_v50 = vmul.f32 0.0051020407, %v5823_v12  ;;  %v1115_v0 = vmul.f32 %v1013_v42, %v1013_v42  ;;  %v1116_v12 = vmul.f32 %v6064_v24, %v6064_v24 }
  0xdc   : > { %975 = vadd.xlane.f32.xlu0 %v974_v29  ;;  %v5977_v54 = vpop.xlane.xlu1 %597 }
  0xdd   : > { %v5984_v45 = vpop.xlane.xlu0 %593  ;;  %v1117_v26 = vmul.f32 %v6059_v50, %v6059_v50 }
  0xdf   : > { %987 = vadd.xlane.f32.xlu1 %v986_v2 }
  0xe0   : > { %983 = vadd.xlane.f32.xlu0 %v982_v58  ;;  %v5991_v16 = vpop.xlane.xlu1 %605 }
  0xe1   : > { %7945 = vst [vmem:[#allocation4_spill] sm:$0xff] %v5991_v16  ;;  %v5998_v61 = vpop.xlane.xlu0 %601 }
  0xe2   : > { %7947 = vst [vmem:[#allocation9_spill] sm:$0xff] %v5998_v61  ;;  %v1228_v61 = vld [vmem:[%s5219_s19 + $0x58] sm:$0xff] }
  0xe3   : > { %995 = vadd.xlane.f32.xlu1 %v994_v14 }
  0xe4   : > { %991 = vadd.xlane.f32.xlu0 %v990_v53  ;;  %v6005_v13 = vpop.xlane.xlu1 %613 }
  0xe5   : > { %7949 = vst [vmem:[#allocation5_spill] sm:$0xff] %v6005_v13  ;;  %v6010_v29 = vpop.xlane.xlu0 %609 }
  0xe6   : > { %7951 = vst [vmem:[#allocation10_spill] sm:$0xff] %v6010_v29 }
  0xe7   : > { %1003 = vadd.xlane.f32.xlu1 %v1002_v41 }
  0xe8   : > { %999 = vadd.xlane.f32.xlu0 %v998_v15  ;;  %v6013_v34 = vpop.xlane.xlu1 %621 }
  0xe9   : > { %7952 = vst [vmem:[#allocation6_spill] sm:$0xff] %v6013_v34  ;;  %v6015_v10 = vpop.xlane.xlu0 %617 }
  0xea   : > { %7953 = vst [vmem:[#allocation12_spill] sm:$0xff] %v6015_v10 }
  0xeb   : > { %1011 = vadd.xlane.f32.xlu1 %v1010_v49  ;;  %v6069_v49 = vmul.f32 0.0051020407, %v5837_v48 }
  0xec   : > { %1007 = vadd.xlane.f32.xlu0 %v1006_v19  ;;  %v6017_v32 = vpop.xlane.xlu1 %629 }
  0xed   : > { %7954 = vst [vmem:[#allocation7_spill] sm:$0xff] %v6017_v32  ;;  %v6019_v57 = vpop.xlane.xlu0 %625 }
  0xee   : > { %7955 = vst [vmem:[#allocation14_spill] sm:$0xff] %v6019_v57  ;;  %v6090_v57 = vmul.f32 0.0051020407, %v5879_v37 }
  0xf0   : > { %v6021_v23 = vpop.xlane.xlu1 %637  ;;  %v1124_v37 = vmul.f32 %v6090_v57, %v6090_v57 }
  0xf1   : > { %v6023_v52 = vpop.xlane.xlu0 %633 }
  0xf4   : > { %v6025_v2 = vpop.xlane.xlu1 %645 }
  0xf5   : > { %v6027_v33 = vpop.xlane.xlu0 %641 }
  0xf8   : > { %v6029_v58 = vpop.xlane.xlu1 %653 }
  0xf9   : > { %v6031_v27 = vpop.xlane.xlu0 %649 }
  0xfc   : > { %v6033_v36 = vpop.xlane.xlu1 %661 }
  0xfd   : > { %v6035_v8 = vpop.xlane.xlu0 %657 }
 0x100   : > { %v6037_v31 = vpop.xlane.xlu1 %669 }
 0x101   : > { %v6039_v44 = vpop.xlane.xlu0 %665 }
 0x104   : > { %v6041_v20 = vpop.xlane.xlu1 %677 }
 0x105   : > { %7956 = vst [vmem:[#allocation8_spill] sm:$0xff] %v6041_v20  ;;  %v6043_v35 = vpop.xlane.xlu0 %673 }
 0x106   : > { %7957 = vst [vmem:[#allocation16_spill] sm:$0xff] %v6043_v35 }
 0x108   : > { %v6045_v11 = vpop.xlane.xlu1 %685 }
 0x109   : > { %7958 = vst [vmem:[#allocation11_spill] sm:$0xff] %v6045_v11  ;;  %v6047_v14 = vpop.xlane.xlu0 %681 }
 0x10a   : > { %7959 = vst [vmem:[#allocation18_spill] sm:$0xff] %v6047_v14 }
 0x10c   : > { %v6049_v39 = vpop.xlane.xlu1 %693 }
 0x10d   : > { %7960 = vst [vmem:[#allocation13_spill] sm:$0xff] %v6049_v39  ;;  %v6051_v53 = vpop.xlane.xlu0 %689 }
 0x10e   : > { %7961 = vst [vmem:[#allocation20_spill] sm:$0xff] %v6051_v53 }
 0x110   : > { %v6053_v38 = vpop.xlane.xlu1 %701 }
 0x111   : > { %7962 = vst [vmem:[#allocation15_spill] sm:$0xff] %v6053_v38  ;;  %v6056_v47 = vpop.xlane.xlu0 %697  ;;  %v6079_v38 = vmul.f32 0.0051020407, %v5851_v5 }
 0x112   : > { %7963 = vst [vmem:[#allocation22_spill] sm:$0xff] %v6056_v47 }
 0x113   : > { %v1120_v5 = vmul.f32 %v6079_v38, %v6079_v38 }
 0x114   : > { %v812_v21 = vpop.xlane.xlu1 %811 }
 0x115   : > { %v1064_v55 = vmul.f32 0.0051020407, %v812_v21  ;;  %v6061_v41 = vpop.xlane.xlu0 %705 }
 0x116   : > { %7964 = vst [vmem:[#allocation17_spill] sm:$0xff] %v6061_v41 }
 0x117   : > { %v1166_v15 = vsub.f32 %v1064_v55, %v1115_v0 }
 0x118   : > { %v820_v18 = vpop.xlane.xlu1 %819 }
 0x119   : > { %v1268_v62 = vadd.f32 1e-05, %v1166_v15  ;;  %v1066_v1 = vmul.f32 0.0051020407, %v820_v18  ;;  %v816_v3 = vpop.xlane.xlu0 %815  ;;  %v1118_v15 = vmul.f32 %v6069_v49, %v6069_v49 }
 0x11a   : > { %v1065_v19 = vmul.f32 0.0051020407, %v816_v3 }
 0x11b   : > { %4874 = vrsqrt.f32 %v1268_v62  ;;  %v1168_v21 = vsub.f32 %v1066_v1, %v1117_v26  ;;  %v1119_v26 = vmul.f32 %v6074_v43, %v6074_v43 }
 0x11c   : > { %v1167_v0 = vsub.f32 %v1065_v19, %v1116_v12  ;;  %v828_v55 = vpop.xlane.xlu1 %827 }
 0x11d   : > { %v1270_v41 = vadd.f32 1e-05, %v1168_v21  ;;  %v824_v47 = vpop.xlane.xlu0 %823  ;;  %v1068_v48 = vmul.f32 0.0051020407, %v828_v55  ;;  %v6084_v21 = vmul.f32 0.0051020407, %v5872_v17 }
 0x11e   : > { %v1269_v18 = vadd.f32 1e-05, %v1167_v0  ;;  %v1067_v32 = vmul.f32 0.0051020407, %v824_v47  ;;  %v1217_v0 = vld [vmem:[%s5219_s19] sm:$0xff] }
 0x11f   : > { %v1170_v3 = vsub.f32 %v1068_v48, %v1119_v26  ;;  %v1121_v17 = vmul.f32 %v6084_v21, %v6084_v21  ;;  %v6095_v26 = vmul.f32 0.0051020407, %v5865_v28 }
 0x120   : > { %4876 = vrsqrt.f32 %v1269_v18  ;;  %v1169_v30 = vsub.f32 %v1067_v32, %v1118_v15  ;;  %v836_v62 = vpop.xlane.xlu1 %835 }
 0x121   : > { %v832_v1 = vpop.xlane.xlu0 %831  ;;  %4878 = vrsqrt.f32 %v1270_v41  ;;  %v1070_v32 = vmul.f32 0.0051020407, %v836_v62  ;;  %v1272_v18 = vadd.f32 1e-05, %v1170_v3  ;;  %v6103_v62 = vmul.f32 0.0051020407, %v5893_v60 }
 0x122   : > { %v1271_v12 = vadd.f32 1e-05, %v1169_v30  ;;  %v1069_v19 = vmul.f32 0.0051020407, %v832_v1  ;;  %v1218_v1 = vld [vmem:[%s5219_s19 + $0x8] sm:$0xff]  ;;  %v1219_v60 = vld [vmem:[%s5219_s19 + $0x10] sm:$0xff] }
 0x123   : > { %v1172_v3 = vsub.f32 %v1070_v32, %v1121_v17  ;;  %v1126_v32 = vmul.f32 %v6103_v62, %v6103_v62 }
 0x124   : > { %v844_v47 = vpop.xlane.xlu1 %843  ;;  %4880 = vrsqrt.f32 %v1271_v12  ;;  %v1171_v41 = vsub.f32 %v1069_v19, %v1120_v5 }
 0x125   : > { %v4875_v55 = vpop.eup %4874  ;;  %v840_v15 = vpop.xlane.xlu0 %839  ;;  %4882 = vrsqrt.f32 %v1272_v18  ;;  %v6116_v18 = vmul.f32 0.0051020407, %v5907_v51 }
 0x126   : > { %v1370_v48 = vmul.f32 %v4875_v55, %v1217_v0  ;;  %v1273_v0 = vadd.f32 1e-05, %v1171_v41  ;;  %v1071_v5 = vmul.f32 0.0051020407, %v840_v15  ;;  %v6106_v55 = vmul.f32 0.0051020407, %v5886_v4 }
 0x127   : > { %v1274_v15 = vadd.f32 1e-05, %v1172_v3  ;;  %v1072_v41 = vmul.f32 0.0051020407, %v844_v47  ;;  %v1220_v47 = vld [vmem:[%s5219_s19 + $0x18] sm:$0xff]  ;;  %v1128_v13 = vmul.f32 %v6116_v18, %v6116_v18 }
 0x128   : > { %v852_v30 = vpop.xlane.xlu1 %851  ;;  %1576 = vperm.xlu0 %4846, %v1370_v48   ;;  %v6098_v53 = vmul.f32 %v1370_v48, %v1013_v42  ;;  %v1122_v48 = vmul.f32 %v6095_v26, %v6095_v26  ;;  %4884 = vrsqrt.f32 %v1273_v0  ;;  %v6130_v0 = vmul.f32 0.0051020407, %v5921_v9 }
 0x129   : > { %v848_v12 = vpop.xlane.xlu0 %847 }
 0x12a   : > { %v4877_v19 = vpop.eup %4876  ;;  %v1073_v28 = vmul.f32 0.0051020407, %v848_v12  ;;  %v1173_v17 = vsub.f32 %v1071_v5, %v1122_v48  ;;  %v1074_v5 = vmul.f32 0.0051020407, %v852_v30  ;;  %v1221_v30 = vld [vmem:[%s5219_s19 + $0x20] sm:$0xff] }
 0x12b   : > { %v6108_v39 = vmul.f32 %v4877_v19, %v1218_v1  ;;  %v4879_v42 = vpop.eup %4878  ;;  %v6122_v19 = vmul.f32 0.0051020407, %v5900_v7 }
 0x12c   : > { %v1175_v10 = vsub.f32 %v1073_v28, %v1124_v37  ;;  %v860_v34 = vpop.xlane.xlu1 %859  ;;  %v1123_v37 = vmul.f32 %v6106_v55, %v6106_v55  ;;  %v6124_v28 = vmul.f32 %v4879_v42, %v1219_v60  ;;  %v1275_v42 = vadd.f32 1e-05, %v1173_v17 }
 0x12d   : > { %1581 = vperm.xlu1 %4847, %v6108_v39   ;;  %v856_v4 = vpop.xlane.xlu0 %855 }
 0x12e   : > { %v1277_v1 = vadd.f32 1e-05, %v1175_v10  ;;  %v1075_v12 = vmul.f32 0.0051020407, %v856_v4  ;;  %v4881_v51 = vpop.eup %4880  ;;  %v1174_v10 = vsub.f32 %v1072_v41, %v1123_v37 }
 0x12f   : > { %v6135_v4 = vmul.f32 %v4881_v51, %v1220_v47  ;;  %v1076_v51 = vmul.f32 0.0051020407, %v860_v34 }
 0x130   : > { %4886 = vrsqrt.f32 %v1277_v1  ;;  %v1177_v29 = vsub.f32 %v1075_v12, %v1126_v32  ;;  %v868_v3 = vpop.xlane.xlu1 %867  ;;  %v1125_v32 = vmul.f32 %v6122_v19, %v6122_v19  ;;  %v4883_v1 = vpop.eup %4882  ;;  %v6138_v12 = vmul.f32 0.0051020407, %v5914_v59 }
 0x131   : > { %1586 = vperm.xlu1 %4847, %v6124_v28   ;;  %v864_v7 = vpop.xlane.xlu0 %863  ;;  %4888 = vrsqrt.f32 %v1274_v15  ;;  %v1130_v15 = vmul.f32 %v6130_v0, %v6130_v0 }
 0x132   : > { %v1279_v48 = vadd.f32 1e-05, %v1177_v29  ;;  %v1077_v60 = vmul.f32 0.0051020407, %v864_v7  ;;  %v1276_v29 = vadd.f32 1e-05, %v1174_v10  ;;  %v1176_v17 = vsub.f32 %v1074_v5, %v1125_v32 }
 0x133   : > { %v6146_v7 = vmul.f32 %v4883_v1, %v1221_v30  ;;  %v1222_v5 = vld [vmem:[%s5219_s19 + $0x28] sm:$0xff]  ;;  %v1078_v30 = vmul.f32 0.0051020407, %v868_v3 }
 0x134   : > { %4890 = vrsqrt.f32 %v1279_v48  ;;  %v1179_v9 = vsub.f32 %v1077_v60, %v1128_v13  ;;  %v6140_v41 = vpop.xlane.xlu1 %875  ;;  %v4885_v13 = vpop.eup %4884  ;;  %v1127_v48 = vmul.f32 %v6138_v12, %v6138_v12  ;;  %v6151_v60 = vmul.f32 0.0051020407, %v5928_v25  ;;  %v1226_v32 = vld [vmem:[%s5219_s19 + $0x48] sm:$0xff] }
 0x135   : > { %1591 = vperm.xlu1 %4847, %v6135_v4   ;;  %v872_v37 = vpop.xlane.xlu0 %871  ;;  %4892 = vrsqrt.f32 %v1275_v42  ;;  %v1278_v1 = vadd.f32 1e-05, %v1176_v17  ;;  %v1375_v25 = vmul.f32 %v4885_v13, %v1222_v5 }
 0x136   : > { %v1281_v47 = vadd.f32 1e-05, %v1179_v9  ;;  %v1079_v59 = vmul.f32 0.0051020407, %v872_v37  ;;  %v1178_v9 = vsub.f32 %v1076_v51, %v1127_v48 }
 0x138   : > { %4894 = vrsqrt.f32 %v1281_v47  ;;  %v1181_v10 = vsub.f32 %v1079_v59, %v1130_v15  ;;  %v6153_v14 = vpop.xlane.xlu1 %883  ;;  %v1129_v47 = vmul.f32 %v6151_v60, %v6151_v60  ;;  %v1223_v59 = vld [vmem:[%s5219_s19 + $0x30] sm:$0xff]  ;;  %v1280_v51 = vadd.f32 1e-05, %v1178_v9 }
 0x139   : > { %4896 = vrsqrt.f32 %v1276_v29  ;;  %1596 = vperm.xlu1 %4847, %v6146_v7   ;;  %v6158_v34 = vpop.xlane.xlu0 %879 }
 0x13a   : > { %v4887_v42 = vpop.eup %4886  ;;  %v1283_v37 = vadd.f32 1e-05, %v1181_v10  ;;  %v1180_v13 = vsub.f32 %v1078_v30, %v1129_v47 }
 0x13b   : > { %v6160_v11 = vmul.f32 %v4887_v42, %v1226_v32  ;;  %v4889_v15 = vpop.eup %4888  ;;  %v1224_v42 = vld [vmem:[%s5219_s19 + $0x38] sm:$0xff] }
 0x13c   : > { %4898 = vrsqrt.f32 %v1283_v37  ;;  %v6164_v29 = vpop.xlane.xlu1 %891  ;;  %v6171_v48 = vmul.f32 %v4889_v15, %v1223_v59  ;;  %v1230_v37 = vld [vmem:[%s5219_s19 + $0x68] sm:$0xff]  ;;  %v1282_v9 = vadd.f32 1e-05, %v1180_v13  ;;  %v1225_v59 = vld [vmem:[%s5219_s19 + $0x40] sm:$0xff] }
 0x13d   : > { %1601 = vperm.xlu1 %4847, %v1375_v25   ;;  %1621 = vperm.xlu0 %4846, %v6160_v11   ;;  %v6169_v17 = vpop.xlane.xlu0 %887  ;;  %4900 = vrsqrt.f32 %v1278_v1 }
 0x13e   : > { %v4891_v3 = vpop.eup %4890  ;;  %4902 = vrsqrt.f32 %v1280_v51 }
 0x13f   : > { %v6173_v10 = vmul.f32 %v4891_v3, %v1228_v61  ;;  %v4893_v5 = vpop.eup %4892  ;;  %v1232_v3 = vld [vmem:[%s5219_s19 + $0x78] sm:$0xff]  ;;  %4904 = vrsqrt.f32 %v1282_v9 }
 0x140   : > { %v6175_v32 = vpop.xlane.xlu1 %899  ;;  %v1377_v15 = vmul.f32 %v4893_v5, %v1224_v42  ;;  %v1473_v5 = vmul.f32 %v6108_v39, %v6064_v24 }
 0x141   : > { %7965 = vst [vmem:[#allocation24_spill] sm:$0xff] %v6175_v32  ;;  %1606 = vperm.xlu1 %4847, %v6171_v48   ;;  %1631 = vperm.xlu0 %4846, %v6173_v10   ;;  %v6181_v16 = vpop.xlane.xlu0 %895 }
 0x142   : > { %v4895_v1 = vpop.eup %4894 }
 0x143   : > { %v4897_v30 = vpop.eup %4896  ;;  %v6183_v61 = vmul.f32 %v4895_v1, %v1230_v37  ;;  %v1227_v1 = vld [vmem:[%s5219_s19 + $0x50] sm:$0xff] }
 0x144   : > { %v6185_v47 = vpop.xlane.xlu1 %907  ;;  %v6192_v51 = vmul.f32 %v4897_v30, %v1225_v59  ;;  %v1475_v30 = vmul.f32 %v6135_v4, %v6069_v49  ;;  %v1229_v59 = vld [vmem:[%s5219_s19 + $0x60] sm:$0xff]  ;;  %v1231_v49 = vld [vmem:[%s5219_s19 + $0x70] sm:$0xff]  ;;  %v1426_v4 = vld [vmem:[%s5224_s22 + $0x28] sm:$0xff] }
 0x145   : > { %7966 = vst [vmem:[#allocation19_spill] sm:$0xff] %v6185_v47  ;;  %1611 = vperm.xlu1 %4847, %v1377_v15   ;;  %1641 = vperm.xlu0 %4846, %v6183_v61   ;;  %v6190_v35 = vpop.xlane.xlu0 %903  ;;  %v1422_v47 = vld [vmem:[%s5224_s22 + $0x8] sm:$0xff] }
 0x146   : > { %v4899_v32 = vpop.eup %4898 }
 0x147   : > { %v6194_v13 = vmul.f32 %v4899_v32, %v1232_v3  ;;  %v4901_v42 = vpop.eup %4900  ;;  %v1524_v32 = vsub.f32 %v1422_v47, %v1473_v5  ;;  %v1424_v3 = vld [vmem:[%s5224_s22 + $0x18] sm:$0xff]  ;;  %v1477_v47 = vmul.f32 %v1375_v25, %v6079_v38  ;;  %v1421_v25 = vld [vmem:[%s5224_s22] sm:$0xff] }
 0x148   : > { %v6198_v37 = vpop.xlane.xlu1 %915  ;;  %v6206_v9 = vmul.f32 %v4901_v42, %v1227_v1  ;;  %v4903_v39 = vpop.eup %4902  ;;  %v1526_v42 = vsub.f32 %v1424_v3, %v1475_v30  ;;  %v6231_v30 = vmul.f32 0.0051020407, %v6023_v52  ;;  %v1481_v52 = vmul.f32 %v6160_v11, %v6090_v57 }
 0x149   : > { %7967 = vst [vmem:[#allocation26_spill] sm:$0xff] %v6198_v37  ;;  %1616 = vperm.xlu1 %4847, %v6192_v51   ;;  %1651 = vperm.xlu0 %4846, %v6194_v13   ;;  %v6204_v20 = vpop.xlane.xlu0 %911  ;;  %v4905_v5 = vpop.eup %4904  ;;  %v1476_v57 = vmul.f32 %v6146_v7, %v6074_v43  ;;  %v1483_v11 = vmul.f32 %v6173_v10, %v6103_v62  ;;  %v6266_v7 = vmul.f32 0.0051020407, %v6027_v33  ;;  %v1427_v10 = vld [vmem:[%s5224_s22 + $0x30] sm:$0xff] }
 0x14a   : > { %7968 = vst [vmem:[#allocation21_spill] sm:$0xff] %v6204_v20  ;;  %v6217_v20 = vmul.f32 %v4903_v39, %v1229_v59  ;;  %v1479_v39 = vmul.f32 %v1377_v15, %v6095_v26  ;;  %v1428_v59 = vld [vmem:[%s5224_s22 + $0x38] sm:$0xff]  ;;  %v1474_v26 = vmul.f32 %v6124_v28, %v6059_v50  ;;  %v1147_v15 = vmul.f32 %v6231_v30, %v6231_v30 }
 0x14b   : > { %v6257_v28 = vmul.f32 0.0051020407, %v6025_v2  ;;  %v1478_v62 = vmul.f32 %v6171_v48, %v6084_v21  ;;  %v1149_v21 = vmul.f32 %v6266_v7, %v6266_v7  ;;  %v1429_v48 = vld [vmem:[%s5224_s22 + $0x40] sm:$0xff] }
 0x14c   : > { %v6210_v24 = vpop.xlane.xlu1 %923 }
 0x14d   : > { %7969 = vst [vmem:[#allocation28_spill] sm:$0xff] %v6210_v24  ;;  %1626 = vperm.xlu1 %4847, %v6206_v9   ;;  %1938 = vperm.xlu0 %4846, %v1524_v32   ;;  %v6215_v37 = vpop.xlane.xlu0 %919  ;;  %v6227_v32 = vmul.f32 %v4905_v5, %v1231_v49  ;;  %v1530_v49 = vsub.f32 %v1428_v59, %v1479_v39 }
 0x14e   : > { %7970 = vst [vmem:[#allocation23_spill] sm:$0xff] %v6215_v37  ;;  %v1528_v37 = vsub.f32 %v1426_v4, %v1477_v47  ;;  %v1523_v47 = vsub.f32 %v1421_v25, %v6098_v53  ;;  %v1430_v4 = vld [vmem:[%s5224_s22 + $0x48] sm:$0xff]  ;;  %v1150_v2 = vmul.f32 %v6257_v28, %v6257_v28 }
 0x14f   : > { %v1532_v50 = vsub.f32 %v1430_v4, %v1481_v52 }
 0x150   : > { %v6220_v1 = vpop.xlane.xlu1 %931 }
 0x151   : > { %1636 = vperm.xlu1 %4847, %v6217_v20   ;;  %1948 = vperm.xlu0 %4846, %v1526_v42   ;;  %v6225_v24 = vpop.xlane.xlu0 %927  ;;  %v6239_v42 = vmul.f32 0.0051020407, %v6021_v23 }
 0x153   : > { %v1148_v53 = vmul.f32 %v6239_v42, %v6239_v42 }
 0x154   : > { %v940_v38 = vpop.xlane.xlu1 %939 }
 0x155   : > { %1646 = vperm.xlu1 %4847, %v6227_v32   ;;  %1958 = vperm.xlu0 %4846, %v1528_v37   ;;  %v6236_v3 = vpop.xlane.xlu0 %935  ;;  %v1096_v5 = vmul.f32 0.0051020407, %v940_v38  ;;  %v1423_v37 = vld [vmem:[%s5224_s22 + $0x10] sm:$0xff] }
 0x156   : > { %7971 = vst [vmem:[#allocation30_spill] sm:$0xff] %v6236_v3  ;;  %v1525_v25 = vsub.f32 %v1423_v37, %v1474_v26 }
 0x157   : > { %v1198_v39 = vsub.f32 %v1096_v5, %v1147_v15 }
 0x158   : > { %v948_v52 = vpop.xlane.xlu1 %947 }
 0x159   : > { %1933 = vperm.xlu1 %4847, %v1523_v47   ;;  %1968 = vperm.xlu0 %4846, %v1530_v49   ;;  %v944_v23 = vpop.xlane.xlu0 %943  ;;  %v1425_v47 = vld [vmem:[%s5224_s22 + $0x20] sm:$0xff]  ;;  %v1432_v49 = vld [vmem:[%s5224_s22 + $0x58] sm:$0xff]  ;;  %v1300_v5 = vadd.f32 1e-05, %v1198_v39 }
 0x15a   : > { %v1097_v38 = vmul.f32 0.0051020407, %v944_v23  ;;  %v1527_v37 = vsub.f32 %v1425_v47, %v1476_v57  ;;  %v1534_v43 = vsub.f32 %v1432_v49, %v1483_v11  ;;  %v1529_v23 = vsub.f32 %v1427_v10, %v1478_v62  ;;  %v1431_v57 = vld [vmem:[%s5224_s22 + $0x50] sm:$0xff]  ;;  %v1250_v11 = vld [vmem:[%s5219_s19 + $0x108] sm:$0xff] }
 0x15c   : > { %v1199_v59 = vsub.f32 %v1097_v38, %v1148_v53  ;;  %v1480_v53 = vmul.f32 %v6192_v51, %v6106_v55  ;;  %v6282_v51 = vmul.f32 0.0051020407, %v5942_v22  ;;  %v1434_v22 = vld [vmem:[%s5224_s22 + $0x68] sm:$0xff] }
 0x15d   : > { %1943 = vperm.xlu1 %4847, %v1525_v25   ;;  %1978 = vperm.xlu0 %4846, %v1532_v50   ;;  %v952_v3 = vpop.xlane.xlu0 %951  ;;  %v1482_v25 = vmul.f32 %v6206_v9, %v6122_v19  ;;  %v6277_v50 = vmul.f32 0.0051020407, %v5935_v40  ;;  %v1485_v40 = vmul.f32 %v6183_v61, %v6116_v18  ;;  %v956_v61 = vpop.xlane.xlu1 %955 }
 0x15e   : > { %v1301_v15 = vadd.f32 1e-05, %v1199_v59  ;;  %v1099_v26 = vmul.f32 0.0051020407, %v952_v3  ;;  %v1098_v3 = vmul.f32 0.0051020407, %v948_v52  ;;  %v1531_v38 = vsub.f32 %v1429_v48, %v1480_v53 }
 0x15f   : > { %v1081_v59 = vmul.f32 0.0051020407, %v6158_v34  ;;  %v1132_v9 = vmul.f32 %v6277_v50, %v6277_v50  ;;  %v1249_v52 = vld [vmem:[%s5219_s19 + $0x100] sm:$0xff]  ;;  %v1080_v34 = vmul.f32 0.0051020407, %v6140_v41 }
 0x160   : > { %4906 = vrsqrt.f32 %v1301_v15  ;;  %v1201_v4 = vsub.f32 %v1099_v26, %v1150_v2  ;;  %v1200_v33 = vsub.f32 %v1098_v3, %v1149_v21  ;;  %v6290_v26 = vmul.f32 0.0051020407, %v6029_v58 }
 0x161   : > { %1953 = vperm.xlu1 %4847, %v1527_v37   ;;  %1988 = vperm.xlu0 %4846, %v1534_v43   ;;  %4908 = vrsqrt.f32 %v1300_v5  ;;  %v960_v49 = vpop.xlane.xlu0 %959  ;;  %v1533_v5 = vsub.f32 %v1431_v57, %v1482_v25  ;;  %v1131_v37 = vmul.f32 %v6282_v51, %v6282_v51  ;;  %v1183_v43 = vsub.f32 %v1081_v59, %v1132_v9  ;;  %v1252_v25 = vld [vmem:[%s5219_s19 + $0x118] sm:$0xff] }
 0x162   : > { %v1303_v39 = vadd.f32 1e-05, %v1201_v4  ;;  %v1302_v47 = vadd.f32 1e-05, %v1200_v33  ;;  %v1101_v18 = vmul.f32 0.0051020407, %v960_v49  ;;  %v1536_v2 = vsub.f32 %v1434_v22, %v1485_v40 }
 0x163   : > { %v1484_v58 = vmul.f32 %v6217_v20, %v6138_v12  ;;  %v1152_v41 = vmul.f32 %v6290_v26, %v6290_v26  ;;  %v6303_v3 = vmul.f32 0.0051020407, %v6031_v27  ;;  %v1433_v4 = vld [vmem:[%s5224_s22 + $0x60] sm:$0xff]  ;;  %v1182_v53 = vsub.f32 %v1080_v34, %v1131_v37  ;;  %v1436_v40 = vld [vmem:[%s5224_s22 + $0x78] sm:$0xff] }
 0x164   : > { %4910 = vrsqrt.f32 %v1303_v39  ;;  %v1285_v21 = vadd.f32 1e-05, %v1183_v43  ;;  %v1100_v48 = vmul.f32 0.0051020407, %v956_v61  ;;  %v1453_v27 = vld [vmem:[%s5224_s22 + $0x100] sm:$0xff]  ;;  %v1487_v49 = vmul.f32 %v6194_v13, %v6130_v0 }
 0x165   : > { %1963 = vperm.xlu1 %4847, %v1529_v23   ;;  %4912 = vrsqrt.f32 %v1302_v47  ;;  %v1454_v23 = vld [vmem:[%s5224_s22 + $0x108] sm:$0xff]  ;;  %v1203_v33 = vsub.f32 %v1101_v18, %v1152_v41  ;;  %v1535_v39 = vsub.f32 %v1433_v4, %v1484_v58  ;;  %v1284_v57 = vadd.f32 1e-05, %v1182_v53  ;;  %v968_v22 = vpop.xlane.xlu0 %967  ;;  %v1456_v18 = vld [vmem:[%s5224_s22 + $0x118] sm:$0xff]  ;;  %v1455_v41 = vld [vmem:[%s5224_s22 + $0x110] sm:$0xff] }
 0x166   : > { %4914 = vrsqrt.f32 %v1285_v21  ;;  %v1083_v9 = vmul.f32 0.0051020407, %v6169_v17  ;;  %v1538_v13 = vsub.f32 %v1436_v40, %v1487_v49  ;;  %v6329_v43 = vmul.f32 0.0051020407, %v6033_v36  ;;  %v1234_v4 = vld [vmem:[%s5219_s19 + $0x88] sm:$0xff]  ;;  %v1253_v49 = vld [vmem:[%s5219_s19 + $0x120] sm:$0xff] }
 0x167   : > { %4916 = vrsqrt.f32 %v1284_v57  ;;  %v1082_v17 = vmul.f32 0.0051020407, %v6153_v14  ;;  %v6340_v14 = vmul.f32 0.0051020407, %v6035_v8  ;;  %v1254_v8 = vld [vmem:[%s5219_s19 + $0x128] sm:$0xff] }
 0x168   : > { %v1085_v40 = vmul.f32 0.0051020407, %v6181_v16  ;;  %v1084_v16 = vmul.f32 0.0051020407, %v6164_v29 }
 0x169   : > { %1973 = vperm.xlu1 %4847, %v1531_v38   ;;  %v1151_v38 = vmul.f32 %v6303_v3, %v6303_v3 }
 0x16a   : > { %v4907_v55 = vpop.eup %4906 }
 0x16b   : > { %v1403_v15 = vmul.f32 %v4907_v55, %v1250_v11  ;;  %v4909_v19 = vpop.eup %4908  ;;  %v1202_v11 = vsub.f32 %v1100_v48, %v1151_v38  ;;  %v1305_v55 = vadd.f32 1e-05, %v1203_v33 }
 0x16c   : > { %v1402_v62 = vmul.f32 %v4909_v19, %v1249_v52  ;;  %v6320_v19 = vmul.f32 0.0051020407, %v5956_v6  ;;  %v1435_v6 = vld [vmem:[%s5224_s22 + $0x70] sm:$0xff] }
 0x16d   : > { %1983 = vperm.xlu1 %4847, %v1533_v5   ;;  %1741 = vperm.xlu0 %4846, %v1403_v15   ;;  %v1505_v10 = vmul.f32 %v1403_v15, %v6239_v42  ;;  %v6315_v5 = vmul.f32 0.0051020407, %v5949_v56  ;;  %v1251_v15 = vld [vmem:[%s5219_s19 + $0x110] sm:$0xff]  ;;  %v1304_v52 = vadd.f32 1e-05, %v1202_v11  ;;  %4918 = vrsqrt.f32 %v1305_v55 }
 0x16e   : > { %v1504_v12 = vmul.f32 %v1402_v62, %v6231_v30  ;;  %v4911_v42 = vpop.eup %4910  ;;  %v1486_v56 = vmul.f32 %v6227_v32, %v6151_v60  ;;  %v1133_v60 = vmul.f32 %v6320_v19, %v6320_v19  ;;  %v964_v32 = vpop.xlane.xlu1 %963 }
 0x16f   : > { %v1556_v20 = vsub.f32 %v1454_v23, %v1505_v10  ;;  %v1405_v47 = vmul.f32 %v4911_v42, %v1252_v25  ;;  %v4913_v30 = vpop.eup %4912  ;;  %v1134_v37 = vmul.f32 %v6315_v5, %v6315_v5  ;;  %4920 = vrsqrt.f32 %v1304_v52  ;;  %v1233_v42 = vld [vmem:[%s5219_s19 + $0x80] sm:$0xff] }
 0x170   : > { %v1555_v59 = vsub.f32 %v1453_v27, %v1504_v12  ;;  %v1404_v0 = vmul.f32 %v4913_v30, %v1251_v15  ;;  %v4915_v58 = vpop.eup %4914  ;;  %v1154_v10 = vmul.f32 %v6329_v43, %v6329_v43  ;;  %v1184_v23 = vsub.f32 %v1082_v17, %v1133_v60  ;;  %v1438_v30 = vld [vmem:[%s5224_s22 + $0x88] sm:$0xff] }
 0x171   : > { %1736 = vperm.xlu1 %4847, %v1402_v62   ;;  %1998 = vperm.xlu0 %4846, %v1536_v2   ;;  %v1507_v34 = vmul.f32 %v1405_v47, %v6257_v28  ;;  %v1185_v61 = vsub.f32 %v1083_v9, %v1134_v37  ;;  %v1103_v62 = vmul.f32 0.0051020407, %v968_v22  ;;  %v1537_v28 = vsub.f32 %v1435_v6, %v1486_v56  ;;  %v4917_v33 = vpop.eup %4916  ;;  %v1458_v37 = vld [vmem:[%s5224_s22 + $0x128] sm:$0xff] }
 0x172   : > { %v1506_v36 = vmul.f32 %v1404_v0, %v6266_v7  ;;  %v1102_v21 = vmul.f32 0.0051020407, %v964_v32  ;;  %v1387_v7 = vmul.f32 %v4915_v58, %v1234_v4  ;;  %v1153_v12 = vmul.f32 %v6340_v14, %v6340_v14  ;;  %v972_v52 = vpop.xlane.xlu1 %971  ;;  %v1457_v32 = vld [vmem:[%s5224_s22 + $0x120] sm:$0xff] }
 0x173   : > { %v1558_v2 = vsub.f32 %v1456_v18, %v1507_v34  ;;  %v1287_v53 = vadd.f32 1e-05, %v1185_v61  ;;  %v1205_v48 = vsub.f32 %v1103_v62, %v1154_v10  ;;  %v1286_v38 = vadd.f32 1e-05, %v1184_v23 }
 0x174   : > { %v1204_v27 = vsub.f32 %v1102_v21, %v1153_v12  ;;  %v1386_v57 = vmul.f32 %v4917_v33, %v1233_v42  ;;  %v1489_v55 = vmul.f32 %v1387_v7, %v6277_v50  ;;  %v6355_v15 = vmul.f32 0.0051020407, %v5970_v46  ;;  %v976_v50 = vpop.xlane.xlu0 %975  ;;  %v1437_v46 = vld [vmem:[%s5224_s22 + $0x80] sm:$0xff]  ;;  %v1256_v21 = vld [vmem:[%s5219_s19 + $0x138] sm:$0xff] }
 0x175   : > { %1993 = vperm.xlu1 %4847, %v1535_v39   ;;  %2098 = vperm.xlu0 %4846, %v1556_v20   ;;  %v1557_v39 = vsub.f32 %v1455_v41, %v1506_v36  ;;  %4922 = vrsqrt.f32 %v1287_v53  ;;  %v1307_v25 = vadd.f32 1e-05, %v1205_v48  ;;  %v6363_v34 = vmul.f32 0.0051020407, %v6037_v31  ;;  %v1235_v53 = vld [vmem:[%s5219_s19 + $0x90] sm:$0xff] }
 0x176   : > { %4924 = vrsqrt.f32 %v1286_v38  ;;  %v1306_v9 = vadd.f32 1e-05, %v1204_v27  ;;  %v1105_v18 = vmul.f32 0.0051020407, %v976_v50  ;;  %v6374_v60 = vmul.f32 0.0051020407, %v6039_v44  ;;  %v6376_v29 = vpop.xlane.xlu1 %979 }
 0x177   : > { %v4919_v20 = vpop.eup %4918  ;;  %4926 = vrsqrt.f32 %v1307_v25  ;;  %v1156_v62 = vmul.f32 %v6363_v34, %v6363_v34  ;;  %v1104_v58 = vmul.f32 0.0051020407, %v972_v52  ;;  %v6388_v38 = vmul.f32 0.0051020407, %v5977_v54  ;;  %v1255_v27 = vld [vmem:[%s5219_s19 + $0x130] sm:$0xff]  ;;  %v1440_v25 = vld [vmem:[%s5224_s22 + $0x98] sm:$0xff] }
 0x178   : > { %v1407_v11 = vmul.f32 %v4919_v20, %v1254_v8  ;;  %4928 = vrsqrt.f32 %v1306_v9  ;;  %v1155_v44 = vmul.f32 %v6374_v60, %v6374_v60  ;;  %v7972_v9 = vld [vmem:[#allocation8_spill] sm:$0xff] }
 0x179   : > { %2093 = vperm.xlu1 %4847, %v1555_v59   ;;  %1751 = vperm.xlu0 %4846, %v1405_v47   ;;  %v4921_v59 = vpop.eup %4920  ;;  %v6350_v47 = vmul.f32 0.0051020407, %v5963_v63  ;;  %v1488_v63 = vmul.f32 %v1386_v57, %v6282_v51  ;;  %v1135_v51 = vmul.f32 %v6355_v15, %v6355_v15  ;;  %v1207_v10 = vsub.f32 %v1105_v18, %v1156_v62 }
 0x17a   : > { %v1406_v22 = vmul.f32 %v4921_v59, %v1253_v49  ;;  %v1206_v33 = vsub.f32 %v1104_v58, %v1155_v44  ;;  %v984_v59 = vpop.xlane.xlu0 %983  ;;  %v6401_v52 = vmul.f32 0.0051020407, %v7972_v9  ;;  %v1462_v9 = vld [vmem:[%s5224_s22 + $0x148] sm:$0xff] }
 0x17b   : > { %v1136_v56 = vmul.f32 %v6350_v47, %v6350_v47 }
 0x17c   : > { %v1508_v61 = vmul.f32 %v1406_v22, %v6303_v3 }
 0x17d   : > { %1746 = vperm.xlu1 %4847, %v1404_v0   ;;  %2008 = vperm.xlu0 %4846, %v1538_v13   ;;  %v1540_v0 = vsub.f32 %v1438_v30, %v1489_v55  ;;  %v1509_v13 = vmul.f32 %v1407_v11, %v6290_v26  ;;  %v1187_v6 = vsub.f32 %v1085_v40, %v1136_v56  ;;  %v1308_v55 = vadd.f32 1e-05, %v1206_v33 }
 0x17e   : > { %v1539_v26 = vsub.f32 %v1437_v46, %v1488_v63  ;;  %v1559_v41 = vsub.f32 %v1457_v32, %v1508_v61  ;;  %v1138_v40 = vmul.f32 %v6388_v38, %v6388_v38 }
 0x17f   : > { %v1560_v17 = vsub.f32 %v1458_v37, %v1509_v13  ;;  %v4923_v31 = vpop.eup %4922  ;;  %v1289_v36 = vadd.f32 1e-05, %v1187_v6  ;;  %v7974_v6 = vld [vmem:[#allocation16_spill] sm:$0xff] }
 0x180   : > { %v4925_v3 = vpop.eup %4924  ;;  %v6414_v18 = vmul.f32 0.0051020407, %v7974_v6 }
 0x181   : > { %2003 = vperm.xlu1 %4847, %v1537_v28   ;;  %2108 = vperm.xlu0 %4846, %v1558_v2   ;;  %v1236_v28 = vld [vmem:[%s5219_s19 + $0x98] sm:$0xff]  ;;  %v1186_v2 = vsub.f32 %v1084_v16, %v1135_v51  ;;  %v4927_v23 = vpop.eup %4926  ;;  %4930 = vrsqrt.f32 %v1289_v36  ;;  %v1388_v20 = vmul.f32 %v4925_v3, %v1235_v53  ;;  %v1158_v16 = vmul.f32 %v6401_v52, %v6401_v52  ;;  %v1459_v51 = vld [vmem:[%s5224_s22 + $0x130] sm:$0xff]  ;;  %v1258_v3 = vld [vmem:[%s5219_s19 + $0x148] sm:$0xff] }
 0x182   : > { %v1389_v4 = vmul.f32 %v4923_v31, %v1236_v28  ;;  %v1409_v12 = vmul.f32 %v4927_v23, %v1256_v21  ;;  %v4929_v8 = vpop.eup %4928  ;;  %v1106_v31 = vmul.f32 0.0051020407, %v6376_v29  ;;  %v1157_v58 = vmul.f32 %v6414_v18, %v6414_v18 }
 0x183   : > { %v1288_v48 = vadd.f32 1e-05, %v1186_v2  ;;  %v1490_v54 = vmul.f32 %v1388_v20, %v6320_v19  ;;  %v1107_v19 = vmul.f32 0.0051020407, %v984_v59 }
 0x184   : > { %v1491_v42 = vmul.f32 %v1389_v4, %v6315_v5  ;;  %v1408_v5 = vmul.f32 %v4929_v8, %v1255_v27  ;;  %v1511_v30 = vmul.f32 %v1409_v12, %v6329_v43  ;;  %v7976_v8 = vld [vmem:[#allocation21_spill] sm:$0xff] }
 0x185   : > { %2103 = vperm.xlu1 %4847, %v1557_v39   ;;  %1661 = vperm.xlu0 %4846, %v1387_v7   ;;  %v1309_v39 = vadd.f32 1e-05, %v1207_v10  ;;  %v6384_v7 = vpop.xlane.xlu1 %987  ;;  %4932 = vrsqrt.f32 %v1288_v48  ;;  %v1209_v62 = vsub.f32 %v1107_v19, %v1158_v16  ;;  %v1237_v10 = vld [vmem:[%s5219_s19 + $0xa0] sm:$0xff]  ;;  %v1089_v27 = vmul.f32 0.0051020407, %v7976_v8 }
 0x186   : > { %v1542_v49 = vsub.f32 %v1440_v25, %v1491_v42  ;;  %v1510_v46 = vmul.f32 %v1408_v5, %v6340_v14  ;;  %v7975_v48 = vld [vmem:[#allocation4_spill] sm:$0xff]  ;;  %v1442_v42 = vld [vmem:[%s5224_s22 + $0xa8] sm:$0xff] }
 0x187   : > { %4934 = vrsqrt.f32 %v1309_v39  ;;  %v1311_v29 = vadd.f32 1e-05, %v1209_v62  ;;  %v6427_v33 = vmul.f32 0.0051020407, %v7975_v48  ;;  %v992_v39 = vpop.xlane.xlu0 %991  ;;  %v1260_v48 = vld [vmem:[%s5219_s19 + $0x158] sm:$0xff] }
 0x188   : > { %4936 = vrsqrt.f32 %v1308_v55  ;;  %v1561_v28 = vsub.f32 %v1459_v51, %v1510_v46  ;;  %v1461_v51 = vld [vmem:[%s5224_s22 + $0x140] sm:$0xff] }
 0x189   : > { %1656 = vperm.xlu1 %4847, %v1386_v57   ;;  %1761 = vperm.xlu0 %4846, %v1407_v11   ;;  %v6393_v57 = vmul.f32 0.0051020407, %v5984_v45  ;;  %v1087_v11 = vmul.f32 0.0051020407, %v6190_v35  ;;  %v6403_v50 = vpop.xlane.xlu1 %995  ;;  %v1439_v45 = vld [vmem:[%s5224_s22 + $0x90] sm:$0xff]  ;;  %v1460_v35 = vld [vmem:[%s5224_s22 + $0x138] sm:$0xff] }
 0x18a   : > { %v1541_v13 = vsub.f32 %v1439_v45, %v1490_v54  ;;  %v1562_v56 = vsub.f32 %v1460_v35, %v1511_v30  ;;  %v7978_v45 = vld [vmem:[#allocation11_spill] sm:$0xff] }
 0x18b   : > { %v1189_v63 = vsub.f32 %v1087_v11, %v1138_v40  ;;  %v1137_v43 = vmul.f32 %v6393_v57, %v6393_v57  ;;  %v4931_v37 = vpop.eup %4930  ;;  %v1441_v40 = vld [vmem:[%s5224_s22 + $0xa0] sm:$0xff]  ;;  %v6446_v35 = vmul.f32 0.0051020407, %v7978_v45 }
 0x18d   : > { %1756 = vperm.xlu1 %4847, %v1406_v22   ;;  %2018 = vperm.xlu0 %4846, %v1540_v0   ;;  %v7973_v22 = vld [vmem:[#allocation24_spill] sm:$0xff]  ;;  %v1291_v61 = vadd.f32 1e-05, %v1189_v63  ;;  %v6419_v32 = vpop.xlane.xlu1 %1003  ;;  %v1109_v63 = vmul.f32 0.0051020407, %v992_v39  ;;  %v7984_v39 = vld [vmem:[#allocation6_spill] sm:$0xff] }
 0x18e   : > { %v1086_v0 = vmul.f32 0.0051020407, %v7973_v22 }
 0x18f   : > { %v4933_v14 = vpop.eup %4932  ;;  %4938 = vrsqrt.f32 %v1291_v61 }
 0x190   : > { %v1390_v23 = vmul.f32 %v4933_v14, %v1237_v10 }
 0x191   : > { %2013 = vperm.xlu1 %4847, %v1539_v26   ;;  %2118 = vperm.xlu0 %4846, %v1560_v17   ;;  %v1238_v26 = vld [vmem:[%s5219_s19 + $0xa8] sm:$0xff]  ;;  %v1188_v17 = vsub.f32 %v1086_v0, %v1137_v43  ;;  %v4935_v36 = vpop.eup %4934  ;;  %v6449_v0 = vpop.xlane.xlu0 %999 }
 0x192   : > { %v1391_v2 = vmul.f32 %v4931_v37, %v1238_v26  ;;  %v1411_v44 = vmul.f32 %v4935_v36, %v1258_v3  ;;  %v4937_v21 = vpop.eup %4936  ;;  %v1492_v55 = vmul.f32 %v1390_v23, %v6355_v15  ;;  %v7979_v15 = vld [vmem:[#allocation19_spill] sm:$0xff]  ;;  %v7980_v37 = vld [vmem:[#allocation18_spill] sm:$0xff] }
 0x193   : > { %v1088_v22 = vmul.f32 0.0051020407, %v7979_v15  ;;  %v6455_v16 = vmul.f32 0.0051020407, %v7980_v37  ;;  %v1240_v26 = vld [vmem:[%s5219_s19 + $0xb8] sm:$0xff] }
 0x194   : > { %v1493_v53 = vmul.f32 %v1391_v2, %v6350_v47  ;;  %v1513_v59 = vmul.f32 %v1411_v44, %v6363_v34  ;;  %v1543_v19 = vsub.f32 %v1441_v40, %v1492_v55 }
 0x195   : > { %2113 = vperm.xlu1 %4847, %v1559_v41   ;;  %1671 = vperm.xlu0 %4846, %v1389_v4   ;;  %v1290_v41 = vadd.f32 1e-05, %v1188_v17  ;;  %v1208_v4 = vsub.f32 %v1106_v31, %v1157_v58  ;;  %v7981_v17 = vld [vmem:[#allocation5_spill] sm:$0xff]  ;;  %v1160_v31 = vmul.f32 %v6446_v35, %v6446_v35 }
 0x196   : > { %v1544_v47 = vsub.f32 %v1442_v42, %v1493_v53  ;;  %v1564_v43 = vsub.f32 %v1462_v9, %v1513_v59  ;;  %v6462_v61 = vmul.f32 0.0051020407, %v7981_v17  ;;  %v7985_v42 = vld [vmem:[#allocation23_spill] sm:$0xff] }
 0x197   : > { %4940 = vrsqrt.f32 %v1290_v41  ;;  %v1310_v25 = vadd.f32 1e-05, %v1208_v4  ;;  %v1211_v58 = vsub.f32 %v1109_v63, %v1160_v31  ;;  %v1159_v4 = vmul.f32 %v6455_v16, %v6455_v16 }
 0x198   : > { %4942 = vrsqrt.f32 %v1311_v29  ;;  %v7983_v29 = vld [vmem:[#allocation26_spill] sm:$0xff]  ;;  %v1091_v8 = vmul.f32 0.0051020407, %v7985_v42 }
 0x199   : > { %1666 = vperm.xlu1 %4847, %v1388_v20   ;;  %1771 = vperm.xlu0 %4846, %v1409_v12   ;;  %v6429_v20 = vpop.xlane.xlu1 %1011  ;;  %v1257_v12 = vld [vmem:[%s5219_s19 + $0x140] sm:$0xff]  ;;  %4944 = vrsqrt.f32 %v1310_v25  ;;  %v1313_v59 = vadd.f32 1e-05, %v1211_v58  ;;  %v1443_v58 = vld [vmem:[%s5224_s22 + $0xb0] sm:$0xff] }
 0x19a   : > { %v1410_v11 = vmul.f32 %v4937_v21, %v1257_v12  ;;  %v1239_v21 = vld [vmem:[%s5219_s19 + $0xb0] sm:$0xff]  ;;  %v6482_v12 = vmul.f32 0.0051020407, %v7984_v39  ;;  %v7986_v25 = vld [vmem:[#allocation12_spill] sm:$0xff] }
 0x19c   : > { %v1144_v63 = vmul.f32 %v6482_v12, %v6482_v12 }
 0x19d   : > { %1766 = vperm.xlu1 %4847, %v1408_v5   ;;  %2028 = vperm.xlu0 %4846, %v1542_v49   ;;  %v1140_v5 = vmul.f32 %v6427_v33, %v6427_v33  ;;  %v7977_v49 = vld [vmem:[#allocation9_spill] sm:$0xff] }
 0x19e   : > { %v6439_v54 = vmul.f32 0.0051020407, %v7977_v49 }
 0x19f   : > { %v1191_v34 = vsub.f32 %v1089_v27, %v1140_v5 }
 0x1a0   : > { %v1139_v46 = vmul.f32 %v6439_v54, %v6439_v54 }
 0x1a1   : > { %2023 = vperm.xlu1 %4847, %v1541_v13   ;;  %2128 = vperm.xlu0 %4846, %v1562_v56   ;;  %v1512_v13 = vmul.f32 %v1410_v11, %v6374_v60  ;;  %v4939_v56 = vpop.eup %4938  ;;  %v7982_v60 = vld [vmem:[#allocation10_spill] sm:$0xff]  ;;  %v1293_v36 = vadd.f32 1e-05, %v1191_v34 }
 0x1a2   : > { %v6467_v62 = vmul.f32 0.0051020407, %v7982_v60  ;;  %v1190_v14 = vsub.f32 %v1088_v22, %v1139_v46  ;;  %v1393_v3 = vmul.f32 %v4939_v56, %v1240_v26  ;;  %v1259_v22 = vld [vmem:[%s5219_s19 + $0x150] sm:$0xff]  ;;  %v1444_v56 = vld [vmem:[%s5224_s22 + $0xb8] sm:$0xff]  ;;  %v7988_v46 = vld [vmem:[#allocation13_spill] sm:$0xff] }
 0x1a3   : > { %v1563_v10 = vsub.f32 %v1461_v51, %v1512_v13  ;;  %4946 = vrsqrt.f32 %v1293_v36  ;;  %v6501_v37 = vmul.f32 0.0051020407, %v7988_v46  ;;  %v1093_v51 = vmul.f32 0.0051020407, %v6225_v24 }
 0x1a4   : > { %v1141_v27 = vmul.f32 %v6467_v62, %v6467_v62  ;;  %v1495_v34 = vmul.f32 %v1393_v3, %v6388_v38 }
 0x1a5   : > { %2123 = vperm.xlu1 %4847, %v1561_v28   ;;  %1681 = vperm.xlu0 %4846, %v1391_v2   ;;  %v1108_v28 = vmul.f32 0.0051020407, %v6384_v7  ;;  %v4941_v2 = vpop.eup %4940  ;;  %v1142_v7 = vmul.f32 %v6462_v61, %v6462_v61 }
 0x1a6   : > { %v4943_v41 = vpop.eup %4942  ;;  %v1392_v5 = vmul.f32 %v4941_v2, %v1239_v21  ;;  %v1546_v36 = vsub.f32 %v1444_v56, %v1495_v34  ;;  %v1241_v34 = vld [vmem:[%s5219_s19 + $0xc0] sm:$0xff] }
 0x1a7   : > { %v1210_v55 = vsub.f32 %v1108_v28, %v1159_v4  ;;  %v1413_v49 = vmul.f32 %v4943_v41, %v1260_v48  ;;  %v4945_v40 = vpop.eup %4944  ;;  %v1193_v13 = vsub.f32 %v1091_v8, %v1142_v7  ;;  %v1464_v41 = vld [vmem:[%s5224_s22 + $0x158] sm:$0xff]  ;;  %v1162_v4 = vmul.f32 %v6501_v37, %v6501_v37  ;;  %v1463_v8 = vld [vmem:[%s5224_s22 + $0x150] sm:$0xff] }
 0x1a8   : > { %v1412_v17 = vmul.f32 %v4945_v40, %v1259_v22  ;;  %v1494_v31 = vmul.f32 %v1392_v5, %v6393_v57  ;;  %v7989_v57 = vld [vmem:[#allocation20_spill] sm:$0xff] }
 0x1a9   : > { %1676 = vperm.xlu1 %4847, %v1390_v23   ;;  %1781 = vperm.xlu0 %4846, %v1411_v44   ;;  %v1090_v23 = vmul.f32 0.0051020407, %v7983_v29  ;;  %v6473_v44 = vpop.xlane.xlu0 %1007  ;;  %v1312_v26 = vadd.f32 1e-05, %v1210_v55  ;;  %v1515_v24 = vmul.f32 %v1413_v49, %v6401_v52  ;;  %v6518_v29 = vmul.f32 0.0051020407, %v7989_v57 }
 0x1aa   : > { %v1514_v21 = vmul.f32 %v1412_v17, %v6414_v18  ;;  %v1110_v52 = vmul.f32 0.0051020407, %v6403_v50 }
 0x1ab   : > { %v1192_v9 = vsub.f32 %v1090_v23, %v1141_v27  ;;  %v1545_v23 = vsub.f32 %v1443_v58, %v1494_v31  ;;  %v1566_v42 = vsub.f32 %v1464_v41, %v1515_v24  ;;  %v1161_v18 = vmul.f32 %v6518_v29, %v6518_v29  ;;  %v1261_v31 = vld [vmem:[%s5219_s19 + $0x160] sm:$0xff]  ;;  %v1446_v24 = vld [vmem:[%s5224_s22 + $0xc8] sm:$0xff] }
 0x1ac   : > { %v6441_v30 = vpop.permute.xlu1 %1581  ;;  %v1565_v50 = vsub.f32 %v1463_v8, %v1514_v21  ;;  %v1094_v58 = vmul.f32 0.0051020407, %v6220_v1  ;;  %v1113_v21 = vmul.f32 0.0051020407, %v6473_v44 }
 0x1ad   : > { %1776 = vperm.xlu1 %4847, %v1410_v11   ;;  %2038 = vperm.xlu0 %4846, %v1544_v47   ;;  %v6488_v11 = vmul.f32 0.0051020407, %v7986_v25  ;;  %v1292_v47 = vadd.f32 1e-05, %v1190_v14  ;;  %v6490_v45 = vpop.permute.xlu0 %1576  ;;  %v1294_v60 = vadd.f32 1e-05, %v1192_v9  ;;  %v4947_v27 = vpop.eup %4946 }
 0x1ae   : > { %v1111_v14 = vmul.f32 0.0051020407, %v6449_v0  ;;  %v1195_v0 = vsub.f32 %v1093_v51, %v1144_v63 }
 0x1af   : > { %4948 = vrsqrt.f32 %v1292_v47  ;;  %v1143_v38 = vmul.f32 %v6488_v11, %v6488_v11  ;;  %v1242_v47 = vld [vmem:[%s5219_s19 + $0xc8] sm:$0xff] }
 0x1b0   : > { %v6457_v6 = vpop.permute.xlu1 %1586  ;;  %4950 = vrsqrt.f32 %v1313_v59  ;;  %v1213_v48 = vsub.f32 %v1111_v14, %v1162_v4  ;;  %v1297_v55 = vadd.f32 1e-05, %v1195_v0  ;;  %v1395_v22 = vmul.f32 %v4947_v27, %v1242_v47  ;;  %v7991_v14 = vld [vmem:[#allocation15_spill] sm:$0xff]  ;;  %v7993_v4 = vld [vmem:[#allocation22_spill] sm:$0xff]  ;;  %v1445_v47 = vld [vmem:[%s5224_s22 + $0xc0] sm:$0xff] }
 0x1b1   : > { %2033 = vperm.xlu1 %4847, %v1543_v19   ;;  %2138 = vperm.xlu0 %4846, %v1564_v43   ;;  %v7987_v19 = vld [vmem:[#allocation28_spill] sm:$0xff]  ;;  %4952 = vrsqrt.f32 %v1312_v26  ;;  %v6554_v57 = vmul.f32 0.0051020407, %v7993_v4  ;;  %v1243_v0 = vld [vmem:[%s5219_s19 + $0xd0] sm:$0xff] }
 0x1b2   : > { %v1092_v43 = vmul.f32 0.0051020407, %v7987_v19  ;;  %4954 = vrsqrt.f32 %v1294_v60  ;;  %v1262_v19 = vld [vmem:[%s5219_s19 + $0x168] sm:$0xff]  ;;  %v1497_v60 = vmul.f32 %v1395_v22, %v6427_v33 }
 0x1b4   : > { %v6475_v53 = vpop.permute.xlu1 %1591 }
 0x1b5   : > { %2133 = vperm.xlu1 %4847, %v1563_v10   ;;  %1691 = vperm.xlu0 %4846, %v1393_v3   ;;  %v1194_v10 = vsub.f32 %v1092_v43, %v1143_v38  ;;  %v1295_v3 = vadd.f32 1e-05, %v1193_v13  ;;  %v7990_v43 = vld [vmem:[#allocation14_spill] sm:$0xff] }
 0x1b6   : > { %v6537_v13 = vmul.f32 0.0051020407, %v7990_v43 }
 0x1b7   : > { %v1296_v25 = vadd.f32 1e-05, %v1194_v10  ;;  %4956 = vrsqrt.f32 %v1295_v3  ;;  %v7992_v3 = vld [vmem:[#allocation7_spill] sm:$0xff] }
 0x1b8   : > { %v6492_v15 = vpop.permute.xlu1 %1596  ;;  %v6551_v41 = vmul.f32 0.0051020407, %v7992_v3  ;;  %v1145_v33 = vmul.f32 %v6537_v13, %v6537_v13 }
 0x1b9   : > { %1686 = vperm.xlu1 %4847, %v1392_v5   ;;  %1791 = vperm.xlu0 %4846, %v1413_v49   ;;  %v4949_v59 = vpop.eup %4948  ;;  %v1212_v5 = vsub.f32 %v1110_v52, %v1161_v18  ;;  %v1315_v49 = vadd.f32 1e-05, %v1213_v48  ;;  %4958 = vrsqrt.f32 %v1296_v25  ;;  %v1244_v48 = vld [vmem:[%s5219_s19 + $0xd8] sm:$0xff]  ;;  %v1548_v25 = vsub.f32 %v1446_v24, %v1497_v60  ;;  %v1465_v24 = vld [vmem:[%s5224_s22 + $0x160] sm:$0xff] }
 0x1ba   : > { %v4951_v63 = vpop.eup %4950  ;;  %4960 = vrsqrt.f32 %v1297_v55  ;;  %v1394_v56 = vmul.f32 %v4949_v59, %v1241_v34  ;;  %v1196_v44 = vsub.f32 %v1094_v58, %v1145_v33 }
 0x1bb   : > { %v4953_v46 = vpop.eup %4952  ;;  %v1314_v51 = vadd.f32 1e-05, %v1212_v5  ;;  %4962 = vrsqrt.f32 %v1315_v49  ;;  %v7995_v49 = vld [vmem:[#allocation17_spill] sm:$0xff] }
 0x1bc   : > { %v6508_v28 = vpop.permute.xlu1 %1601  ;;  %v6510_v2 = vpop.permute.xlu0 %1621  ;;  %v1414_v1 = vmul.f32 %v4953_v46, %v1261_v31  ;;  %v1496_v52 = vmul.f32 %v1394_v56, %v6439_v54  ;;  %v1466_v54 = vld [vmem:[%s5224_s22 + $0x168] sm:$0xff]  ;;  %v1245_v46 = vld [vmem:[%s5219_s19 + $0xe0] sm:$0xff]  ;;  %v1114_v31 = vmul.f32 0.0051020407, %v6429_v20  ;;  %v1298_v3 = vadd.f32 1e-05, %v1196_v44 }
 0x1bd   : > { %1786 = vperm.xlu1 %4847, %v1412_v17   ;;  %2048 = vperm.xlu0 %4846, %v1546_v36   ;;  %v1415_v17 = vmul.f32 %v4951_v63, %v1262_v19  ;;  %v6546_v36 = vmul.f32 0.0051020407, %v7991_v14  ;;  %v4955_v10 = vpop.eup %4954  ;;  %4964 = vrsqrt.f32 %v1314_v51  ;;  %v1146_v63 = vmul.f32 %v6551_v41, %v6551_v41  ;;  %v1264_v20 = vld [vmem:[%s5219_s19 + $0x178] sm:$0xff] }
 0x1be   : > { %v6573_v5 = vmul.f32 %v4955_v10, %v1243_v0  ;;  %v1547_v43 = vsub.f32 %v1445_v47, %v1496_v52  ;;  %v1246_v10 = vld [vmem:[%s5219_s19 + $0xe8] sm:$0xff]  ;;  %4966 = vrsqrt.f32 %v1298_v3  ;;  %v4980_v3 = vld [vmem:[%s5209_s12 + $0x20] sm:$0xff] }
 0x1bf   : > { %v1517_v18 = vmul.f32 %v1415_v17, %v6446_v35  ;;  %v1164_v55 = vmul.f32 %v6546_v36, %v6546_v36 }
 0x1c0   : > { %v6522_v7 = vpop.permute.xlu1 %1606  ;;  %v6524_v39 = vpop.permute.xlu0 %1631 }
 0x1c1   : > { %2043 = vperm.xlu1 %4847, %v1545_v23   ;;  %2148 = vperm.xlu0 %4846, %v1566_v42   ;;  %v4957_v23 = vpop.eup %4956  ;;  %v1112_v42 = vmul.f32 0.0051020407, %v6419_v32  ;;  %v1163_v32 = vmul.f32 %v6554_v57, %v6554_v57  ;;  %v1215_v19 = vsub.f32 %v1113_v21, %v1164_v55  ;;  %v1568_v58 = vsub.f32 %v1466_v54, %v1517_v18  ;;  %v6602_v21 = vld [vmem:[%s5224_s22 + $0xd0] sm:$0xff] }
 0x1c2   : > { %v1397_v35 = vmul.f32 %v4957_v23, %v1244_v48 }
 0x1c3   : > { %v4959_v34 = vpop.eup %4958  ;;  %v1317_v52 = vadd.f32 1e-05, %v1215_v19 }
 0x1c4   : > { %v6530_v40 = vpop.permute.xlu1 %1611  ;;  %v6532_v9 = vpop.permute.xlu0 %1641  ;;  %v6599_v33 = vmul.f32 %v1397_v35, %v6462_v61 }
 0x1c5   : > { %2143 = vperm.xlu1 %4847, %v1565_v50   ;;  %1701 = vperm.xlu0 %4846, %v1395_v22   ;;  %v7994_v50 = vld [vmem:[#allocation30_spill] sm:$0xff]  ;;  %v6578_v22 = vmul.f32 0.0051020407, %v7995_v49  ;;  %v4961_v51 = vpop.eup %4960  ;;  %4968 = vrsqrt.f32 %v1317_v52 }
 0x1c6   : > { %v1095_v59 = vmul.f32 0.0051020407, %v7994_v50  ;;  %v4963_v0 = vpop.eup %4962 }
 0x1c7   : > { %v1165_v23 = vmul.f32 %v6578_v22, %v6578_v22  ;;  %v1417_v55 = vmul.f32 %v4963_v0, %v1264_v20  ;;  %v4965_v50 = vpop.eup %4964  ;;  %v4981_v0 = vld [vmem:[%s5209_s12 + $0x28] sm:$0xff]  ;;  %v4982_v20 = vld [vmem:[%s5209_s12 + $0x30] sm:$0xff] }
 0x1c8   : > { %v6539_v26 = vpop.permute.xlu1 %1616  ;;  %v6541_v38 = vpop.permute.xlu0 %1651  ;;  %v1197_v4 = vsub.f32 %v1095_v59, %v1146_v63  ;;  %v4976_v59 = vld [vmem:[%s5209_s12 + $0x10] sm:$0xff] }
 0x1c9   : > { %1696 = vperm.xlu1 %4847, %v1394_v56   ;;  %1801 = vperm.xlu0 %4846, %v1415_v17   ;;  %v1516_v56 = vmul.f32 %v1414_v1, %v6455_v16  ;;  %v1214_v17 = vsub.f32 %v1112_v42, %v1163_v32  ;;  %v6593_v16 = vmul.f32 %v6573_v5, %v6467_v62  ;;  %v6607_v42 = vld [vmem:[%s5224_s22 + $0xd8] sm:$0xff]  ;;  %v1263_v63 = vld [vmem:[%s5219_s19 + $0x170] sm:$0xff] }
 0x1ca   : > { %v6609_v62 = vmul.f32 %v4961_v51, %v1246_v10  ;;  %v1216_v47 = vsub.f32 %v1114_v31, %v1165_v23  ;;  %v6613_v61 = vadd.f32 1e-05, %v1197_v4  ;;  %v1831_v54 = vmul.f32 %v4976_v59, %v6441_v30  ;;  %v4977_v32 = vld [vmem:[%s5209_s12 + $0x18] sm:$0xff]  ;;  %v4979_v51 = vld [vmem:[%s5209_s12 + $0x8] sm:$0xff] }
 0x1cb   : > { %v1567_v48 = vsub.f32 %v1465_v24, %v1516_v56  ;;  %v1549_v44 = vsub.f32 %v6602_v21, %v6593_v16  ;;  %v1832_v49 = vmul.f32 %v4977_v32, %v6441_v30  ;;  %v1550_v19 = vsub.f32 %v6607_v42, %v6599_v33  ;;  %v4978_v56 = vld [vmem:[%s5209_s12] sm:$0xff]  ;;  %v4983_v33 = vld [vmem:[%s5209_s12 + $0x38] sm:$0xff]  ;;  %v4984_v42 = vld [vmem:[%s5209_s12 + $0x50] sm:$0xff] }
 0x1cc   : > { %v6563_v8 = vpop.permute.xlu1 %1626  ;;  %v6565_v27 = vpop.permute.xlu0 %1938  ;;  %v6634_v30 = vmul.f32 %v6609_v62, %v6482_v12  ;;  %v6642_v12 = vmul.f32 %v1417_v55, %v6501_v37  ;;  %v1833_v4 = vmul.f32 %v4980_v3, %v6457_v6  ;;  %v1834_v23 = vmul.f32 %v4981_v0, %v6457_v6 }
 0x1cd   : > { %1796 = vperm.xlu1 %4847, %v1414_v1   ;;  %2058 = vperm.xlu0 %4846, %v1548_v25   ;;  %v6604_v1 = vmul.f32 %v4959_v34, %v1245_v46  ;;  %v1316_v25 = vadd.f32 1e-05, %v1214_v17  ;;  %v1829_v46 = vmul.f32 %v4978_v56, %v6490_v45  ;;  %v1830_v17 = vmul.f32 %v4979_v51, %v6490_v45 }
 0x1ce   : > { %v2189_v31 = vadd.f32 %v6565_v27, %v1832_v49  ;;  %v1416_v45 = vmul.f32 %v4965_v50, %v1263_v63  ;;  %v1836_v52 = vmul.f32 %v4983_v33, %v6475_v53 }
 0x1cf   : > { %4970 = vrsqrt.f32 %v1316_v25  ;;  %v4985_v25 = vld [vmem:[%s5209_s12 + $0x58] sm:$0xff] }
 0x1d0   : > { %v6585_v60 = vpop.permute.xlu1 %1636  ;;  %v6587_v14 = vpop.permute.xlu0 %1948  ;;  %v1840_v37 = vmul.f32 %v4985_v25, %v6508_v28  ;;  %v1266_v25 = vld [vmem:[%s5219_s19 + $0x188] sm:$0xff] }
 0x1d1   : > { %2053 = vperm.xlu1 %4847, %v1547_v43   ;;  %2158 = vperm.xlu0 %4846, %v1568_v58   ;;  %v6626_v43 = vmul.f32 %v6604_v1, %v6488_v11  ;;  %v2188_v11 = vadd.f32 %v6565_v27, %v1831_v54  ;;  %v1835_v27 = vmul.f32 %v4982_v20, %v6475_v53  ;;  %v2291_v53 = vmax.f32 %v2189_v31, 0.0 }
 0x1d2   : > { %v2193_v6 = vadd.f32 %v6587_v14, %v1836_v52  ;;  %v4991_v52 = vld [vmem:[%s5209_s12 + $0x78] sm:$0xff] }
 0x1d3   : > { %v2290_v59 = vmax.f32 %v2188_v11, 0.0  ;;  %v2192_v54 = vadd.f32 %v6587_v14, %v1835_v27  ;;  %v6663_v14 = vpop.eup %4966  ;;  %v4990_v27 = vld [vmem:[%s5209_s12 + $0x70] sm:$0xff] }
 0x1d4   : > { %v6611_v18 = vpop.permute.xlu1 %1646  ;;  %v1959_v34 = vpop.permute.xlu0 %1958  ;;  %v2295_v0 = vmax.f32 %v2193_v6, 0.0  ;;  %v1843_v33 = vmul.f32 %v4990_v27, %v6530_v40  ;;  %v4996_v27 = vld [vmem:[%s5209_s12 + $0xb0] sm:$0xff] }
 0x1d5   : > { %2153 = vperm.xlu1 %4847, %v1567_v48   ;;  %1711 = vperm.xlu0 %4846, %v1397_v35   ;;  %v6636_v35 = vadd.f32 1e-05, %v1216_v47  ;;  %v1468_v48 = vld [vmem:[%s5224_s22 + $0x178] sm:$0xff]  ;;  %v2197_v51 = vadd.f32 %v1959_v34, %v1840_v37  ;;  %v4969_v20 = vpop.eup %4968 }
 0x1d6   : > { %v1570_v56 = vsub.f32 %v1468_v48, %v6642_v12 }
 0x1d7   : > { %4972 = vrsqrt.f32 %v6636_v35  ;;  %v4993_v35 = vld [vmem:[%s5209_s12 + $0x98] sm:$0xff] }
 0x1d8   : > { %v1934_v58 = vpop.permute.xlu1 %1933  ;;  %v1969_v32 = vpop.permute.xlu0 %1968  ;;  %4974 = vrsqrt.f32 %v6613_v61 }
 0x1d9   : > { %v2186_v24 = vadd.f32 %v1934_v58, %v1829_v46  ;;  %v2187_v10 = vadd.f32 %v1934_v58, %v1830_v17  ;;  %1706 = vperm.xlu1 %4847, %v6573_v5   ;;  %1811 = vperm.xlu0 %4846, %v1417_v55   ;;  %v1839_v5 = vmul.f32 %v4984_v42, %v6508_v28  ;;  %v4986_v58 = vld [vmem:[%s5209_s12 + $0x40] sm:$0xff]  ;;  %v4971_v37 = vpop.eup %4970 }
 0x1da   : > { %v6661_v28 = vmul.f32 %v1416_v45, %v6518_v29  ;;  %v1837_v31 = vmul.f32 %v4986_v58, %v6492_v15  ;;  %v2200_v6 = vadd.f32 %v1969_v32, %v1843_v33  ;;  %v1848_v58 = vmul.f32 %v4993_v35, %v6510_v2 }
 0x1db   : > { %v2288_v47 = vmax.f32 %v2186_v24, 0.0  ;;  %v2289_v50 = vmax.f32 %v2187_v10, 0.0  ;;  %v2196_v46 = vadd.f32 %v1959_v34, %v1839_v5  ;;  %v4987_v24 = vld [vmem:[%s5209_s12 + $0x48] sm:$0xff]  ;;  %v1467_v5 = vld [vmem:[%s5224_s22 + $0x170] sm:$0xff]  ;;  %v1851_v33 = vmul.f32 %v4996_v27, %v6524_v39 }
 0x1dc   : > { %v1944_v49 = vpop.permute.xlu1 %1943  ;;  %v1838_v10 = vmul.f32 %v4987_v24, %v6492_v15  ;;  %v4989_v34 = vld [vmem:[%s5209_s12 + $0x68] sm:$0xff]  ;;  %v1844_v15 = vmul.f32 %v4991_v52, %v6530_v40  ;;  %v1569_v21 = vsub.f32 %v1467_v5, %v6661_v28  ;;  %v2302_v28 = vmax.f32 %v2200_v6, 0.0  ;;  %v4997_v52 = vld [vmem:[%s5209_s12 + $0xb8] sm:$0xff] }
 0x1dd   : > { %v2190_v55 = vadd.f32 %v1944_v49, %v1833_v4  ;;  %v2191_v63 = vadd.f32 %v1944_v49, %v1834_v23  ;;  %1806 = vperm.xlu1 %4847, %v1416_v45   ;;  %2068 = vperm.xlu0 %4846, %v1550_v19   ;;  %v2391_v17 = vpack.c.bf16 %v2291_v53, %v2289_v50  ;;  %v4988_v4 = vld [vmem:[%s5209_s12 + $0x60] sm:$0xff]  ;;  %v2294_v45 = vmax.f32 %v2192_v54, 0.0  ;;  %v1979_v50 = vpop.permute.xlu0 %1978 }
 0x1de   : > { %v2390_v11 = vpack.c.bf16 %v2290_v59, %v2288_v47  ;;  %v1841_v29 = vmul.f32 %v4988_v4, %v6522_v7  ;;  %v1842_v19 = vmul.f32 %v4989_v34, %v6522_v7  ;;  %v2298_v47 = vmax.f32 %v2196_v46, 0.0 }
 0x1df   : > { %v2292_v12 = vmax.f32 %v2190_v55, 0.0  ;;  %v2293_v3 = vmax.f32 %v2191_v63, 0.0  ;;  %2775 = vmatprep.subr.bf16.mxu1 %v2391_v17  ;;  %v2299_v7 = vmax.f32 %v2197_v51, 0.0  ;;  %v2201_v40 = vadd.f32 %v1969_v32, %v1844_v15  ;;  %v4992_v55 = vld [vmem:[%s5209_s12 + $0x90] sm:$0xff]  ;;  %v1265_v17 = vld [vmem:[%s5219_s19 + $0x180] sm:$0xff] }
 0x1e0   : > { %v1954_v23 = vpop.permute.xlu1 %1953  ;;  %2776 = vmatpush1.bf16.msra.mxu1 %v2390_v11  ;;  %v1847_v63 = vmul.f32 %v4992_v55, %v6510_v2  ;;  %v1450_v11 = vld [vmem:[%s5224_s22 + $0xe8] sm:$0xff]  ;;  %v2205_v34 = vadd.f32 %v1979_v50, %v1848_v58  ;;  %v1852_v15 = vmul.f32 %v4997_v52, %v6524_v39  ;;  %v5004_v52 = vld [vmem:[%s5209_s12 + $0x210] sm:$0xff] }
 0x1e1   : > { %v2194_v48 = vadd.f32 %v1954_v23, %v1837_v31  ;;  %v2195_v42 = vadd.f32 %v1954_v23, %v1838_v10  ;;  %2063 = vperm.xlu1 %4847, %v1549_v44   ;;  %2168 = vperm.xlu0 %4846, %v1570_v56   ;;  %v2393_v59 = vpack.c.bf16 %v2295_v0, %v2293_v3  ;;  %v4994_v31 = vld [vmem:[%s5209_s12 + $0x80] sm:$0xff]  ;;  %v4995_v10 = vld [vmem:[%s5209_s12 + $0x88] sm:$0xff]  ;;  %v2303_v3 = vmax.f32 %v2201_v40, 0.0 }
 0x1e2   : > { %v2392_v54 = vpack.c.bf16 %v2294_v45, %v2292_v12  ;;  %v1419_v44 = vmul.f32 %v4969_v20, %v1266_v25  ;;  %v1845_v24 = vmul.f32 %v4994_v31, %v6539_v26  ;;  %v1846_v12 = vmul.f32 %v4995_v10, %v6539_v26  ;;  %v4999_v25 = vld [vmem:[%s5209_s12 + $0xa8] sm:$0xff]  ;;  %v1449_v40 = vld [vmem:[%s5224_s22 + $0xe0] sm:$0xff]  ;;  %v5000_v31 = vld [vmem:[%s5209_s12 + $0xd0] sm:$0xff] }
 0x1e3   : > { %v2296_v49 = vmax.f32 %v2194_v48, 0.0  ;;  %v2297_v53 = vmax.f32 %v2195_v42, 0.0  ;;  %2777 = vmatprep.subr.bf16.mxu1 %v2393_v59  ;;  %v2204_v61 = vadd.f32 %v1979_v50, %v1847_v63  ;;  %v1418_v45 = vmul.f32 %v4971_v37, %v1265_v17  ;;  %v1247_v42 = vld [vmem:[%s5219_s19 + $0xf0] sm:$0xff]  ;;  %v4973_v63 = vpop.eup %4972  ;;  %v1469_v10 = vld [vmem:[%s5224_s22 + $0x180] sm:$0xff] }
 0x1e4   : > { %v1964_v16 = vpop.permute.xlu1 %1963  ;;  %2778 = vmatpush1.bf16.msra.mxu1 %v2392_v54  ;;  %v1552_v0 = vsub.f32 %v1450_v11, %v6634_v30  ;;  %v1521_v48 = vmul.f32 %v1419_v44, %v6546_v36  ;;  %v4998_v30 = vld [vmem:[%s5209_s12 + $0xa0] sm:$0xff]  ;;  %v1850_v37 = vmul.f32 %v4999_v25, %v6563_v8  ;;  %v2307_v59 = vmax.f32 %v2205_v34, 0.0  ;;  %v5007_v25 = vld [vmem:[%s5209_s12 + $0x208] sm:$0xff] }
 0x1e5   : > { %v2198_v56 = vadd.f32 %v1964_v16, %v1841_v29  ;;  %v2199_v46 = vadd.f32 %v1964_v16, %v1842_v19  ;;  %v2395_v32 = vpack.c.bf16 %v2299_v7, %v2297_v53  ;;  %v2394_v51 = vpack.c.bf16 %v2298_v47, %v2296_v49  ;;  %2163 = vperm.xlu1 %4847, %v1569_v21   ;;  %v1989_v19 = vpop.permute.xlu0 %1988  ;;  %v1470_v53 = vld [vmem:[%s5224_s22 + $0x188] sm:$0xff]  ;;  %v1267_v21 = vld [vmem:[%s5219_s19 + $0x190] sm:$0xff]  ;;  %v5002_v34 = vld [vmem:[%s5209_s12 + $0xc0] sm:$0xff] }
 0x1e6   : > { %1721 = vperm.xlu0 %4846, %v6609_v62   ;;  %v1849_v5 = vmul.f32 %v4998_v30, %v6563_v8  ;;  %v2306_v50 = vmax.f32 %v2204_v61, 0.0  ;;  %v2208_v39 = vadd.f32 %v1989_v19, %v1851_v33  ;;  %v6711_v55 = vmul.f32 %v6663_v14, %v1247_v42  ;;  %v5006_v30 = vld [vmem:[%s5209_s12 + $0x200] sm:$0xff] }
 0x1e7   : > { %v2300_v4 = vmax.f32 %v2198_v56, 0.0  ;;  %v2301_v29 = vmax.f32 %v2199_v46, 0.0  ;;  %2779 = vmatprep.subr.bf16.mxu1 %v2395_v32  ;;  %v1551_v46 = vsub.f32 %v1449_v40, %v6626_v43  ;;  %v4975_v32 = vpop.eup %4974  ;;  %v1572_v35 = vsub.f32 %v1470_v53, %v1521_v48  ;;  %v5005_v48 = vld [vmem:[%s5209_s12 + $0x218] sm:$0xff] }
 0x1e8   : > { %v1974_v2 = vpop.permute.xlu1 %1973  ;;  %2780 = vmatpush1.bf16.msra.mxu1 %v2394_v51  ;;  %v2310_v51 = vmax.f32 %v2208_v39, 0.0  ;;  %v1520_v58 = vmul.f32 %v1418_v45, %v6554_v57  ;;  %v1502_v43 = vmul.f32 %v6711_v55, %v6537_v13  ;;  %v1451_v57 = vld [vmem:[%s5224_s22 + $0xf0] sm:$0xff] }
 0x1e9   : > { %v2202_v26 = vadd.f32 %v1974_v2, %v1845_v24  ;;  %v2203_v23 = vadd.f32 %v1974_v2, %v1846_v12  ;;  %v2397_v62 = vpack.c.bf16 %v2303_v3, %v2301_v29  ;;  %v2396_v20 = vpack.c.bf16 %v2302_v28, %v2300_v4  ;;  %1716 = vperm.xlu1 %4847, %v6604_v1   ;;  %v1248_v12 = vld [vmem:[%s5219_s19 + $0xf8] sm:$0xff]  ;;  %v5003_v2 = vld [vmem:[%s5209_s12 + $0xc8] sm:$0xff] }
 0x1ea   : > { %1821 = vperm.xlu0 %4846, %v1419_v44   ;;  %v2209_v1 = vadd.f32 %v1989_v19, %v1852_v15  ;;  %v1855_v24 = vmul.f32 %v5000_v31, %v6532_v9  ;;  %v6722_v28 = vmul.f32 %v4973_v63, %v1267_v21  ;;  %v5001_v3 = vld [vmem:[%s5209_s12 + $0xd8] sm:$0xff]  ;;  %v1853_v19 = vmul.f32 %v5002_v34, %v6585_v60  ;;  %v5010_v31 = vld [vmem:[%s5209_s12 + $0xe0] sm:$0xff] }
 0x1eb   : > { %v2304_v47 = vmax.f32 %v2202_v26, 0.0  ;;  %v2305_v7 = vmax.f32 %v2203_v23, 0.0  ;;  %2781 = vmatprep.subr.bf16.mxu1 %v2397_v62  ;;  %v1856_v4 = vmul.f32 %v5001_v3, %v6532_v9  ;;  %v1571_v9 = vsub.f32 %v1469_v10, %v1520_v58  ;;  %v5011_v10 = vld [vmem:[%s5209_s12 + $0xe8] sm:$0xff]  ;;  %v5013_v34 = vld [vmem:[%s5209_s12 + $0x238] sm:$0xff] }
 0x1ec   : > { %v1984_v54 = vpop.permute.xlu1 %1983  ;;  %v1742_v6 = vpop.permute.xlu0 %1741  ;;  %2782 = vmatpush1.bf16.msra.mxu1 %v2396_v20  ;;  %v2311_v17 = vmax.f32 %v2209_v1, 0.0  ;;  %v1401_v62 = vmul.f32 %v4975_v32, %v1248_v12  ;;  %v1553_v33 = vsub.f32 %v1451_v57, %v1502_v43 }
 0x1ed   : > { %v2206_v36 = vadd.f32 %v1984_v54, %v1849_v5  ;;  %v2207_v49 = vadd.f32 %v1984_v54, %v1850_v37  ;;  %1816 = vperm.xlu1 %4847, %v1418_v45   ;;  %v2399_v8 = vpack.c.bf16 %v2307_v59, %v2305_v7  ;;  %v2398_v16 = vpack.c.bf16 %v2306_v50, %v2304_v47 }
 0x1ee   : > { %2078 = vperm.xlu0 %4846, %v1552_v0   ;;  %v1854_v45 = vmul.f32 %v5003_v2, %v6585_v60  ;;  %v1895_v15 = vmul.f32 %v5004_v52, %v1742_v6  ;;  %v1896_v42 = vmul.f32 %v5005_v48, %v1742_v6  ;;  %v1522_v60 = vmul.f32 %v6722_v28, %v6578_v22  ;;  %v5014_v2 = vld [vmem:[%s5209_s12 + $0x220] sm:$0xff] }
 0x1ef   : > { %v2308_v44 = vmax.f32 %v2206_v36, 0.0  ;;  %v2309_v56 = vmax.f32 %v2207_v49, 0.0  ;;  %2783 = vmatprep.subr.bf16.mxu1 %v2399_v8  ;;  %v1471_v49 = vld [vmem:[%s5224_s22 + $0x190] sm:$0xff]  ;;  %v1503_v32 = vmul.f32 %v1401_v62, %v6551_v41  ;;  %v1858_v41 = vmul.f32 %v5011_v10, %v6611_v18 }
 0x1f0   : > { %v1737_v14 = vpop.permute.xlu1 %1736  ;;  %v1999_v11 = vpop.permute.xlu0 %1998  ;;  %2784 = vmatpush1.bf16.msra.mxu1 %v2398_v16 }
 0x1f1   : > { %2073 = vperm.xlu1 %4847, %v1551_v46   ;;  %v2401_v29 = vpack.c.bf16 %v2311_v17, %v2309_v56  ;;  %v2400_v61 = vpack.c.bf16 %v2310_v51, %v2308_v44  ;;  %v2212_v0 = vadd.f32 %v1999_v11, %v1855_v24  ;;  %v2213_v13 = vadd.f32 %v1999_v11, %v1856_v4  ;;  %v5008_v51 = vld [vmem:[%s5209_s12 + $0xf0] sm:$0xff]  ;;  %v1452_v17 = vld [vmem:[%s5224_s22 + $0xf8] sm:$0xff] }
 0x1f2   : > { %2178 = vperm.xlu0 %4846, %v1572_v35   ;;  %v1893_v5 = vmul.f32 %v5006_v30, %v1737_v14  ;;  %v1894_v37 = vmul.f32 %v5007_v25, %v1737_v14  ;;  %v1573_v56 = vsub.f32 %v1471_v49, %v1522_v60  ;;  %v5009_v14 = vld [vmem:[%s5209_s12 + $0xf8] sm:$0xff]  ;;  %v1857_v24 = vmul.f32 %v5010_v31, %v6611_v18 }
 0x1f3   : > { %2785 = vmatprep.subr.bf16.mxu1 %v2401_v29  ;;  %v2314_v50 = vmax.f32 %v2212_v0, 0.0  ;;  %v2315_v59 = vmax.f32 %v2213_v13, 0.0  ;;  %v1860_v11 = vmul.f32 %v5009_v14, %v6541_v38  ;;  %v1554_v4 = vsub.f32 %v1452_v17, %v1503_v32  ;;  %v5015_v0 = vld [vmem:[%s5209_s12 + $0x228] sm:$0xff]  ;;  %v5022_v17 = vld [vmem:[%s5209_s12 + $0x240] sm:$0xff] }
 0x1f4   : > { %v1994_v26 = vpop.permute.xlu1 %1993  ;;  %v2099_v23 = vpop.permute.xlu0 %2098  ;;  %2786 = vmatpush1.bf16.msra.mxu1 %v2400_v61  ;;  %v5012_v61 = vld [vmem:[%s5209_s12 + $0x230] sm:$0xff] }
 0x1f5   : > { %v2210_v20 = vadd.f32 %v1994_v26, %v1853_v19  ;;  %v2211_v27 = vadd.f32 %v1994_v26, %v1854_v45  ;;  %2173 = vperm.xlu1 %4847, %v1571_v9   ;;  %v2252_v39 = vadd.f32 %v2099_v23, %v1895_v15  ;;  %v2253_v1 = vadd.f32 %v2099_v23, %v1896_v42 }
 0x1f6   : > { %1731 = vperm.xlu0 %4846, %v1401_v62  }
 0x1f7   : > { %v2312_v47 = vmax.f32 %v2210_v20, 0.0  ;;  %v2313_v7 = vmax.f32 %v2211_v27, 0.0  ;;  %v2354_v16 = vmax.f32 %v2252_v39, 0.0  ;;  %v2355_v46 = vmax.f32 %v2253_v1, 0.0  ;;  %v5016_v1 = vld [vmem:[%s5209_s12 + $0x110] sm:$0xff] }
 0x1f8   : > { %v2094_v54 = vpop.permute.xlu1 %2093  ;;  %v1752_v40 = vpop.permute.xlu0 %1751 }
 0x1f9   : > { %v2250_v36 = vadd.f32 %v2094_v54, %v1893_v5  ;;  %v2251_v6 = vadd.f32 %v2094_v54, %v1894_v37  ;;  %1726 = vperm.xlu1 %4847, %v6711_v55   ;;  %v2403_v22 = vpack.c.bf16 %v2315_v59, %v2313_v7  ;;  %v2402_v53 = vpack.c.bf16 %v2314_v50, %v2312_v47 }
 0x1fa   : > { %2083 = vperm.xlu0 %4846, %v1553_v33   ;;  %v1859_v55 = vmul.f32 %v5008_v51, %v6541_v38  ;;  %v1899_v57 = vmul.f32 %v5012_v61, %v1752_v40  ;;  %v1900_v19 = vmul.f32 %v5013_v34, %v1752_v40  ;;  %v5017_v40 = vld [vmem:[%s5209_s12 + $0x118] sm:$0xff] }
 0x1fb   : > { %v2352_v63 = vmax.f32 %v2250_v36, 0.0  ;;  %v2353_v8 = vmax.f32 %v2251_v6, 0.0  ;;  %2787 = vmatprep.subr.bf16.mxu1 %v2403_v22  ;;  %v5018_v6 = vld [vmem:[%s5209_s12 + $0x100] sm:$0xff]  ;;  %v5019_v22 = vld [vmem:[%s5209_s12 + $0x108] sm:$0xff]  ;;  %v5021_v51 = vld [vmem:[%s5209_s12 + $0x258] sm:$0xff] }
 0x1fc   : > { %v1747_v21 = vpop.permute.xlu1 %1746  ;;  %v2009_v44 = vpop.permute.xlu0 %2008  ;;  %2788 = vmatpush1.bf16.msra.mxu1 %v2402_v53 }
 0x1fd   : > { %1826 = vperm.xlu1 %4847, %v6722_v28   ;;  %v2423_v35 = vpack.c.bf16 %v2355_v46, %v2353_v8  ;;  %v2422_v58 = vpack.c.bf16 %v2354_v16, %v2352_v63  ;;  %v2216_v12 = vadd.f32 %v2009_v44, %v1859_v55  ;;  %v2217_v43 = vadd.f32 %v2009_v44, %v1860_v11  ;;  %v5020_v46 = vld [vmem:[%s5209_s12 + $0x250] sm:$0xff]  ;;  %v5023_v11 = vld [vmem:[%s5209_s12 + $0x248] sm:$0xff] }
 0x1fe   : > { %2183 = vperm.xlu0 %4846, %v1573_v56   ;;  %v1897_v45 = vmul.f32 %v5014_v2, %v1747_v21  ;;  %v1898_v13 = vmul.f32 %v5015_v0, %v1747_v21  ;;  %v4848_v0 = vld [vmem:[%s5214_s15 + $0xc0] sm:$0xff]  }
 0x1ff   : > { %2888 = vmatprep.subr.bf16.mxu0 %v2423_v35  ;;  %v2318_v23 = vmax.f32 %v2216_v12, 0.0  ;;  %v2319_v9 = vmax.f32 %v2217_v43, 0.0 }
 0x200   : > { %v2004_v3 = vpop.permute.xlu1 %2003  ;;  %v2109_v38 = vpop.permute.xlu0 %2108  ;;  %2889 = vmatpush1.bf16.msra.mxu0 %v2422_v58 }
 0x201   : > { %v2214_v28 = vadd.f32 %v2004_v3, %v1857_v24  ;;  %v2215_v29 = vadd.f32 %v2004_v3, %v1858_v41  ;;  %2088 = vperm.xlu1 %4847, %v1554_v4   ;;  %v2256_v62 = vadd.f32 %v2109_v38, %v1899_v57  ;;  %v2257_v20 = vadd.f32 %v2109_v38, %v1900_v19 }
 0x203   : > { %v2316_v18 = vmax.f32 %v2214_v28, 0.0  ;;  %v2317_v26 = vmax.f32 %v2215_v29, 0.0  ;;  %v2358_v5 = vmax.f32 %v2256_v62, 0.0  ;;  %v2359_v25 = vmax.f32 %v2257_v20, 0.0  ;;  %v5024_v62 = vld [vmem:[%s5209_s12 + $0x130] sm:$0xff] }
 0x204   : > { %v2104_v27 = vpop.permute.xlu1 %2103  ;;  %v1662_v33 = vpop.permute.xlu0 %1661 }
 0x205   : > { %v2254_v52 = vadd.f32 %v2104_v27, %v1897_v45  ;;  %v2255_v15 = vadd.f32 %v2104_v27, %v1898_v13  ;;  %v2405_v48 = vpack.c.bf16 %v2319_v9, %v2317_v26  ;;  %v2404_v42 = vpack.c.bf16 %v2318_v23, %v2316_v18  ;;  %v4849_v9 = vld [vmem:[%s5214_s15 + $0xc8] ss:$0 sps:$4 sm:$0xff]   ;;  %v5025_v27 = vld [vmem:[%s5209_s12 + $0x138] sm:$0xff] }
 0x206   : > { %v1863_v54 = vmul.f32 %v5016_v1, %v1662_v33  ;;  %v1864_v36 = vmul.f32 %v5017_v40, %v1662_v33 }
 0x207   : > { %v2356_v60 = vmax.f32 %v2254_v52, 0.0  ;;  %v2357_v30 = vmax.f32 %v2255_v15, 0.0  ;;  %2789 = vmatprep.subr.bf16.mxu1 %v2405_v48  ;;  %v5026_v52 = vld [vmem:[%s5209_s12 + $0x120] sm:$0xff]  ;;  %v5027_v48 = vld [vmem:[%s5209_s12 + $0x128] sm:$0xff] }
 0x208   : > { %v1657_v37 = vpop.permute.xlu1 %1656  ;;  %v1762_v47 = vpop.permute.xlu0 %1761  ;;  %2790 = vmatpush1.bf16.msra.mxu1 %v2404_v42 }
 0x209   : > { %v2425_v7 = vpack.c.bf16 %v2359_v25, %v2357_v30  ;;  %v2424_v50 = vpack.c.bf16 %v2358_v5, %v2356_v60  ;;  %v1861_v49 = vmul.f32 %v5018_v6, %v1657_v37  ;;  %v1862_v53 = vmul.f32 %v5019_v22, %v1657_v37 }
 0x20a   : > { %v1903_v32 = vmul.f32 %v5020_v46, %v1762_v47  ;;  %v1904_v55 = vmul.f32 %v5021_v51, %v1762_v47 }
 0x20b   : > { %2890 = vmatprep.subr.bf16.mxu0 %v2425_v7  ;;  %v4850_v7 = vld [vmem:[%s5214_s15 + $0x40] sm:$0xff]  }
 0x20c   : > { %v1757_v59 = vpop.permute.xlu1 %1756  ;;  %v2019_v39 = vpop.permute.xlu0 %2018  ;;  %2891 = vmatpush1.bf16.msra.mxu0 %v2424_v50  ;;  %v5028_v50 = vld [vmem:[%s5209_s12 + $0x270] sm:$0xff] }
 0x20d   : > { %v2220_v63 = vadd.f32 %v2019_v39, %v1863_v54  ;;  %v2221_v8 = vadd.f32 %v2019_v39, %v1864_v36  ;;  %v1901_v14 = vmul.f32 %v5022_v17, %v1757_v59  ;;  %v1902_v35 = vmul.f32 %v5023_v11, %v1757_v59  ;;  %v5029_v39 = vld [vmem:[%s5209_s12 + $0x278] sm:$0xff]  ;;  %v5030_v54 = vld [vmem:[%s5209_s12 + $0x260] sm:$0xff]  ;;  %v5031_v36 = vld [vmem:[%s5209_s12 + $0x268] sm:$0xff] }
 0x20f   : > { %v2322_v24 = vmax.f32 %v2220_v63, 0.0  ;;  %v2323_v10 = vmax.f32 %v2221_v8, 0.0 }
 0x210   : > { %v2014_v16 = vpop.permute.xlu1 %2013  ;;  %v2119_v21 = vpop.permute.xlu0 %2118 }
 0x211   : > { %v2218_v44 = vadd.f32 %v2014_v16, %v1861_v49  ;;  %v2219_v56 = vadd.f32 %v2014_v16, %v1862_v53  ;;  %v2260_v41 = vadd.f32 %v2119_v21, %v1903_v32  ;;  %v2261_v12 = vadd.f32 %v2119_v21, %v1904_v55  ;;  %v4851_v32 = vld [vmem:[%s5214_s15 + $0x48] sm:$0xff]  }
 0x213   : > { %v2320_v58 = vmax.f32 %v2218_v44, 0.0  ;;  %v2321_v31 = vmax.f32 %v2219_v56, 0.0  ;;  %v2362_v34 = vmax.f32 %v2260_v41, 0.0  ;;  %v2363_v19 = vmax.f32 %v2261_v12, 0.0 }
 0x214   : > { %v2114_v43 = vpop.permute.xlu1 %2113  ;;  %v1672_v3 = vpop.permute.xlu0 %1671 }
 0x215   : > { %v2258_v38 = vadd.f32 %v2114_v43, %v1901_v14  ;;  %v2259_v4 = vadd.f32 %v2114_v43, %v1902_v35  ;;  %v2407_v28 = vpack.c.bf16 %v2323_v10, %v2321_v31  ;;  %v2406_v29 = vpack.c.bf16 %v2322_v24, %v2320_v58  ;;  %v4852_v24 = vld [vmem:[%s5214_s15 + $0x50] sm:$0xff]  }
 0x216   : > { %v1867_v20 = vmul.f32 %v5024_v62, %v1672_v3  ;;  %v1868_v33 = vmul.f32 %v5025_v27, %v1672_v3  ;;  %v4853_v3 = vld [vmem:[%s5214_s15 + $0x58] sm:$0xff]  }
 0x217   : > { %v2360_v61 = vmax.f32 %v2258_v38, 0.0  ;;  %v2361_v57 = vmax.f32 %v2259_v4, 0.0  ;;  %2791 = vmatprep.subr.bf16.mxu1 %v2407_v28  ;;  %v5032_v38 = vld [vmem:[%s5209_s12 + $0x150] sm:$0xff]  ;;  %v5033_v28 = vld [vmem:[%s5209_s12 + $0x158] sm:$0xff] }
 0x218   : > { %v1667_v2 = vpop.permute.xlu1 %1666  ;;  %v1772_v45 = vpop.permute.xlu0 %1771  ;;  %2792 = vmatpush1.bf16.msra.mxu1 %v2406_v29 }
 0x219   : > { %v2427_v13 = vpack.c.bf16 %v2363_v19, %v2361_v57  ;;  %v2426_v18 = vpack.c.bf16 %v2362_v34, %v2360_v61  ;;  %v1865_v15 = vmul.f32 %v5026_v52, %v1667_v2  ;;  %v1866_v42 = vmul.f32 %v5027_v48, %v1667_v2  ;;  %v5034_v61 = vld [vmem:[%s5209_s12 + $0x140] sm:$0xff]  ;;  %v5035_v34 = vld [vmem:[%s5209_s12 + $0x148] sm:$0xff] }
 0x21a   : > { %v1907_v59 = vmul.f32 %v5028_v50, %v1772_v45  ;;  %v1908_v1 = vmul.f32 %v5029_v39, %v1772_v45  ;;  %v4855_v39 = vld [vmem:[%s5214_s15 + $0x68] sm:$0xff]  }
 0x21b   : > { %2892 = vmatprep.subr.bf16.mxu0 %v2427_v13 }
 0x21c   : > { %2727 = vxpose.xlu0.c.b16.start [1/2] (short) %v4848_v0, 128  ;;  %v1767_v26 = vpop.permute.xlu1 %1766  ;;  %v2029_v23 = vpop.permute.xlu0 %2028  ;;  %2893 = vmatpush1.bf16.msra.mxu0 %v2426_v18 }
 0x21d   : > { %v2224_v60 = vadd.f32 %v2029_v23, %v1867_v20  ;;  %v2225_v30 = vadd.f32 %v2029_v23, %v1868_v33  ;;  %v1905_v40 = vmul.f32 %v5030_v54, %v1767_v26  ;;  %v1906_v6 = vmul.f32 %v5031_v36, %v1767_v26  ;;  %v4854_v23 = vld [vmem:[%s5214_s15 + $0x60] sm:$0xff]   ;;  %v5037_v20 = vld [vmem:[%s5209_s12 + $0x298] sm:$0xff] }
 0x21e   : > { %v5038_v33 = vld [vmem:[%s5209_s12 + $0x280] sm:$0xff] }
 0x21f   : > { %v2326_v53 = vmax.f32 %v2224_v60, 0.0  ;;  %v2327_v63 = vmax.f32 %v2225_v30, 0.0 }
 0x220   : > { %2728 = vxpose.xlu0.c.b16.end [2/2] (short) %v4849_v9, 128  ;;  %v2024_v5 = vpop.permute.xlu1 %2023  ;;  %v2129_v25 = vpop.permute.xlu0 %2128  ;;  %v5036_v9 = vld [vmem:[%s5209_s12 + $0x290] sm:$0xff] }
 0x221   : > { %v2222_v37 = vadd.f32 %v2024_v5, %v1865_v15  ;;  %v2223_v47 = vadd.f32 %v2024_v5, %v1866_v42  ;;  %v2264_v8 = vadd.f32 %v2129_v25, %v1907_v59  ;;  %v2265_v16 = vadd.f32 %v2129_v25, %v1908_v1  ;;  %v5039_v15 = vld [vmem:[%s5209_s12 + $0x288] sm:$0xff] }
 0x223   : > { %v2324_v49 = vmax.f32 %v2222_v37, 0.0  ;;  %v2325_v22 = vmax.f32 %v2223_v47, 0.0  ;;  %v2366_v11 = vmax.f32 %v2264_v8, 0.0  ;;  %v2367_v35 = vmax.f32 %v2265_v16, 0.0  ;;  %v4857_v8 = vld [vmem:[%s5214_s15 + $0x70] sm:$0xff]  }
 0x224   : > { %v2124_v21 = vpop.permute.xlu1 %2123  ;;  %v1682_v44 = vpop.permute.xlu0 %1681  ;;  %2695 = vxpose.xlu1.c.b16.start [1/8] %v4850_v7, 128 }
 0x225   : > { %v2262_v56 = vadd.f32 %v2124_v21, %v1905_v40  ;;  %v2263_v46 = vadd.f32 %v2124_v21, %v1906_v6  ;;  %v2409_v51 = vpack.c.bf16 %v2327_v63, %v2325_v22  ;;  %v2408_v55 = vpack.c.bf16 %v2326_v53, %v2324_v49  ;;  %v4856_v40 = vld [vmem:[%s5214_s15] sm:$0xff]  }
 0x226   : > { %v1871_v4 = vmul.f32 %v5032_v38, %v1682_v44  ;;  %v1872_v29 = vmul.f32 %v5033_v28, %v1682_v44  ;;  %v4858_v44 = vld [vmem:[%s5214_s15 + $0x8] sm:$0xff]   ;;  %v5045_v38 = vld [vmem:[%s5209_s12 + $0x2b8] sm:$0xff] }
 0x227   : > { %v2364_v17 = vmax.f32 %v2262_v56, 0.0  ;;  %v2365_v14 = vmax.f32 %v2263_v46, 0.0  ;;  %2793 = vmatprep.subr.bf16.mxu1 %v2409_v51  ;;  %v5040_v56 = vld [vmem:[%s5209_s12 + $0x170] sm:$0xff] }
 0x228   : > { %v1677_v58 = vpop.permute.xlu1 %1676  ;;  %v1782_v31 = vpop.permute.xlu0 %1781  ;;  %2696 = vxpose.xlu1.c.b16.cont [2/8] %v4851_v32, 128  ;;  %2794 = vmatpush1.bf16.msra.mxu1 %v2408_v55  ;;  %v5041_v32 = vld [vmem:[%s5209_s12 + $0x178] sm:$0xff] }
 0x229   : > { %v2429_v10 = vpack.c.bf16 %v2367_v35, %v2365_v14  ;;  %v2428_v41 = vpack.c.bf16 %v2366_v11, %v2364_v17  ;;  %v1869_v57 = vmul.f32 %v5034_v61, %v1677_v58  ;;  %v1870_v19 = vmul.f32 %v5035_v34, %v1677_v58  ;;  %v4859_v14 = vld [vmem:[%s5214_s15 + $0x78] sm:$0xff]   ;;  %v4860_v58 = vld [vmem:[%s5214_s15 + $0x10] sm:$0xff]   ;;  %v5046_v34 = vld [vmem:[%s5209_s12 + $0x2a0] sm:$0xff] }
 0x22a   : > { %v1911_v62 = vmul.f32 %v5036_v9, %v1782_v31  ;;  %v1912_v27 = vmul.f32 %v5037_v20, %v1782_v31  ;;  %v5042_v31 = vld [vmem:[%s5209_s12 + $0x160] sm:$0xff] }
 0x22b   : > { %2894 = vmatprep.subr.bf16.mxu0 %v2429_v10  ;;  %v5043_v10 = vld [vmem:[%s5209_s12 + $0x168] sm:$0xff] }
 0x22c   : > { %v1777_v12 = vpop.permute.xlu1 %1776  ;;  %v2039_v43 = vpop.permute.xlu0 %2038  ;;  %2697 = vxpose.xlu1.c.b16.cont [3/8] %v4852_v24, 128  ;;  %2895 = vmatpush1.bf16.msra.mxu0 %v2428_v41 }
 0x22d   : > { %v2228_v2 = vadd.f32 %v2039_v43, %v1871_v4  ;;  %v2229_v45 = vadd.f32 %v2039_v43, %v1872_v29  ;;  %v1909_v52 = vmul.f32 %v5038_v33, %v1777_v12  ;;  %v1910_v48 = vmul.f32 %v5039_v15, %v1777_v12  ;;  %v5044_v43 = vld [vmem:[%s5209_s12 + $0x2b0] sm:$0xff] }
 0x22f   : > { %v2330_v30 = vmax.f32 %v2228_v2, 0.0  ;;  %v2331_v5 = vmax.f32 %v2229_v45, 0.0  ;;  %v5047_v2 = vld [vmem:[%s5209_s12 + $0x2a8] sm:$0xff] }
 0x230   : > { %v2034_v0 = vpop.permute.xlu1 %2033  ;;  %v2139_v13 = vpop.permute.xlu0 %2138  ;;  %2698 = vxpose.xlu1.c.b16.cont [4/8] %v4853_v3, 128 }
 0x231   : > { %v2226_v18 = vadd.f32 %v2034_v0, %v1869_v57  ;;  %v2227_v26 = vadd.f32 %v2034_v0, %v1870_v19  ;;  %v2268_v25 = vadd.f32 %v2139_v13, %v1911_v62  ;;  %v2269_v37 = vadd.f32 %v2139_v13, %v1912_v27  ;;  %v4861_v57 = vld [vmem:[%s5214_s15 + $0x80] sm:$0xff]  }
 0x233   : > { %v2328_v42 = vmax.f32 %v2226_v18, 0.0  ;;  %v2329_v60 = vmax.f32 %v2227_v26, 0.0  ;;  %v2370_v49 = vmax.f32 %v2268_v25, 0.0  ;;  %v2371_v22 = vmax.f32 %v2269_v37, 0.0  ;;  %v4862_v18 = vld [vmem:[%s5214_s15 + $0x18] sm:$0xff]  }
 0x234   : > { %v2134_v47 = vpop.permute.xlu1 %2133  ;;  %v1692_v7 = vpop.permute.xlu0 %1691  ;;  %2699 = vxpose.xlu1.c.b16.cont [5/8] %v4854_v23, 128 }
 0x235   : > { %v2266_v50 = vadd.f32 %v2134_v47, %v1909_v52  ;;  %v2267_v59 = vadd.f32 %v2134_v47, %v1910_v48  ;;  %v2411_v1 = vpack.c.bf16 %v2331_v5, %v2329_v60  ;;  %v2410_v54 = vpack.c.bf16 %v2330_v30, %v2328_v42  ;;  %v4863_v48 = vld [vmem:[%s5214_s15 + $0x88] sm:$0xff]   ;;  %v4864_v60 = vld [vmem:[%s5214_s15 + $0x20] sm:$0xff]  }
 0x236   : > { %v1875_v46 = vmul.f32 %v5040_v56, %v1692_v7  ;;  %v1876_v51 = vmul.f32 %v5041_v32, %v1692_v7  ;;  %v5051_v56 = vld [vmem:[%s5209_s12 + $0x188] sm:$0xff] }
 0x237   : > { %v2368_v36 = vmax.f32 %v2266_v50, 0.0  ;;  %v2369_v6 = vmax.f32 %v2267_v59, 0.0  ;;  %2795 = vmatprep.subr.bf16.mxu1 %v2411_v1  ;;  %v4865_v59 = vld [vmem:[%s5214_s15 + $0x90] sm:$0xff]   ;;  %v4866_v1 = vld [vmem:[%s5214_s15 + $0x28] sm:$0xff]  }
 0x238   : > { %v1687_v53 = vpop.permute.xlu1 %1686  ;;  %v1792_v63 = vpop.permute.xlu0 %1791  ;;  %2700 = vxpose.xlu1.c.b16.cont [6/8] %v4855_v39, 128  ;;  %2796 = vmatpush1.bf16.msra.mxu1 %v2410_v54  ;;  %v5048_v54 = vld [vmem:[%s5209_s12 + $0x190] sm:$0xff] }
 0x239   : > { %2679 = vxpose.xlu0.c.b16.start [1/8] %v4856_v40, 128  ;;  %v2431_v16 = vpack.c.bf16 %v2371_v22, %v2369_v6  ;;  %v2430_v21 = vpack.c.bf16 %v2370_v49, %v2368_v36  ;;  %v1873_v24 = vmul.f32 %v5042_v31, %v1687_v53  ;;  %v1874_v41 = vmul.f32 %v5043_v10, %v1687_v53  ;;  %v5049_v36 = vld [vmem:[%s5209_s12 + $0x198] sm:$0xff]  ;;  %v4869_v31 = vld [vmem:[%s5214_s15 + $0xa0] sm:$0xff]  }
 0x23a   : > { %v1915_v3 = vmul.f32 %v5044_v43, %v1792_v63  ;;  %v1916_v4 = vmul.f32 %v5045_v38, %v1792_v63  ;;  %v4867_v53 = vld [vmem:[%s5214_s15 + $0x98] sm:$0xff]  }
 0x23b   : > { %2896 = vmatprep.subr.bf16.mxu0 %v2431_v16  ;;  %v4868_v16 = vld [vmem:[%s5214_s15 + $0x30] sm:$0xff]   ;;  %v4870_v38 = vld [vmem:[%s5214_s15 + $0x38] sm:$0xff]  }
 0x23c   : > { %v1787_v55 = vpop.permute.xlu1 %1786  ;;  %2701 = vxpose.xlu1.c.b16.cont [7/8] %v4857_v8, 128  ;;  %2897 = vmatpush1.bf16.msra.mxu0 %v2430_v21  ;;  %v2049_v17 = vpop.permute.xlu0 %2048  ;;  %v5050_v21 = vld [vmem:[%s5209_s12 + $0x180] sm:$0xff] }
 0x23d   : > { %v2232_v11 = vadd.f32 %v2049_v17, %v1875_v46  ;;  %v2233_v35 = vadd.f32 %v2049_v17, %v1876_v51  ;;  %2680 = vxpose.xlu0.c.b16.cont [2/8] %v4858_v44, 128  ;;  %v1913_v19 = vmul.f32 %v5046_v34, %v1787_v55  ;;  %v1914_v45 = vmul.f32 %v5047_v2, %v1787_v55  ;;  %v5052_v51 = vld [vmem:[%s5209_s12 + $0x2d0] sm:$0xff]  ;;  %v5053_v17 = vld [vmem:[%s5209_s12 + $0x2d8] sm:$0xff] }
 0x23f   : > { %v2334_v0 = vmax.f32 %v2232_v11, 0.0  ;;  %v2335_v13 = vmax.f32 %v2233_v35, 0.0 }
 0x240   : > { %v2044_v12 = vpop.permute.xlu1 %2043  ;;  %2702 = vxpose.xlu1.c.b16.end [8/8] %v4859_v14, 128  ;;  %v2149_v61 = vpop.permute.xlu0 %2148 }
 0x241   : > { %v2230_v28 = vadd.f32 %v2044_v12, %v1873_v24  ;;  %v2231_v29 = vadd.f32 %v2044_v12, %v1874_v41  ;;  %2681 = vxpose.xlu0.c.b16.cont [3/8] %v4860_v58, 128  ;;  %v2272_v9 = vadd.f32 %v2149_v61, %v1915_v3  ;;  %v2273_v62 = vadd.f32 %v2149_v61, %v1916_v4  ;;  %v5054_v24 = vld [vmem:[%s5209_s12 + $0x2c0] sm:$0xff]  ;;  %v5055_v41 = vld [vmem:[%s5209_s12 + $0x2c8] sm:$0xff] }
 0x243   : > { %v2332_v26 = vmax.f32 %v2230_v28, 0.0  ;;  %v2333_v23 = vmax.f32 %v2231_v29, 0.0  ;;  %v2374_v30 = vmax.f32 %v2272_v9, 0.0  ;;  %v2375_v5 = vmax.f32 %v2273_v62, 0.0 }
 0x244   : > { %v2144_v20 = vpop.permute.xlu1 %2143  ;;  %2711 = vxpose.xlu1.c.b16.start [1/8] %v4861_v57, 128  ;;  %v1702_v52 = vpop.permute.xlu0 %1701 }
 0x245   : > { %v2270_v27 = vadd.f32 %v2144_v20, %v1913_v19  ;;  %v2271_v33 = vadd.f32 %v2144_v20, %v1914_v45  ;;  %v2413_v15 = vpack.c.bf16 %v2335_v13, %v2333_v23  ;;  %v2412_v42 = vpack.c.bf16 %v2334_v0, %v2332_v26  ;;  %2682 = vxpose.xlu0.c.b16.cont [4/8] %v4862_v18, 128  ;;  %v4871_v0 = vld [vmem:[%s5214_s15 + $0xa8] sm:$0xff]  }
 0x246   : > { %v1879_v40 = vmul.f32 %v5048_v54, %v1702_v52  ;;  %v1880_v6 = vmul.f32 %v5049_v36, %v1702_v52 }
 0x247   : > { %v2372_v25 = vmax.f32 %v2270_v27, 0.0  ;;  %v2373_v37 = vmax.f32 %v2271_v33, 0.0  ;;  %2797 = vmatprep.subr.bf16.mxu1 %v2413_v15  ;;  %v4872_v33 = vld [vmem:[%s5214_s15 + $0xb0] sm:$0xff]  }
 0x248   : > { %v1697_v47 = vpop.permute.xlu1 %1696  ;;  %2798 = vmatpush1.bf16.msra.mxu1 %v2412_v42  ;;  %2712 = vxpose.xlu1.c.b16.cont [2/8] %v4863_v48, 128  ;;  %v1802_v7 = vpop.permute.xlu0 %1801  ;;  %v4873_v42 = vld [vmem:[%s5214_s15 + $0xb8] sm:$0xff]  }
 0x249   : > { %v2433_v50 = vpack.c.bf16 %v2375_v5, %v2373_v37  ;;  %v2432_v39 = vpack.c.bf16 %v2374_v30, %v2372_v25  ;;  %2683 = vxpose.xlu0.c.b16.cont [5/8] %v4864_v60, 128  ;;  %v1877_v44 = vmul.f32 %v5050_v21, %v1697_v47  ;;  %v1878_v46 = vmul.f32 %v5051_v56, %v1697_v47  ;;  %v5056_v60 = vld [vmem:[%s5209_s12 + $0x1b0] sm:$0xff]  ;;  %v5057_v5 = vld [vmem:[%s5209_s12 + $0x1b8] sm:$0xff]  ;;  %v5058_v37 = vld [vmem:[%s5209_s12 + $0x1a0] sm:$0xff] }
 0x24a   : > { %v1919_v55 = vmul.f32 %v5052_v51, %v1802_v7  ;;  %v1920_v14 = vmul.f32 %v5053_v17, %v1802_v7  ;;  %v5059_v7 = vld [vmem:[%s5209_s12 + $0x1a8] sm:$0xff] }
 0x24b   : > { %2898 = vmatprep.subr.bf16.mxu0 %v2433_v50 }
 0x24c   : > { %v1797_v49 = vpop.permute.xlu1 %1796  ;;  %2899 = vmatpush1.bf16.msra.mxu0 %v2432_v39  ;;  %2713 = vxpose.xlu1.c.b16.cont [3/8] %v4865_v59, 128  ;;  %v2059_v22 = vpop.permute.xlu0 %2058 }
 0x24d   : > { %v2236_v63 = vadd.f32 %v2059_v22, %v1879_v40  ;;  %v2237_v8 = vadd.f32 %v2059_v22, %v1880_v6  ;;  %2684 = vxpose.xlu0.c.b16.cont [6/8] %v4866_v1, 128  ;;  %v1917_v10 = vmul.f32 %v5054_v24, %v1797_v49  ;;  %v1918_v12 = vmul.f32 %v5055_v41, %v1797_v49  ;;  %v5060_v6 = vld [vmem:[%s5209_s12 + $0x2f0] sm:$0xff]  ;;  %v5061_v22 = vld [vmem:[%s5209_s12 + $0x2f8] sm:$0xff] }
 0x24f   : > { %v2338_v43 = vmax.f32 %v2236_v63, 0.0  ;;  %v2339_v3 = vmax.f32 %v2237_v8, 0.0  ;;  %v5062_v63 = vld [vmem:[%s5209_s12 + $0x2e0] sm:$0xff] }
 0x250   : > { %v2054_v32 = vpop.permute.xlu1 %2053  ;;  %2714 = vxpose.xlu1.c.b16.cont [4/8] %v4867_v53, 128  ;;  %v2159_v58 = vpop.permute.xlu0 %2158 }
 0x251   : > { %v2234_v11 = vadd.f32 %v2054_v32, %v1877_v44  ;;  %v2235_v35 = vadd.f32 %v2054_v32, %v1878_v46  ;;  %2685 = vxpose.xlu0.c.b16.cont [7/8] %v4868_v16, 128  ;;  %v2276_v29 = vadd.f32 %v2159_v58, %v1919_v55  ;;  %v2277_v61 = vadd.f32 %v2159_v58, %v1920_v14  ;;  %v5063_v16 = vld [vmem:[%s5209_s12 + $0x2e8] sm:$0xff] }
 0x253   : > { %v2336_v4 = vmax.f32 %v2234_v11, 0.0  ;;  %v2337_v28 = vmax.f32 %v2235_v35, 0.0  ;;  %v2378_v18 = vmax.f32 %v2276_v29, 0.0  ;;  %v2379_v26 = vmax.f32 %v2277_v61, 0.0  ;;  %v5064_v61 = vld [vmem:[%s5209_s12 + $0x1d0] sm:$0xff] }
 0x254   : > { %v2154_v57 = vpop.permute.xlu1 %2153  ;;  %2715 = vxpose.xlu1.c.b16.cont [5/8] %v4869_v31, 128  ;;  %v1712_v2 = vpop.permute.xlu0 %1711 }
 0x255   : > { %v2274_v34 = vadd.f32 %v2154_v57, %v1917_v10  ;;  %v2275_v19 = vadd.f32 %v2154_v57, %v1918_v12  ;;  %v2415_v45 = vpack.c.bf16 %v2339_v3, %v2337_v28  ;;  %v2414_v13 = vpack.c.bf16 %v2338_v43, %v2336_v4  ;;  %2686 = vxpose.xlu0.c.b16.end [8/8] %v4870_v38, 128 }
 0x256   : > { %v1883_v30 = vmul.f32 %v5056_v60, %v1712_v2  ;;  %v1884_v25 = vmul.f32 %v5057_v5, %v1712_v2  ;;  %v5066_v2 = vld [vmem:[%s5209_s12 + $0x1c0] sm:$0xff]  ;;  %v5071_v60 = vld [vmem:[%s5209_s12 + $0x308] sm:$0xff] }
 0x257   : > { %v2376_v23 = vmax.f32 %v2274_v34, 0.0  ;;  %v2377_v9 = vmax.f32 %v2275_v19, 0.0  ;;  %2799 = vmatprep.subr.bf16.mxu1 %v2415_v45  ;;  %v5065_v34 = vld [vmem:[%s5209_s12 + $0x1d8] sm:$0xff] }
 0x258   : > { %v1707_v62 = vpop.permute.xlu1 %1706  ;;  %2800 = vmatpush1.bf16.msra.mxu1 %v2414_v13  ;;  %2716 = vxpose.xlu1.c.b16.cont [6/8] %v4871_v0, 128  ;;  %v1812_v20 = vpop.permute.xlu0 %1811  ;;  %v5067_v0 = vld [vmem:[%s5209_s12 + $0x1c8] sm:$0xff] }
 0x259   : > { %v2435_v27 = vpack.c.bf16 %v2379_v26, %v2377_v9  ;;  %v2434_v52 = vpack.c.bf16 %v2378_v18, %v2376_v23  ;;  %v1881_v47 = vmul.f32 %v5058_v37, %v1707_v62  ;;  %v1882_v50 = vmul.f32 %v5059_v7, %v1707_v62  ;;  %v5068_v62 = vld [vmem:[%s5209_s12 + $0x310] sm:$0xff] }
 0x25a   : > { %v1923_v49 = vmul.f32 %v5060_v6, %v1812_v20  ;;  %v1924_v53 = vmul.f32 %v5061_v22, %v1812_v20 }
 0x25b   : > { %2900 = vmatprep.subr.bf16.mxu0 %v2435_v27  ;;  %v5069_v27 = vld [vmem:[%s5209_s12 + $0x318] sm:$0xff] }
 0x25c   : > { %v1807_v15 = vpop.permute.xlu1 %1806  ;;  %2901 = vmatpush1.bf16.msra.mxu0 %v2434_v52  ;;  %2717 = vxpose.xlu1.c.b16.cont [7/8] %v4872_v33, 128  ;;  %v2069_v48 = vpop.permute.xlu0 %2068 }
 0x25d   : > { %v2240_v59 = vadd.f32 %v2069_v48, %v1883_v30  ;;  %v2241_v39 = vadd.f32 %v2069_v48, %v1884_v25  ;;  %v1921_v8 = vmul.f32 %v5062_v63, %v1807_v15  ;;  %v1922_v21 = vmul.f32 %v5063_v16, %v1807_v15  ;;  %v5070_v48 = vld [vmem:[%s5209_s12 + $0x300] sm:$0xff] }
 0x25f   : > { %v2342_v46 = vmax.f32 %v2240_v59, 0.0  ;;  %v2343_v32 = vmax.f32 %v2241_v39, 0.0 }
 0x260   : > { %v2064_v1 = vpop.permute.xlu1 %2063  ;;  %2718 = vxpose.xlu1.c.b16.end [8/8] %v4873_v42, 128  ;;  %v2169_v54 = vpop.permute.xlu0 %2168 }
 0x261   : > { %v2238_v40 = vadd.f32 %v2064_v1, %v1881_v47  ;;  %v2239_v36 = vadd.f32 %v2064_v1, %v1882_v50  ;;  %v2280_v51 = vadd.f32 %v2169_v54, %v1923_v49  ;;  %v2281_v55 = vadd.f32 %v2169_v54, %v1924_v53 }
 0x263   : > { %v2340_v44 = vmax.f32 %v2238_v40, 0.0  ;;  %v2341_v56 = vmax.f32 %v2239_v36, 0.0  ;;  %v2382_v41 = vmax.f32 %v2280_v51, 0.0  ;;  %v2383_v12 = vmax.f32 %v2281_v55, 0.0 }
 0x264   : > { %v2164_v17 = vpop.permute.xlu1 %2163 }
 0x265   : > { %v1722_v14 = vpop.permute.xlu0 %1721  ;;  %v2278_v11 = vadd.f32 %v2164_v17, %v1921_v8  ;;  %v2279_v35 = vadd.f32 %v2164_v17, %v1922_v21  ;;  %v2417_v58 = vpack.c.bf16 %v2343_v32, %v2341_v56  ;;  %v2416_v31 = vpack.c.bf16 %v2342_v46, %v2340_v44  ;;  %v5072_v44 = vld [vmem:[%s5209_s12 + $0x1e0] sm:$0xff]  ;;  %v5073_v46 = vld [vmem:[%s5209_s12 + $0x1e8] sm:$0xff] }
 0x266   : > { %v1887_v57 = vmul.f32 %v5064_v61, %v1722_v14  ;;  %v1888_v19 = vmul.f32 %v5065_v34, %v1722_v14  ;;  %v5074_v17 = vld [vmem:[%s5209_s12 + $0x320] sm:$0xff] }
 0x267   : > { %v2380_v24 = vmax.f32 %v2278_v11, 0.0  ;;  %v2381_v10 = vmax.f32 %v2279_v35, 0.0  ;;  %2801 = vmatprep.subr.bf16.mxu1 %v2417_v58  ;;  %v5075_v11 = vld [vmem:[%s5209_s12 + $0x328] sm:$0xff] }
 0x268   : > { %v1717_v43 = vpop.permute.xlu1 %1716  ;;  %2802 = vmatpush1.bf16.msra.mxu1 %v2416_v31 }
 0x269   : > { %v1822_v3 = vpop.permute.xlu0 %1821  ;;  %v2437_v38 = vpack.c.bf16 %v2383_v12, %v2381_v10  ;;  %v2436_v4 = vpack.c.bf16 %v2382_v41, %v2380_v24  ;;  %v1885_v45 = vmul.f32 %v5066_v2, %v1717_v43  ;;  %v1886_v13 = vmul.f32 %v5067_v0, %v1717_v43  ;;  %v5076_v24 = vld [vmem:[%s5209_s12 + $0x1f0] sm:$0xff]  ;;  %v5077_v41 = vld [vmem:[%s5209_s12 + $0x1f8] sm:$0xff] }
 0x26a   : > { %v1927_v20 = vmul.f32 %v5068_v62, %v1822_v3  ;;  %v1928_v33 = vmul.f32 %v5069_v27, %v1822_v3 }
 0x26b   : > { %2902 = vmatprep.subr.bf16.mxu0 %v2437_v38 }
 0x26c   : > { %v1817_v28 = vpop.permute.xlu1 %1816  ;;  %2903 = vmatpush1.bf16.msra.mxu0 %v2436_v4 }
 0x26d   : > { %v2079_v29 = vpop.permute.xlu0 %2078  ;;  %v1925_v42 = vmul.f32 %v5070_v48, %v1817_v28  ;;  %v1926_v30 = vmul.f32 %v5071_v60, %v1817_v28 }
 0x26e   : > { %v2244_v18 = vadd.f32 %v2079_v29, %v1887_v57  ;;  %v2245_v26 = vadd.f32 %v2079_v29, %v1888_v19 }
 0x270   : > { %v2074_v23 = vpop.permute.xlu1 %2073  ;;  %v2346_v7 = vmax.f32 %v2244_v18, 0.0  ;;  %v2347_v50 = vmax.f32 %v2245_v26, 0.0 }
 0x271   : > { %v2179_v9 = vpop.permute.xlu0 %2178  ;;  %v2242_v52 = vadd.f32 %v2074_v23, %v1885_v45  ;;  %v2243_v15 = vadd.f32 %v2074_v23, %v1886_v13 }
 0x272   : > { %v2284_v37 = vadd.f32 %v2179_v9, %v1927_v20  ;;  %v2285_v47 = vadd.f32 %v2179_v9, %v1928_v33 }
 0x273   : > { %v2344_v5 = vmax.f32 %v2242_v52, 0.0  ;;  %v2345_v25 = vmax.f32 %v2243_v15, 0.0 }
 0x274   : > { %v2174_v59 = vpop.permute.xlu1 %2173  ;;  %v2386_v6 = vmax.f32 %v2284_v37, 0.0  ;;  %v2387_v49 = vmax.f32 %v2285_v47, 0.0 }
 0x275   : > { %v1732_v39 = vpop.permute.xlu0 %1731  ;;  %v2282_v1 = vadd.f32 %v2174_v59, %v1925_v42  ;;  %v2283_v54 = vadd.f32 %v2174_v59, %v1926_v30  ;;  %v2419_v40 = vpack.c.bf16 %v2347_v50, %v2345_v25  ;;  %v2418_v36 = vpack.c.bf16 %v2346_v7, %v2344_v5 }
 0x276   : > { %v1891_v10 = vmul.f32 %v5076_v24, %v1732_v39  ;;  %v1892_v12 = vmul.f32 %v5077_v41, %v1732_v39 }
 0x277   : > { %v2384_v22 = vmax.f32 %v2282_v1, 0.0  ;;  %v2385_v53 = vmax.f32 %v2283_v54, 0.0  ;;  %2803 = vmatprep.subr.bf16.mxu1 %v2419_v40 }
 0x278   : > { %v1727_v63 = vpop.permute.xlu1 %1726  ;;  %2804 = vmatpush1.bf16.msra.mxu1 %v2418_v36 }
 0x279   : > { %v2084_v8 = vpop.permute.xlu0 %2083  ;;  %v2439_v16 = vpack.c.bf16 %v2387_v49, %v2385_v53  ;;  %v2438_v21 = vpack.c.bf16 %v2386_v6, %v2384_v22  ;;  %v1889_v56 = vmul.f32 %v5072_v44, %v1727_v63  ;;  %v1890_v32 = vmul.f32 %v5073_v46, %v1727_v63 }
 0x27b   : > { %2904 = vmatprep.subr.bf16.mxu0 %v2439_v16  ;;  %v2246_v58 = vadd.f32 %v2084_v8, %v1889_v56  ;;  %v2247_v31 = vadd.f32 %v2084_v8, %v1890_v32 }
 0x27c   : > { %v1827_v51 = vpop.permute.xlu1 %1826  ;;  %2905 = vmatpush1.bf16.msra.mxu0 %v2438_v21 }
 0x27d   : > { %v2184_v55 = vpop.permute.xlu0 %2183  ;;  %v1929_v14 = vmul.f32 %v5074_v17, %v1827_v51  ;;  %v1930_v35 = vmul.f32 %v5075_v11, %v1827_v51  ;;  %v2348_v34 = vmax.f32 %v2246_v58, 0.0  ;;  %v2349_v19 = vmax.f32 %v2247_v31, 0.0 }
 0x27f   : > { %v2286_v43 = vadd.f32 %v2184_v55, %v1929_v14  ;;  %v2287_v3 = vadd.f32 %v2184_v55, %v1930_v35  ;;  %v2442_v55 = vld [vmem:[#allocation2] sm:$0xff]  ;;  %v2443_v35 = vld [vmem:[#allocation2 + $0x8] sm:$0xff] }
 0x280   : > { %v2089_v38 = vpop.permute.xlu1 %2088 }
 0x281   : > { %v2388_v4 = vmax.f32 %v2286_v43, 0.0  ;;  %v2389_v28 = vmax.f32 %v2287_v3, 0.0  ;;  %v2248_v29 = vadd.f32 %v2089_v38, %v1891_v10  ;;  %v2249_v61 = vadd.f32 %v2089_v38, %v1892_v12  ;;  %v2444_v10 = vld [vmem:[#allocation2 + $0x10] sm:$0xff]  ;;  %v2445_v38 = vld [vmem:[#allocation2 + $0x18] sm:$0xff] }
 0x282   : > { %v2735_v57 = vpop.trf.xlu0 }
 0x283   : > { %4747 = vmatprep.mubr.msk.bf16.mxu0 %vm2743_vm2, %v2735_v57  ;;  %v2440_v2 = vpack.c.bf16 %v2388_v4, %v2388_v4  ;;  %v2441_v45 = vpack.c.bf16 %v2389_v28, %v2389_v28  ;;  %v2350_v0 = vmax.f32 %v2248_v29, 0.0  ;;  %v2351_v13 = vmax.f32 %v2249_v61, 0.0 }
 0x285   : > { %4746 = vmatprep.subr.msk.bf16.mxu0 %vm2768_vm3, %v2441_v45  ;;  %v2770_v26 = vsel %vm2768_vm3, %v2440_v2, 0  ;;  %v2421_v23 = vpack.c.bf16 %v2351_v13, %v2349_v19  ;;  %v2420_v9 = vpack.c.bf16 %v2350_v0, %v2348_v34  ;;  %v2446_v19 = vld [vmem:[#allocation2 + $0x20] sm:$0xff]  ;;  %v2447_v13 = vld [vmem:[#allocation2 + $0x28] sm:$0xff] }
 0x286   : > { %v2736_v18 = vpop.trf.xlu0  ;;  %2907 = vmatpush1.bf16.msra.mxu0 %v2770_v26 }
 0x287   : > { %2805 = vmatprep.subr.bf16.mxu1 %v2421_v23 }
 0x288   : > { %2806 = vmatpush1.bf16.msra.mxu1 %v2420_v9  ;;  %v2448_v9 = vld [vmem:[#allocation2 + $0x30] sm:$0xff] }
 0x28a   : > { %v2737_v62 = vpop.trf.xlu0  ;;  %v2703_v20 = vpop.trf.xlu1 }
 0x28b   : > { %2807 = vmatprep.mubr.bf16.mxu1 %v2703_v20 }
 0x28e   : > { %v2738_v27 = vpop.trf.xlu0  ;;  %v2704_v33 = vpop.trf.xlu1 }
 0x292   : > { %v2739_v52 = vpop.trf.xlu0  ;;  %v2705_v15 = vpop.trf.xlu1 }
 0x296   : > { %v2740_v48 = vpop.trf.xlu0  ;;  %v2706_v42 = vpop.trf.xlu1 }
 0x29a   : > { %v2741_v60 = vpop.trf.xlu0  ;;  %v2707_v30 = vpop.trf.xlu1 }
 0x29e   : > { %v2742_v5 = vpop.trf.xlu0  ;;  %v2708_v25 = vpop.trf.xlu1 }
 0x2a2   : > { %v2687_v37 = vpop.trf.xlu0  ;;  %v2709_v47 = vpop.trf.xlu1 }
 0x2a3   : > { %2808 = vmatmul.mubr.bf16.vlgmr.msra.gmra.mrb[0].mxu1 %v2687_v37 }
 0x2a4   : > { %2817 = vmatprep.mubr.bf16.mxu1 %v2704_v33 }
 0x2a6   : > { %v2710_v7 = vpop.trf.xlu1  ;;  %v2688_v50 = vpop.trf.xlu0 }
 0x2aa   : > { %v2719_v59 = vpop.trf.xlu1  ;;  %v2689_v39 = vpop.trf.xlu0 }
 0x2ab   : > { %2818 = vmatmul.mubr.bf16.gmra.mrb[4].mxu1 %v2688_v50  ;;  %2921 = vmatmul.mubr.bf16.vlgmr.msra.gmra.mrb[0].mxu0 %v2719_v59  ;;  %v2451_v50 = vld [vmem:[#allocation2 + $0x48] sm:$0xff] }
 0x2ac   : > { %2827 = vmatprep.mubr.bf16.mxu1 %v2705_v15  ;;  %4748 = vmatprep.mubr.msk.bf16.mxu0 %vm2743_vm2, %v2736_v18 }
 0x2ae   : > { %v2720_v1 = vpop.trf.xlu1  ;;  %v2690_v54 = vpop.trf.xlu0 }
 0x2b2   : > { %v2721_v40 = vpop.trf.xlu1  ;;  %v2691_v36 = vpop.trf.xlu0 }
 0x2b3   : > { %2828 = vmatmul.mubr.bf16.gmra.mrb[8].mxu1 %v2689_v39  ;;  %2931 = vmatmul.mubr.bf16.gmra.mrb[4].mxu0 %v2720_v1 }
 0x2b4   : > { %2837 = vmatprep.mubr.bf16.mxu1 %v2706_v42  ;;  %4749 = vmatprep.mubr.msk.bf16.mxu0 %vm2743_vm2, %v2737_v62 }
 0x2b6   : > { %v2722_v6 = vpop.trf.xlu1  ;;  %v2692_v49 = vpop.trf.xlu0 }
 0x2ba   : > { %v2723_v22 = vpop.trf.xlu1  ;;  %v2693_v53 = vpop.trf.xlu0 }
 0x2bb   : > { %2838 = vmatmul.mubr.bf16.gmra.mrb[12].mxu1 %v2690_v54  ;;  %2941 = vmatmul.mubr.bf16.gmra.mrb[8].mxu0 %v2721_v40  ;;  %v2452_v54 = vld [vmem:[#allocation2 + $0x50] sm:$0xff] }
 0x2bc   : > { %2847 = vmatprep.mubr.bf16.mxu1 %v2707_v30  ;;  %4750 = vmatprep.mubr.msk.bf16.mxu0 %vm2743_vm2, %v2738_v27 }
 0x2be   : > { %v2724_v63 = vpop.trf.xlu1  ;;  %v2694_v8 = vpop.trf.xlu0 }
 0x2c2   : > { %v2725_v16 = vpop.trf.xlu1 }
 0x2c3   : > { %2848 = vmatmul.mubr.bf16.gmra.mrb[16].mxu1 %v2691_v36  ;;  %2951 = vmatmul.mubr.bf16.gmra.mrb[12].mxu0 %v2722_v6 }
 0x2c4   : > { %2857 = vmatprep.mubr.bf16.mxu1 %v2708_v25  ;;  %4751 = vmatprep.mubr.msk.bf16.mxu0 %vm2743_vm2, %v2739_v52  ;;  %v2449_v52 = vld [vmem:[#allocation2 + $0x38] sm:$0xff]  ;;  %v2450_v25 = vld [vmem:[#allocation2 + $0x40] sm:$0xff] }
 0x2c6   : > { %v2726_v21 = vpop.trf.xlu1 }
 0x2cb   : > { %2858 = vmatmul.mubr.bf16.gmra.mrb[20].mxu1 %v2692_v49  ;;  %2961 = vmatmul.mubr.bf16.gmra.mrb[16].mxu0 %v2723_v22  ;;  %v2453_v22 = vld [vmem:[#allocation2 + $0x58] sm:$0xff] }
 0x2cc   : > { %2867 = vmatprep.mubr.bf16.mxu1 %v2709_v47  ;;  %4752 = vmatprep.mubr.msk.bf16.mxu0 %vm2743_vm2, %v2740_v48 }
 0x2d3   : > { %2868 = vmatmul.mubr.bf16.gmra.mrb[24].mxu1 %v2693_v53  ;;  %2971 = vmatmul.mubr.bf16.gmra.mrb[20].mxu0 %v2724_v63 }
 0x2d4   : > { %2877 = vmatprep.mubr.bf16.mxu1 %v2710_v7  ;;  %4753 = vmatprep.mubr.msk.bf16.mxu0 %vm2743_vm2, %v2741_v60 }
 0x2db   : > { %2878 = vmatmul.mubr.bf16.gmra.mrb[28].mxu1 %v2694_v8  ;;  %2981 = vmatmul.mubr.bf16.gmra.mrb[24].mxu0 %v2725_v16 }
 0x2dc   : > { %4754 = vmatprep.mubr.msk.bf16.mxu0 %vm2743_vm2, %v2742_v5 }
 0x2e3   : > { %2991 = vmatmul.mubr.bf16.gmra.mrb[28].mxu0 %v2726_v21 }
 0x376   : > { %v2809_v44 = vpop.f32.mrb[0].mxu1 }
 0x377   : > { %v2811_v56 = vpop.f32.mrb[1].mxu1 }
 0x378   : > { %v2813_v46 = vpop.f32.mrb[2].mxu1 }
 0x379   : > { %v2815_v32 = vpop.f32.mrb[3].mxu1 }
 0x37e   : > { %v2819_v51 = vpop.f32.mrb[4].mxu1  ;;  %v2922_v17 = vpop.f32.mrb[0].mxu0 }
 0x37f   : > { %v2821_v14 = vpop.f32.mrb[5].mxu1  ;;  %v2923_v11 = vadd.f32 %v2922_v17, %v2809_v44  ;;  %v2924_v58 = vpop.f32.mrb[1].mxu0 }
 0x380   : > { %v2823_v31 = vpop.f32.mrb[6].mxu1  ;;  %v2925_v24 = vadd.f32 %v2924_v58, %v2811_v56  ;;  %v2926_v41 = vpop.f32.mrb[2].mxu0  ;;  %v2454_v56 = vld [vmem:[#allocation2 + $0x60] sm:$0xff] }
 0x381   : > { %v2825_v12 = vpop.f32.mrb[7].mxu1  ;;  %v3001_v43 = vadd.f32 %v2923_v11, %v2442_v55  ;;  %v2927_v3 = vadd.f32 %v2926_v41, %v2813_v46  ;;  %v2928_v4 = vpop.f32.mrb[3].mxu0  ;;  %v2455_v55 = vld [vmem:[#allocation2 + $0x68] sm:$0xff]  ;;  %v2457_v41 = vld [vmem:[#allocation2 + $0x78] sm:$0xff] }
 0x382   : > { %v3002_v28 = vadd.f32 %v2925_v24, %v2443_v35  ;;  %v2929_v29 = vadd.f32 %v2928_v4, %v2815_v32  ;;  %v2456_v35 = vld [vmem:[#allocation2 + $0x70] sm:$0xff] }
 0x383   : > { %3033 = vst [vmem:[#allocation2] sm:$0xff] %v3001_v43  ;;  %v3003_v61 = vadd.f32 %v2927_v3, %v2444_v10 }
 0x384   : > { %3034 = vst.msk [vmem:[#allocation2 + $0x8] sm:$0xff] %vm502_vm1, %v3002_v28  ;;  %v3004_v57 = vadd.f32 %v2929_v29, %v2445_v38  ;;  %v2458_v29 = vld [vmem:[#allocation2 + $0x80] sm:$0xff] }
 0x385   : > { %3035 = vst [vmem:[#allocation2 + $0x10] sm:$0xff] %v3003_v61 }
 0x386   : > { %v2829_v34 = vpop.f32.mrb[8].mxu1  ;;  %3036 = vst.msk [vmem:[#allocation2 + $0x18] sm:$0xff] %vm502_vm1, %v3004_v57  ;;  %v2932_v2 = vpop.f32.mrb[4].mxu0 }
 0x387   : > { %v2831_v45 = vpop.f32.mrb[9].mxu1  ;;  %v2933_v0 = vadd.f32 %v2932_v2, %v2819_v51  ;;  %v2934_v18 = vpop.f32.mrb[5].mxu0 }
 0x388   : > { %v2833_v26 = vpop.f32.mrb[10].mxu1  ;;  %v2935_v23 = vadd.f32 %v2934_v18, %v2821_v14  ;;  %v2936_v62 = vpop.f32.mrb[6].mxu0 }
 0x389   : > { %v2835_v20 = vpop.f32.mrb[11].mxu1  ;;  %v3005_v27 = vadd.f32 %v2933_v0, %v2446_v19  ;;  %v2937_v33 = vadd.f32 %v2936_v62, %v2823_v31  ;;  %v2938_v15 = vpop.f32.mrb[7].mxu0  ;;  %v2459_v19 = vld [vmem:[#allocation2 + $0x88] sm:$0xff]  ;;  %v2461_v62 = vld [vmem:[#allocation2 + $0x98] sm:$0xff] }
 0x38a   : > { %v3006_v48 = vadd.f32 %v2935_v23, %v2447_v13  ;;  %v2939_v42 = vadd.f32 %v2938_v15, %v2825_v12  ;;  %v2460_v13 = vld [vmem:[#allocation2 + $0x90] sm:$0xff] }
 0x38b   : > { %3037 = vst [vmem:[#allocation2 + $0x20] sm:$0xff] %v3005_v27  ;;  %v3007_v60 = vadd.f32 %v2937_v33, %v2448_v9 }
 0x38c   : > { %3038 = vst.msk [vmem:[#allocation2 + $0x28] sm:$0xff] %vm502_vm1, %v3006_v48  ;;  %v3008_v30 = vadd.f32 %v2939_v42, %v2449_v52  ;;  %v2462_v42 = vld [vmem:[#allocation2 + $0xa0] sm:$0xff] }
 0x38d   : > { %3039 = vst [vmem:[#allocation2 + $0x30] sm:$0xff] %v3007_v60 }
 0x38e   : > { %v2839_v5 = vpop.f32.mrb[12].mxu1  ;;  %3040 = vst.msk [vmem:[#allocation2 + $0x38] sm:$0xff] %vm502_vm1, %v3008_v30  ;;  %v2942_v37 = vpop.f32.mrb[8].mxu0 }
 0x38f   : > { %v2841_v47 = vpop.f32.mrb[13].mxu1  ;;  %v2943_v7 = vadd.f32 %v2942_v37, %v2829_v34  ;;  %v2944_v59 = vpop.f32.mrb[9].mxu0 }
 0x390   : > { %v2843_v39 = vpop.f32.mrb[14].mxu1  ;;  %v2945_v1 = vadd.f32 %v2944_v59, %v2831_v45  ;;  %v2946_v40 = vpop.f32.mrb[10].mxu0 }
 0x391   : > { %v2845_v36 = vpop.f32.mrb[15].mxu1  ;;  %v3009_v6 = vadd.f32 %v2943_v7, %v2450_v25  ;;  %v2947_v49 = vadd.f32 %v2946_v40, %v2833_v26  ;;  %v2948_v53 = vpop.f32.mrb[11].mxu0  ;;  %v2463_v25 = vld [vmem:[#allocation2 + $0xa8] sm:$0xff]  ;;  %v2465_v40 = vld [vmem:[#allocation2 + $0xb8] sm:$0xff] }
 0x392   : > { %v3010_v63 = vadd.f32 %v2945_v1, %v2451_v50  ;;  %v2949_v8 = vadd.f32 %v2948_v53, %v2835_v20  ;;  %v2464_v50 = vld [vmem:[#allocation2 + $0xb0] sm:$0xff] }
 0x393   : > { %3041 = vst [vmem:[#allocation2 + $0x40] sm:$0xff] %v3009_v6  ;;  %v3011_v16 = vadd.f32 %v2947_v49, %v2452_v54 }
 0x394   : > { %3042 = vst.msk [vmem:[#allocation2 + $0x48] sm:$0xff] %vm502_vm1, %v3010_v63  ;;  %v3012_v21 = vadd.f32 %v2949_v8, %v2453_v22  ;;  %v2466_v8 = vld [vmem:[#allocation2 + $0xc0] sm:$0xff] }
 0x395   : > { %3043 = vst [vmem:[#allocation2 + $0x50] sm:$0xff] %v3011_v16 }
 0x396   : > { %v2849_v44 = vpop.f32.mrb[16].mxu1  ;;  %3044 = vst.msk [vmem:[#allocation2 + $0x58] sm:$0xff] %vm502_vm1, %v3012_v21  ;;  %v2952_v46 = vpop.f32.mrb[12].mxu0 }
 0x397   : > { %v2851_v32 = vpop.f32.mrb[17].mxu1  ;;  %v2953_v51 = vadd.f32 %v2952_v46, %v2839_v5  ;;  %v2954_v17 = vpop.f32.mrb[13].mxu0 }
 0x398   : > { %v2853_v14 = vpop.f32.mrb[18].mxu1  ;;  %v2955_v11 = vadd.f32 %v2954_v17, %v2841_v47  ;;  %v2956_v58 = vpop.f32.mrb[14].mxu0 }
 0x399   : > { %v2855_v31 = vpop.f32.mrb[19].mxu1  ;;  %v3013_v24 = vadd.f32 %v2953_v51, %v2454_v56  ;;  %v2957_v10 = vadd.f32 %v2956_v58, %v2843_v39  ;;  %v2958_v12 = vpop.f32.mrb[15].mxu0  ;;  %v2467_v56 = vld [vmem:[#allocation2 + $0xc8] sm:$0xff]  ;;  %v2469_v58 = vld [vmem:[#allocation2 + $0xd8] sm:$0xff] }
 0x39a   : > { %v3014_v43 = vadd.f32 %v2955_v11, %v2455_v55  ;;  %v2959_v3 = vadd.f32 %v2958_v12, %v2845_v36  ;;  %v2468_v55 = vld [vmem:[#allocation2 + $0xd0] sm:$0xff] }
 0x39b   : > { %3045 = vst [vmem:[#allocation2 + $0x60] sm:$0xff] %v3013_v24  ;;  %v3015_v38 = vadd.f32 %v2957_v10, %v2456_v35 }
 0x39c   : > { %3046 = vst.msk [vmem:[#allocation2 + $0x68] sm:$0xff] %vm502_vm1, %v3014_v43  ;;  %v3016_v4 = vadd.f32 %v2959_v3, %v2457_v41  ;;  %v2470_v43 = vld [vmem:[#allocation2 + $0xe0] sm:$0xff] }
 0x39d   : > { %3047 = vst [vmem:[#allocation2 + $0x70] sm:$0xff] %v3015_v38 }
 0x39e   : > { %v2859_v28 = vpop.f32.mrb[20].mxu1  ;;  %3048 = vst.msk [vmem:[#allocation2 + $0x78] sm:$0xff] %vm502_vm1, %v3016_v4  ;;  %v2962_v61 = vpop.f32.mrb[16].mxu0  ;;  %v2471_v4 = vld [vmem:[#allocation2 + $0xe8] sm:$0xff] }
 0x39f   : > { %v2861_v57 = vpop.f32.mrb[21].mxu1  ;;  %v2963_v34 = vadd.f32 %v2962_v61, %v2849_v44  ;;  %v2964_v2 = vpop.f32.mrb[17].mxu0  ;;  %v2472_v61 = vld [vmem:[#allocation2 + $0xf0] sm:$0xff] }
 0x3a0   : > { %v2863_v45 = vpop.f32.mrb[22].mxu1  ;;  %v2965_v0 = vadd.f32 %v2964_v2, %v2851_v32  ;;  %v2966_v18 = vpop.f32.mrb[18].mxu0  ;;  %v2473_v2 = vld [vmem:[#allocation2 + $0xf8] sm:$0xff] }
 0x3a1   : > { %v2865_v26 = vpop.f32.mrb[23].mxu1  ;;  %v3017_v23 = vadd.f32 %v2963_v34, %v2458_v29  ;;  %v2967_v9 = vadd.f32 %v2966_v18, %v2853_v14  ;;  %v2968_v20 = vpop.f32.mrb[19].mxu0 }
 0x3a2   : > { %v3018_v27 = vadd.f32 %v2965_v0, %v2459_v19  ;;  %v2969_v33 = vadd.f32 %v2968_v20, %v2855_v31 }
 0x3a3   : > { %3049 = vst [vmem:[#allocation2 + $0x80] sm:$0xff] %v3017_v23  ;;  %v3019_v52 = vadd.f32 %v2967_v9, %v2460_v13 }
 0x3a4   : > { %3050 = vst.msk [vmem:[#allocation2 + $0x88] sm:$0xff] %vm502_vm1, %v3018_v27  ;;  %v3020_v15 = vadd.f32 %v2969_v33, %v2461_v62 }
 0x3a5   : > { %3051 = vst [vmem:[#allocation2 + $0x90] sm:$0xff] %v3019_v52 }
 0x3a6   : > { %v2869_v48 = vpop.f32.mrb[24].mxu1  ;;  %3052 = vst.msk [vmem:[#allocation2 + $0x98] sm:$0xff] %vm502_vm1, %v3020_v15  ;;  %v2972_v60 = vpop.f32.mrb[20].mxu0 }
 0x3a7   : > { %v2871_v30 = vpop.f32.mrb[25].mxu1  ;;  %v2973_v5 = vadd.f32 %v2972_v60, %v2859_v28  ;;  %v2974_v37 = vpop.f32.mrb[21].mxu0 }
 0x3a8   : > { %v2873_v47 = vpop.f32.mrb[26].mxu1  ;;  %v2975_v7 = vadd.f32 %v2974_v37, %v2861_v57  ;;  %v2976_v59 = vpop.f32.mrb[22].mxu0 }
 0x3a9   : > { %v2875_v39 = vpop.f32.mrb[27].mxu1  ;;  %v3021_v1 = vadd.f32 %v2973_v5, %v2462_v42  ;;  %v2977_v54 = vadd.f32 %v2976_v59, %v2863_v45  ;;  %v2978_v36 = vpop.f32.mrb[23].mxu0 }
 0x3aa   : > { %v3022_v6 = vadd.f32 %v2975_v7, %v2463_v25  ;;  %v2979_v49 = vadd.f32 %v2978_v36, %v2865_v26 }
 0x3ab   : > { %3053 = vst [vmem:[#allocation2 + $0xa0] sm:$0xff] %v3021_v1  ;;  %v3023_v22 = vadd.f32 %v2977_v54, %v2464_v50 }
 0x3ac   : > { %3054 = vst.msk [vmem:[#allocation2 + $0xa8] sm:$0xff] %vm502_vm1, %v3022_v6  ;;  %v3024_v53 = vadd.f32 %v2979_v49, %v2465_v40 }
 0x3ad   : > { %3055 = vst [vmem:[#allocation2 + $0xb0] sm:$0xff] %v3023_v22 }
 0x3ae   : > { %v2879_v63 = vpop.f32.mrb[28].mxu1  ;;  %3056 = vst.msk [vmem:[#allocation2 + $0xb8] sm:$0xff] %vm502_vm1, %v3024_v53  ;;  %v2982_v16 = vpop.f32.mrb[24].mxu0 }
 0x3af   : > { %v2881_v21 = vpop.f32.mrb[29].mxu1  ;;  %v2983_v44 = vadd.f32 %v2982_v16, %v2869_v48  ;;  %v2984_v46 = vpop.f32.mrb[25].mxu0 }
 0x3b0   : > { %v2883_v32 = vpop.f32.mrb[30].mxu1  ;;  %v2985_v51 = vadd.f32 %v2984_v46, %v2871_v30  ;;  %v2986_v17 = vpop.f32.mrb[26].mxu0 }
 0x3b1   : > { %v2885_v14 = vpop.f32.mrb[31].mxu1  ;;  %v3025_v11 = vadd.f32 %v2983_v44, %v2466_v8  ;;  %v2987_v35 = vadd.f32 %v2986_v17, %v2873_v47  ;;  %v2988_v31 = vpop.f32.mrb[27].mxu0 }
 0x3b2   : > { %v3026_v24 = vadd.f32 %v2985_v51, %v2467_v56  ;;  %v2989_v10 = vadd.f32 %v2988_v31, %v2875_v39 }
 0x3b3   : > { %3057 = vst [vmem:[#allocation2 + $0xc0] sm:$0xff] %v3025_v11  ;;  %v3027_v41 = vadd.f32 %v2987_v35, %v2468_v55 }
 0x3b4   : > { %3058 = vst.msk [vmem:[#allocation2 + $0xc8] sm:$0xff] %vm502_vm1, %v3026_v24  ;;  %v3028_v12 = vadd.f32 %v2989_v10, %v2469_v58 }
 0x3b5   : > { %3059 = vst [vmem:[#allocation2 + $0xd0] sm:$0xff] %v3027_v41 }
 0x3b6   : > { %3060 = vst.msk [vmem:[#allocation2 + $0xd8] sm:$0xff] %vm502_vm1, %v3028_v12  ;;  %v2992_v3 = vpop.f32.mrb[28].mxu0 }
 0x3b7   : > { %v2993_v38 = vadd.f32 %v2992_v3, %v2879_v63  ;;  %v2994_v28 = vpop.f32.mrb[29].mxu0 }
 0x3b8   : > { %v2995_v29 = vadd.f32 %v2994_v28, %v2881_v21  ;;  %v2996_v57 = vpop.f32.mrb[30].mxu0  ;;  %3068 = sbr.rel (%p4755_p5) target bundleno = 2134 (0x856), region = 60 }
 0x3b9   : > { %v3029_v34 = vadd.f32 %v2993_v38, %v2470_v43  ;;  %v2997_v19 = vadd.f32 %v2996_v57, %v2883_v32  ;;  %v2998_v45 = vpop.f32.mrb[31].mxu0 }
 0x3ba   : > { %v3030_v0 = vadd.f32 %v2995_v29, %v2471_v4  ;;  %v2999_v13 = vadd.f32 %v2998_v45, %v2885_v14 }
 0x3bb   : > { %3061 = vst [vmem:[#allocation2 + $0xe0] sm:$0xff] %v3029_v34  ;;  %v3031_v18 = vadd.f32 %v2997_v19, %v2472_v61 }
 0x3bc   : > { %3062 = vst.msk [vmem:[#allocation2 + $0xe8] sm:$0xff] %vm502_vm1, %v3030_v0  ;;  %v3032_v26 = vadd.f32 %v2999_v13, %v2473_v2 }
 0x3bd   : > { %3063 = vst [vmem:[#allocation2 + $0xf0] sm:$0xff] %v3031_v18 }
 0x3be   : > { %3064 = vst.msk [vmem:[#allocation2 + $0xf8] sm:$0xff] %vm502_vm1, %v3032_v26 }
 0x3bf   : > { %v6867_v23 = vld [vmem:[#allocation2] sm:$0xff]  ;;  %v6869_v9 = vld [vmem:[#allocation2 + $0x8] sm:$0xff]  ;;  %v6871_v62 = vld [vmem:[#allocation2 + $0x10] sm:$0xff]  ;;  %vm3709_vm4 = vcmask 130048   ;;  %vm3718_vm5 = vcmask 818848   ;;  %s5141_s24 = smov 16  }
 0x3c0   : > { %v3101_v20 = vsel %vm502_vm1, %v6869_v9, 0.0  ;;  %v3165_v27 = vmul.f32 %v6867_v23, %v6867_v23  ;;  %v3166_v33 = vmul.f32 %v6869_v9, %v6869_v9  ;;  %v6879_v52 = vld [vmem:[#allocation2 + $0x18] sm:$0xff]  ;;  %v3167_v42 = vmul.f32 %v6871_v62, %v6871_v62  ;;  %v6888_v30 = vld [vmem:[#allocation2 + $0x28] sm:$0xff]  ;;  %v6895_v50 = vld [vmem:[#allocation2 + $0x20] sm:$0xff]  ;;  %s5142_s21 = smov 1   ;;  %s5144_s25 = smov 114  }
 0x3c1   : > { %v3102_v15 = vadd.f32 %v3101_v20, %v6867_v23  ;;  %v3105_v48 = vsel %vm502_vm1, %v6879_v52, 0.0  ;;  %v3168_v60 = vmul.f32 %v6879_v52, %v6879_v52  ;;  %v6893_v7 = vld [vmem:[#allocation2 + $0x38] sm:$0xff]  ;;  %v3109_v59 = vsel %vm502_vm1, %v6888_v30, 0.0  ;;  %v6901_v54 = vld [vmem:[#allocation2 + $0x30] sm:$0xff]  ;;  %v6914_v8 = vld [vmem:[#allocation2 + $0x48] sm:$0xff]  ;;  %s5145_s26 = smov 100  }
 0x3c2   : > { %v3197_v5 = vsel %vm502_vm1, %v3166_v33, 0.0  ;;  %v3106_v37 = vadd.f32 %v3105_v48, %v6871_v62  ;;  %v3170_v39 = vmul.f32 %v6888_v30, %v6888_v30  ;;  %v3113_v40 = vsel %vm502_vm1, %v6893_v7, 0.0  ;;  %v6917_v44 = vld [vmem:[#allocation2 + $0x58] sm:$0xff]  ;;  %v6919_v56 = vld [vmem:[#allocation2 + $0x40] sm:$0xff]  ;;  %v6927_v17 = vld [vmem:[#allocation2 + $0x50] sm:$0xff]  ;;  %s5146_s28 = smov 14  }
 0x3c3   : > { %3103 = vadd.xlane.f32.xlu0 %v3102_v15  ;;  %v3198_v25 = vadd.f32 %v3197_v5, %v3165_v27  ;;  %v3201_v47 = vsel %vm502_vm1, %v3168_v60, 0.0  ;;  %v3172_v36 = vmul.f32 %v6893_v7, %v6893_v7  ;;  %v3110_v6 = vadd.f32 %v3109_v59, %v6895_v50  ;;  %v6935_v31 = vld [vmem:[#allocation2 + $0x68] sm:$0xff]  ;;  %v6941_v12 = vld [vmem:[#allocation2 + $0x78] sm:$0xff]  ;;  %v6943_v3 = vld [vmem:[#allocation2 + $0x60] sm:$0xff]  ;;  %s5147_s29 = smov 15   ;;  %s5148_s30 = smov 13  }
 0x3c4   : > { %v3202_v1 = vadd.f32 %v3201_v47, %v3167_v42  ;;  %v3169_v49 = vmul.f32 %v6895_v50, %v6895_v50  ;;  %v3205_v22 = vsel %vm502_vm1, %v3170_v39, 0.0  ;;  %v3114_v53 = vadd.f32 %v3113_v40, %v6901_v54  ;;  %v6949_v29 = vld [vmem:[#allocation2 + $0x70] sm:$0xff]  ;;  %v6962_v13 = vld [vmem:[#allocation2 + $0x88] sm:$0xff]  ;;  %v6965_v20 = vld [vmem:[#allocation2 + $0x98] sm:$0xff]  ;;  %s5149_s9 = smov 112  }
 0x3c5   : > { %3199 = vadd.xlane.f32.xlu1 %v3198_v25  ;;  %v3171_v63 = vmul.f32 %v6901_v54, %v6901_v54  ;;  %v3209_v16 = vsel %vm502_vm1, %v3172_v36, 0.0  ;;  %v3117_v46 = vsel %vm502_vm1, %v6914_v8, 0.0  ;;  %v3174_v32 = vmul.f32 %v6914_v8, %v6914_v8  ;;  %v6967_v27 = vld [vmem:[#allocation2 + $0x80] sm:$0xff]  ;;  %v6973_v42 = vld [vmem:[#allocation2 + $0x90] sm:$0xff] }
 0x3c6   : > { %v3206_v21 = vadd.f32 %v3205_v22, %v3169_v49  ;;  %v3176_v55 = vmul.f32 %v6917_v44, %v6917_v44  ;;  %v3121_v14 = vsel %vm502_vm1, %v6917_v44, 0.0  ;;  %v3118_v11 = vadd.f32 %v3117_v46, %v6919_v56  ;;  %v6991_v49 = vld [vmem:[#allocation2 + $0xa0] sm:$0xff] }
 0x3c7   : > { %3107 = vadd.xlane.f32.xlu0 %v3106_v37  ;;  %v3210_v51 = vadd.f32 %v3209_v16, %v3171_v63  ;;  %v3173_v35 = vmul.f32 %v6919_v56, %v6919_v56  ;;  %v3213_v58 = vsel %vm502_vm1, %v3174_v32, 0.0  ;;  %v3122_v24 = vadd.f32 %v3121_v14, %v6927_v17 }
 0x3c8   : > { %v3175_v10 = vmul.f32 %v6927_v17, %v6927_v17  ;;  %v3217_v41 = vsel %vm502_vm1, %v3176_v55, 0.0  ;;  %v3125_v38 = vsel %vm502_vm1, %v6935_v31, 0.0  ;;  %v3178_v4 = vmul.f32 %v6935_v31, %v6935_v31 }
 0x3c9   : > { %3203 = vadd.xlane.f32.xlu1 %v3202_v1  ;;  %v3214_v43 = vadd.f32 %v3213_v58, %v3173_v35  ;;  %v3129_v61 = vsel %vm502_vm1, %v6941_v12, 0.0  ;;  %v3180_v57 = vmul.f32 %v6941_v12, %v6941_v12  ;;  %v3126_v34 = vadd.f32 %v3125_v38, %v6943_v3  ;;  %v6986_v1 = vld [vmem:[#allocation2 + $0xa8] sm:$0xff] }
 0x3ca   : > { %v3218_v28 = vadd.f32 %v3217_v41, %v3175_v10  ;;  %v3177_v19 = vmul.f32 %v6943_v3, %v6943_v3  ;;  %v3221_v2 = vsel %vm502_vm1, %v3178_v4, 0.0  ;;  %v3130_v45 = vadd.f32 %v3129_v61, %v6949_v29  ;;  %7996 = vst [vmem:[#allocation53_spill] sm:$0xff] %v6986_v1  ;;  %v7014_v58 = vld [vmem:[#allocation2 + $0xc8] sm:$0xff]  ;;  %v7017_v41 = vld [vmem:[#allocation2 + $0xd8] sm:$0xff]  ;;  %v7025_v61 = vld [vmem:[#allocation2 + $0xd0] sm:$0xff] }
 0x3cb   : > { %3111 = vadd.xlane.f32.xlu0 %v3110_v6  ;;  %v3179_v0 = vmul.f32 %v6949_v29, %v6949_v29  ;;  %v3225_v18 = vsel %vm502_vm1, %v3180_v57, 0.0  ;;  %v3133_v33 = vsel %vm502_vm1, %v6962_v13, 0.0  ;;  %v3182_v15 = vmul.f32 %v6962_v13, %v6962_v13  ;;  %v6989_v6 = vld [vmem:[#allocation2 + $0xb8] sm:$0xff]  ;;  %7999 = vst [vmem:[#allocation56_spill] sm:$0xff] %v7014_v58  ;;  %8000 = vst [vmem:[#allocation57_spill] sm:$0xff] %v7017_v41 }
 0x3cc   : > { %v3222_v26 = vadd.f32 %v3221_v2, %v3177_v19  ;;  %v3137_v60 = vsel %vm502_vm1, %v6965_v20, 0.0  ;;  %v3184_v5 = vmul.f32 %v6965_v20, %v6965_v20  ;;  %v3134_v25 = vadd.f32 %v3133_v33, %v6967_v27  ;;  %7997 = vst [vmem:[#allocation54_spill] sm:$0xff] %v6989_v6  ;;  %8002 = vst [vmem:[#allocation59_spill] sm:$0xff] %v7025_v61 }
 0x3cd   : > { %3115 = vadd.xlane.f32.xlu1 %v3114_v53  ;;  %v3226_v48 = vadd.f32 %v3225_v18, %v3179_v0  ;;  %v3181_v37 = vmul.f32 %v6967_v27, %v6967_v27  ;;  %v3229_v47 = vsel %vm502_vm1, %v3182_v15, 0.0  ;;  %v3138_v59 = vadd.f32 %v3137_v60, %v6973_v42  ;;  %v7043_v60 = vld [vmem:[#allocation2 + $0xe0] sm:$0xff] }
 0x3ce   : > { %v3183_v39 = vmul.f32 %v6973_v42, %v6973_v42  ;;  %v3233_v40 = vsel %vm502_vm1, %v3184_v5, 0.0  ;;  %v3141_v22 = vsel %vm502_vm1, %v6986_v1, 0.0  ;;  %v3186_v53 = vmul.f32 %v6986_v1, %v6986_v1  ;;  %8005 = vst [vmem:[#allocation62_spill] sm:$0xff] %v7043_v60 }
 0x3cf   : > { %3207 = vadd.xlane.f32.xlu0 %v3206_v21  ;;  %v3230_v36 = vadd.f32 %v3229_v47, %v3181_v37  ;;  %v7837_v16 = vmov 0   ;;  %v6998_v21 = vld [vmem:[#allocation2 + $0xb0] sm:$0xff]  ;;  %v3145_v46 = vsel %vm502_vm1, %v6989_v6, 0.0  ;;  %v3188_v32 = vmul.f32 %v6989_v6, %v6989_v6 }
 0x3d0   : > { %v3234_v63 = vadd.f32 %v3233_v40, %v3183_v39  ;;  %5078 = vset.pattern.permute.xlu0 %v7837_v16  ;;  %7998 = vst [vmem:[#allocation55_spill] sm:$0xff] %v6998_v21  ;;  %5079 = vset.pattern.permute.xlu1 %v7837_v16  ;;  %v3185_v55 = vmul.f32 %v6991_v49, %v6991_v49  ;;  %v3237_v14 = vsel %vm502_vm1, %v3186_v53, 0.0  ;;  %v3149_v38 = vsel %vm502_vm1, %v7014_v58, 0.0  ;;  %v7049_v47 = vld [vmem:[#allocation2 + $0xf0] sm:$0xff] }
 0x3d1   : > { %3211 = vadd.xlane.f32.xlu1 %v3210_v51  ;;  %4010 = vmatprep.mubr.bf16.mxu0 %v7837_v16  ;;  %v3142_v51 = vadd.f32 %v3141_v22, %v6991_v49  ;;  %v3187_v35 = vmul.f32 %v6998_v21, %v6998_v21  ;;  %v3190_v4 = vmul.f32 %v7014_v58, %v7014_v58  ;;  %v3153_v57 = vsel %vm502_vm1, %v7017_v41, 0.0 }
 0x3d2   : > { %4100 = vmatprep.mubr.bf16.mxu1 %v7837_v16  ;;  %v3238_v10 = vadd.f32 %v3237_v14, %v3185_v55  ;;  %v3154_v0 = vadd.f32 %v3153_v57, %v7025_v61  ;;  %v3191_v18 = vmul.f32 %v7025_v61, %v7025_v61  ;;  %8006 = vst [vmem:[#allocation63_spill] sm:$0xff] %v7049_v47  ;;  %vm3800_vm6 = vcmask 1047680  }
 0x3d3   : > { %3119 = vadd.xlane.f32.xlu0 %v3118_v11  ;;  %v3146_v11 = vadd.f32 %v3145_v46, %v6998_v21  ;;  %vm3802_vm7 = vcmask 687104   ;;  %vm4263_vm8 = vcmask 932864   ;;  %vm4352_vm9 = vcmask 818176  }
 0x3d4   : > { %vm4474_vm10 = vcmask 7168   ;;  %vm4544_vm11 = vcmask 23552   ;;  %vm4218_vm12 = vcmask 113664   ;;  %vm4510_vm13 = vcmask 121856  }
 0x3d5   : > { %3123 = vadd.xlane.f32.xlu1 %v3122_v24  ;;  %v3241_v24 = vsel %vm502_vm1, %v3188_v32, 0.0  ;;  %vm4580_vm14 = vcmask 105472   ;;  %vm4625_vm15 = vcmask 916480  }
 0x3d7   : > { %3215 = vadd.xlane.f32.xlu0 %v3214_v43  ;;  %v7019_v43 = vld [vmem:[#allocation2 + $0xc0] sm:$0xff] }
 0x3d8   : > { %8001 = vst [vmem:[#allocation58_spill] sm:$0xff] %v7019_v43  ;;  %v3150_v19 = vadd.f32 %v3149_v38, %v7019_v43  ;;  %v3189_v2 = vmul.f32 %v7019_v43, %v7019_v43 }
 0x3d9   : > { %3219 = vadd.xlane.f32.xlu1 %v3218_v28  ;;  %v3242_v28 = vadd.f32 %v3241_v24, %v3187_v35 }
 0x3db   : > { %3127 = vadd.xlane.f32.xlu0 %v3126_v34  ;;  %v3192_v34 = vmul.f32 %v7017_v41, %v7017_v41 }
 0x3dd   : > { %3131 = vadd.xlane.f32.xlu1 %v3130_v45  ;;  %v3245_v45 = vsel %vm502_vm1, %v3190_v4, 0.0  ;;  %v3249_v33 = vsel %vm502_vm1, %v3192_v34, 0.0 }
 0x3de   : > { %v3246_v15 = vadd.f32 %v3245_v45, %v3189_v2  ;;  %v3250_v37 = vadd.f32 %v3249_v33, %v3191_v18 }
 0x3df   : > { %3223 = vadd.xlane.f32.xlu0 %v3222_v26  ;;  %v7038_v26 = vld [vmem:[#allocation2 + $0xe8] sm:$0xff] }
 0x3e0   : > { %8003 = vst [vmem:[#allocation60_spill] sm:$0xff] %v7038_v26  ;;  %v3157_v5 = vsel %vm502_vm1, %v7038_v26, 0.0 }
 0x3e1   : > { %3227 = vadd.xlane.f32.xlu1 %v3226_v48  ;;  %v7041_v48 = vld [vmem:[#allocation2 + $0xf8] sm:$0xff]  ;;  %v3158_v40 = vadd.f32 %v3157_v5, %v7043_v60 }
 0x3e2   : > { %8004 = vst [vmem:[#allocation61_spill] sm:$0xff] %v7041_v48  ;;  %v3196_v39 = vmul.f32 %v7041_v48, %v7041_v48 }
 0x3e3   : > { %3135 = vadd.xlane.f32.xlu0 %v3134_v25  ;;  %v3194_v25 = vmul.f32 %v7038_v26, %v7038_v26 }
 0x3e4   : > { %v3257_v46 = vsel %vm502_vm1, %v3196_v39, 0.0 }
 0x3e5   : > { %3139 = vadd.xlane.f32.xlu1 %v3138_v59  ;;  %v3161_v59 = vsel %vm502_vm1, %v7041_v48, 0.0  ;;  %v3253_v22 = vsel %vm502_vm1, %v3194_v25, 0.0 }
 0x3e6   : > { %v3162_v53 = vadd.f32 %v3161_v59, %v7049_v47 }
 0x3e7   : > { %3231 = vadd.xlane.f32.xlu0 %v3230_v36  ;;  %v3193_v36 = vmul.f32 %v7043_v60, %v7043_v60 }
 0x3e9   : > { %3235 = vadd.xlane.f32.xlu1 %v3234_v63  ;;  %v3195_v63 = vmul.f32 %v7049_v47, %v7049_v47  ;;  %v3254_v32 = vadd.f32 %v3253_v22, %v3193_v36 }
 0x3eb   : > { %3143 = vadd.xlane.f32.xlu0 %v3142_v51  ;;  %v3258_v51 = vadd.f32 %v3257_v46, %v3195_v63 }
 0x3ed   : > { %3147 = vadd.xlane.f32.xlu1 %v3146_v11 }
 0x3ef   : > { %3239 = vadd.xlane.f32.xlu0 %v3238_v10 }
 0x3f1   : > { %3243 = vadd.xlane.f32.xlu1 %v3242_v28 }
 0x3f3   : > { %3151 = vadd.xlane.f32.xlu0 %v3150_v19 }
 0x3f5   : > { %3155 = vadd.xlane.f32.xlu1 %v3154_v0 }
 0x3f7   : > { %3247 = vadd.xlane.f32.xlu0 %v3246_v15 }
 0x3f9   : > { %3251 = vadd.xlane.f32.xlu1 %v3250_v37 }
 0x3fb   : > { %3159 = vadd.xlane.f32.xlu0 %v3158_v40 }
 0x3fd   : > { %3163 = vadd.xlane.f32.xlu1 %v3162_v53 }
 0x3ff   : > { %3255 = vadd.xlane.f32.xlu0 %v3254_v32  ;;  %v3325_v32 = vld [vmem:[%s7783_s4] sm:$0xff] }
 0x401   : > { %3259 = vadd.xlane.f32.xlu1 %v3258_v51 }
 0x450   : > { %v3104_v55 = vpop.xlane.xlu0 %3103 }
 0x451   : > { %v7063_v14 = vmul.f32 0.0051020407, %v3104_v55 }
 0x452   : > { %v3200_v11 = vpop.xlane.xlu1 %3199 }
 0x453   : > { %v3293_v35 = vmul.f32 %v7063_v14, %v7063_v14  ;;  %v3277_v24 = vmul.f32 0.0051020407, %v3200_v11 }
 0x454   : > { %v3108_v10 = vpop.xlane.xlu0 %3107 }
 0x455   : > { %v3309_v38 = vsub.f32 %v3277_v24, %v3293_v35  ;;  %v7067_v4 = vmul.f32 0.0051020407, %v3108_v10 }
 0x456   : > { %v3204_v28 = vpop.xlane.xlu1 %3203 }
 0x457   : > { %v3341_v57 = vadd.f32 1e-05, %v3309_v38  ;;  %v3294_v34 = vmul.f32 %v7067_v4, %v7067_v4  ;;  %v3278_v19 = vmul.f32 0.0051020407, %v3204_v28 }
 0x458   : > { %v3112_v2 = vpop.xlane.xlu0 %3111 }
 0x459   : > { %5098 = vrsqrt.f32 %v3341_v57  ;;  %v3310_v45 = vsub.f32 %v3278_v19, %v3294_v34  ;;  %v7071_v0 = vmul.f32 0.0051020407, %v3112_v2  ;;  %v3326_v34 = vld [vmem:[%s7783_s4 + $0x8] sm:$0xff] }
 0x45a   : > { %v3116_v18 = vpop.xlane.xlu1 %3115 }
 0x45b   : > { %v3342_v33 = vadd.f32 1e-05, %v3310_v45  ;;  %v7073_v15 = vmul.f32 0.0051020407, %v3116_v18  ;;  %v3295_v25 = vmul.f32 %v7071_v0, %v7071_v0 }
 0x45c   : > { %v3208_v5 = vpop.xlane.xlu0 %3207 }
 0x45d   : > { %5100 = vrsqrt.f32 %v3342_v33  ;;  %v3296_v37 = vmul.f32 %v7073_v15, %v7073_v15  ;;  %v3279_v59 = vmul.f32 0.0051020407, %v3208_v5 }
 0x45e   : > { %v3212_v39 = vpop.xlane.xlu1 %3211 }
 0x45f   : > { %v3311_v40 = vsub.f32 %v3279_v59, %v3295_v25  ;;  %v3280_v36 = vmul.f32 0.0051020407, %v3212_v39 }
 0x460   : > { %v3120_v22 = vpop.xlane.xlu0 %3119 }
 0x461   : > { %v3343_v53 = vadd.f32 1e-05, %v3311_v40  ;;  %v3312_v63 = vsub.f32 %v3280_v36, %v3296_v37  ;;  %v7079_v46 = vmul.f32 0.0051020407, %v3120_v22  ;;  %v3327_v22 = vld [vmem:[%s7783_s4 + $0x10] sm:$0xff] }
 0x462   : > { %v3124_v51 = vpop.xlane.xlu1 %3123 }
 0x463   : > { %v5099_v55 = vpop.eup %5098  ;;  %5102 = vrsqrt.f32 %v3343_v53  ;;  %v3344_v11 = vadd.f32 1e-05, %v3312_v63  ;;  %v7084_v35 = vmul.f32 0.0051020407, %v3124_v51  ;;  %v3297_v38 = vmul.f32 %v7079_v46, %v7079_v46 }
 0x464   : > { %v3216_v24 = vpop.xlane.xlu0 %3215  ;;  %v7086_v10 = vmul.f32 %v5099_v55, %v3325_v32 }
 0x465   : > { %5104 = vrsqrt.f32 %v3344_v11  ;;  %v3298_v28 = vmul.f32 %v7084_v35, %v7084_v35  ;;  %v3281_v57 = vmul.f32 0.0051020407, %v3216_v24 }
 0x466   : > { %v3220_v19 = vpop.xlane.xlu1 %3219  ;;  %3439 = vperm.xlu0 %5078, %v7086_v10  }
 0x467   : > { %v5101_v2 = vpop.eup %5100  ;;  %v3313_v45 = vsub.f32 %v3281_v57, %v3297_v38  ;;  %v3282_v18 = vmul.f32 0.0051020407, %v3220_v19 }
 0x468   : > { %v3128_v33 = vpop.xlane.xlu0 %3127  ;;  %v7096_v5 = vmul.f32 %v5101_v2, %v3326_v34  ;;  %v3328_v34 = vld [vmem:[%s7783_s4 + $0x18] sm:$0xff] }
 0x469   : > { %v3345_v25 = vadd.f32 1e-05, %v3313_v45  ;;  %v3314_v37 = vsub.f32 %v3282_v18, %v3298_v28  ;;  %v7098_v59 = vmul.f32 0.0051020407, %v3128_v33 }
 0x46a   : > { %v3132_v39 = vpop.xlane.xlu1 %3131  ;;  %3444 = vperm.xlu1 %5079, %v7096_v5  }
 0x46b   : > { %5106 = vrsqrt.f32 %v3345_v25  ;;  %v3346_v40 = vadd.f32 1e-05, %v3314_v37  ;;  %v7101_v36 = vmul.f32 0.0051020407, %v3132_v39  ;;  %v3299_v32 = vmul.f32 %v7098_v59, %v7098_v59 }
 0x46c   : > { %v3224_v53 = vpop.xlane.xlu0 %3223 }
 0x46d   : > { %v5103_v63 = vpop.eup %5102  ;;  %5108 = vrsqrt.f32 %v3346_v40  ;;  %v3300_v51 = vmul.f32 %v7101_v36, %v7101_v36  ;;  %v3283_v55 = vmul.f32 0.0051020407, %v3224_v53  ;;  %v3329_v40 = vld [vmem:[%s7783_s4 + $0x20] sm:$0xff] }
 0x46e   : > { %v3228_v11 = vpop.xlane.xlu1 %3227  ;;  %v7110_v24 = vmul.f32 %v5103_v63, %v3327_v22 }
 0x46f   : > { %v5105_v38 = vpop.eup %5104  ;;  %v3315_v28 = vsub.f32 %v3283_v55, %v3299_v32  ;;  %v3284_v57 = vmul.f32 0.0051020407, %v3228_v11  ;;  %v3330_v55 = vld [vmem:[%s7783_s4 + $0x28] sm:$0xff] }
 0x470   : > { %3449 = vperm.xlu1 %5079, %v7110_v24   ;;  %v3136_v19 = vpop.xlane.xlu0 %3135  ;;  %v7118_v25 = vmul.f32 %v5105_v38, %v3328_v34 }
 0x471   : > { %v3347_v2 = vadd.f32 1e-05, %v3315_v28  ;;  %v3316_v45 = vsub.f32 %v3284_v57, %v3300_v51  ;;  %v7116_v18 = vmul.f32 0.0051020407, %v3136_v19 }
 0x472   : > { %v3140_v33 = vpop.xlane.xlu1 %3139 }
 0x473   : > { %5110 = vrsqrt.f32 %v3347_v2  ;;  %v3348_v37 = vadd.f32 1e-05, %v3316_v45  ;;  %v7120_v39 = vmul.f32 0.0051020407, %v3140_v33  ;;  %v3301_v63 = vmul.f32 %v7116_v18, %v7116_v18 }
 0x474   : > { %3454 = vperm.xlu1 %5079, %v7118_v25   ;;  %v3232_v22 = vpop.xlane.xlu0 %3231 }
 0x475   : > { %v5107_v53 = vpop.eup %5106  ;;  %5112 = vrsqrt.f32 %v3348_v37  ;;  %v3302_v32 = vmul.f32 %v7120_v39, %v7120_v39  ;;  %v3285_v51 = vmul.f32 0.0051020407, %v3232_v22 }
 0x476   : > { %v3236_v11 = vpop.xlane.xlu1 %3235  ;;  %v7133_v38 = vmul.f32 %v5107_v53, %v3329_v40  ;;  %v3331_v40 = vld [vmem:[%s7783_s4 + $0x30] sm:$0xff] }
 0x477   : > { %v5109_v28 = vpop.eup %5108  ;;  %v3317_v57 = vsub.f32 %v3285_v51, %v3301_v63  ;;  %v3286_v34 = vmul.f32 0.0051020407, %v3236_v11  ;;  %v3332_v11 = vld [vmem:[%s7783_s4 + $0x38] sm:$0xff] }
 0x478   : > { %3459 = vperm.xlu1 %5079, %v7133_v38   ;;  %v3144_v19 = vpop.xlane.xlu0 %3143  ;;  %v7136_v2 = vmul.f32 %v5109_v28, %v3330_v55 }
 0x479   : > { %v3349_v45 = vadd.f32 1e-05, %v3317_v57  ;;  %v3318_v33 = vsub.f32 %v3286_v34, %v3302_v32  ;;  %v7138_v37 = vmul.f32 0.0051020407, %v3144_v19 }
 0x47a   : > { %v3148_v22 = vpop.xlane.xlu1 %3147  ;;  %3464 = vperm.xlu0 %5078, %v7136_v2  }
 0x47b   : > { %5114 = vrsqrt.f32 %v3349_v45  ;;  %v3350_v16 = vadd.f32 1e-05, %v3318_v33  ;;  %v7141_v26 = vmul.f32 0.0051020407, %v3148_v22  ;;  %v3303_v51 = vmul.f32 %v7138_v37, %v7138_v37 }
 0x47c   : > { %v3240_v53 = vpop.xlane.xlu0 %3239 }
 0x47d   : > { %v5111_v63 = vpop.eup %5110  ;;  %5116 = vrsqrt.f32 %v3350_v16  ;;  %v3304_v32 = vmul.f32 %v7141_v26, %v7141_v26  ;;  %v3287_v55 = vmul.f32 0.0051020407, %v3240_v53 }
 0x47e   : > { %v3244_v28 = vpop.xlane.xlu1 %3243  ;;  %v7153_v57 = vmul.f32 %v5111_v63, %v3331_v40  ;;  %v3333_v40 = vld [vmem:[%s7783_s4 + $0x40] sm:$0xff] }
 0x47f   : > { %v5113_v34 = vpop.eup %5112  ;;  %v3319_v19 = vsub.f32 %v3287_v55, %v3303_v51  ;;  %v3288_v45 = vmul.f32 0.0051020407, %v3244_v28 }
 0x480   : > { %3469 = vperm.xlu1 %5079, %v7153_v57   ;;  %v3152_v16 = vpop.xlane.xlu0 %3151  ;;  %v7156_v33 = vmul.f32 %v5113_v34, %v3332_v11 }
 0x481   : > { %v3351_v22 = vadd.f32 1e-05, %v3319_v19  ;;  %v3320_v60 = vsub.f32 %v3288_v45, %v3304_v32  ;;  %v7158_v48 = vmul.f32 0.0051020407, %v3152_v16 }
 0x482   : > { %v3156_v53 = vpop.xlane.xlu1 %3155  ;;  %3474 = vperm.xlu0 %5078, %v7156_v33  }
 0x483   : > { %5118 = vrsqrt.f32 %v3351_v22  ;;  %v3352_v47 = vadd.f32 1e-05, %v3320_v60  ;;  %v7161_v58 = vmul.f32 0.0051020407, %v3156_v53  ;;  %v3305_v55 = vmul.f32 %v7158_v48, %v7158_v48  ;;  %v3334_v60 = vld [vmem:[%s7783_s4 + $0x48] sm:$0xff] }
 0x484   : > { %v3248_v63 = vpop.xlane.xlu0 %3247 }
 0x485   : > { %v5115_v51 = vpop.eup %5114  ;;  %5120 = vrsqrt.f32 %v3352_v47  ;;  %v3306_v32 = vmul.f32 %v7161_v58, %v7161_v58  ;;  %v3289_v11 = vmul.f32 0.0051020407, %v3248_v63 }
 0x486   : > { %v3252_v28 = vpop.xlane.xlu1 %3251  ;;  %v7173_v34 = vmul.f32 %v5115_v51, %v3333_v40  ;;  %v3335_v40 = vld [vmem:[%s7783_s4 + $0x50] sm:$0xff] }
 0x487   : > { %v5117_v19 = vpop.eup %5116  ;;  %v3321_v45 = vsub.f32 %v3289_v11, %v3305_v55  ;;  %v3290_v16 = vmul.f32 0.0051020407, %v3252_v28 }
 0x488   : > { %3479 = vperm.xlu1 %5079, %v7173_v34   ;;  %v3160_v47 = vpop.xlane.xlu0 %3159  ;;  %v7176_v22 = vmul.f32 %v5117_v19, %v3334_v60 }
 0x489   : > { %v3353_v53 = vadd.f32 1e-05, %v3321_v45  ;;  %v3322_v43 = vsub.f32 %v3290_v16, %v3306_v32  ;;  %v7178_v41 = vmul.f32 0.0051020407, %v3160_v47 }
 0x48a   : > { %v3164_v63 = vpop.xlane.xlu1 %3163  ;;  %3484 = vperm.xlu0 %5078, %v7176_v22  }
 0x48b   : > { %5122 = vrsqrt.f32 %v3353_v53  ;;  %v3354_v61 = vadd.f32 1e-05, %v3322_v43  ;;  %v7181_v6 = vmul.f32 0.0051020407, %v3164_v63  ;;  %v3307_v11 = vmul.f32 %v7178_v41, %v7178_v41  ;;  %v3336_v43 = vld [vmem:[%s7783_s4 + $0x58] sm:$0xff] }
 0x48c   : > { %v3256_v51 = vpop.xlane.xlu0 %3255 }
 0x48d   : > { %v5119_v55 = vpop.eup %5118  ;;  %5124 = vrsqrt.f32 %v3354_v61  ;;  %v3308_v32 = vmul.f32 %v7181_v6, %v7181_v6  ;;  %v3291_v60 = vmul.f32 0.0051020407, %v3256_v51  ;;  %v3337_v51 = vld [vmem:[%s7783_s4 + $0x60] sm:$0xff] }
 0x48e   : > { %v3260_v28 = vpop.xlane.xlu1 %3259  ;;  %v7193_v19 = vmul.f32 %v5119_v55, %v3335_v40  ;;  %v3338_v40 = vld [vmem:[%s7783_s4 + $0x68] sm:$0xff] }
 0x48f   : > { %v5121_v45 = vpop.eup %5120  ;;  %v3323_v16 = vsub.f32 %v3291_v60, %v3307_v11  ;;  %v3292_v47 = vmul.f32 0.0051020407, %v3260_v28 }
 0x490   : > { %3489 = vperm.xlu1 %5079, %v7193_v19   ;;  %v3384_v61 = vmul.f32 %v5121_v45, %v3336_v43 }
 0x491   : > { %v3355_v53 = vadd.f32 1e-05, %v3323_v16  ;;  %v3324_v63 = vsub.f32 %v3292_v47, %v3308_v32  ;;  %v3339_v32 = vld [vmem:[%s7783_s4 + $0x70] sm:$0xff]  ;;  %v3389_v16 = vld [vmem:[%s7784_s5] sm:$0xff] }
 0x492   : > { %3494 = vperm.xlu0 %5078, %v3384_v61  }
 0x493   : > { %5126 = vrsqrt.f32 %v3355_v53  ;;  %v3356_v21 = vadd.f32 1e-05, %v3324_v63  ;;  %v3410_v53 = vmul.f32 %v7136_v2, %v7084_v35  ;;  %v3394_v63 = vld [vmem:[%s7784_s5 + $0x28] sm:$0xff]  ;;  %v3396_v35 = vld [vmem:[%s7784_s5 + $0x38] sm:$0xff] }
 0x495   : > { %v5123_v1 = vpop.eup %5122  ;;  %5128 = vrsqrt.f32 %v3356_v21  ;;  %v3340_v21 = vld [vmem:[%s7783_s4 + $0x78] sm:$0xff] }
 0x496   : > { %v7202_v55 = vmul.f32 %v5123_v1, %v3337_v51  ;;  %v3405_v1 = vmul.f32 %v7086_v10, %v7063_v14  ;;  %v3406_v14 = vmul.f32 %v7096_v5, %v7067_v4  ;;  %v3390_v10 = vld [vmem:[%s7784_s5 + $0x8] sm:$0xff]  ;;  %v3391_v4 = vld [vmem:[%s7784_s5 + $0x10] sm:$0xff] }
 0x497   : > { %v5125_v11 = vpop.eup %5124 }
 0x498   : > { %3499 = vperm.xlu1 %5079, %v7202_v55   ;;  %v3386_v60 = vmul.f32 %v5125_v11, %v3338_v40  ;;  %v3421_v51 = vsub.f32 %v3389_v16, %v3405_v1  ;;  %v3426_v40 = vsub.f32 %v3394_v63, %v3410_v53  ;;  %v3412_v11 = vmul.f32 %v7156_v33, %v7101_v36  ;;  %v3398_v36 = vld [vmem:[%s7784_s5 + $0x48] sm:$0xff] }
 0x499   : > { %v3422_v2 = vsub.f32 %v3390_v10, %v3406_v14  ;;  %v3416_v1 = vmul.f32 %v3384_v61, %v7141_v26  ;;  %v3402_v26 = vld [vmem:[%s7784_s5 + $0x68] sm:$0xff]  ;;  %v3411_v53 = vmul.f32 %v7153_v57, %v7098_v59  ;;  %v3397_v59 = vld [vmem:[%s7784_s5 + $0x40] sm:$0xff] }
 0x49a   : > { %3504 = vperm.xlu0 %5078, %v3386_v60   ;;  %v3428_v5 = vsub.f32 %v3396_v35, %v3412_v11  ;;  %v3418_v16 = vmul.f32 %v3386_v60, %v7161_v58  ;;  %v3404_v58 = vld [vmem:[%s7784_s5 + $0x78] sm:$0xff]  ;;  %v8007_v35 = vmov 0  }
 0x49b   : > { %3710 = vst.msk [vmem:[#allocation3] sm:$0xff] %vm3709_vm4, %v8007_v35  ;;  %3711 = vst.msk [vmem:[#allocation3 + $0x10] sm:$0xff] %vm3709_vm4, %v8007_v35 }
 0x49c   : > { %3712 = vst.msk [vmem:[#allocation3 + $0x20] sm:$0xff] %vm3709_vm4, %v8007_v35  ;;  %3713 = vst.msk [vmem:[#allocation3 + $0x30] sm:$0xff] %vm3709_vm4, %v8007_v35 }
 0x49d   : > { %v5127_v43 = vpop.eup %5126  ;;  %3714 = vst.msk [vmem:[#allocation3 + $0x40] sm:$0xff] %vm3709_vm4, %v8007_v35  ;;  %3715 = vst.msk [vmem:[#allocation3 + $0x50] sm:$0xff] %vm3709_vm4, %v8007_v35 }
 0x49e   : > { %v7211_v28 = vmul.f32 %v5127_v43, %v3339_v32  ;;  %v3407_v32 = vmul.f32 %v7110_v24, %v7071_v0  ;;  %v3414_v43 = vmul.f32 %v7176_v22, %v7120_v39  ;;  %v3392_v0 = vld [vmem:[%s7784_s5 + $0x18] sm:$0xff]  ;;  %3716 = vst.msk [vmem:[#allocation3 + $0x60] sm:$0xff] %vm3709_vm4, %v8007_v35  ;;  %3717 = vst.msk [vmem:[#allocation3 + $0x70] sm:$0xff] %vm3709_vm4, %v8007_v35 }
 0x49f   : > { %v5129_v45 = vpop.eup %5128  ;;  %v3400_v39 = vld [vmem:[%s7784_s5 + $0x58] sm:$0xff]  ;;  %3719 = vst.msk [vmem:[#allocation3 + $0x8] sm:$0xff] %vm3718_vm5, %v8007_v35  ;;  %3720 = vst.msk [vmem:[#allocation3 + $0x18] sm:$0xff] %vm3718_vm5, %v8007_v35 }
 0x4a0   : > { %3509 = vperm.xlu1 %5079, %v7211_v28   ;;  %v3388_v47 = vmul.f32 %v5129_v45, %v3340_v21  ;;  %v3423_v33 = vsub.f32 %v3391_v4, %v3407_v32  ;;  %v3408_v21 = vmul.f32 %v7118_v25, %v7073_v15  ;;  %v3430_v24 = vsub.f32 %v3398_v36, %v3414_v43  ;;  %v3393_v15 = vld [vmem:[%s7784_s5 + $0x20] sm:$0xff] }
 0x4a1   : > { %v3409_v45 = vmul.f32 %v7133_v38, %v7079_v46  ;;  %v3432_v25 = vsub.f32 %v3400_v39, %v3416_v1  ;;  %v3395_v46 = vld [vmem:[%s7784_s5 + $0x30] sm:$0xff]  ;;  %v3434_v38 = vsub.f32 %v3402_v26, %v3418_v16  ;;  %v3419_v11 = vmul.f32 %v7211_v28, %v7178_v41  ;;  %3721 = vst.msk [vmem:[#allocation3 + $0x28] sm:$0xff] %vm3718_vm5, %v8007_v35 }
 0x4a2   : > { %3514 = vperm.xlu0 %5078, %v3388_v47   ;;  %v3424_v22 = vsub.f32 %v3392_v0, %v3408_v21  ;;  %v3420_v63 = vmul.f32 %v3388_v47, %v7181_v6  ;;  %v3427_v60 = vsub.f32 %v3395_v46, %v3411_v53  ;;  %v3415_v6 = vmul.f32 %v7193_v19, %v7138_v37  ;;  %v3399_v47 = vld [vmem:[%s7784_s5 + $0x50] sm:$0xff] }
 0x4a3   : > { %v3425_v61 = vsub.f32 %v3393_v15, %v3409_v45  ;;  %v3403_v37 = vld [vmem:[%s7784_s5 + $0x70] sm:$0xff]  ;;  %3722 = vst.msk [vmem:[#allocation3 + $0x38] sm:$0xff] %vm3718_vm5, %v8007_v35  ;;  %3723 = vst.msk [vmem:[#allocation3 + $0x48] sm:$0xff] %vm3718_vm5, %v8007_v35 }
 0x4a4   : > { %3551 = vperm.xlu1 %5079, %v3421_v51   ;;  %v3413_v51 = vmul.f32 %v7173_v34, %v7116_v18  ;;  %v3436_v57 = vsub.f32 %v3404_v58, %v3420_v63  ;;  %v3431_v10 = vsub.f32 %v3399_v47, %v3415_v6  ;;  %v3417_v18 = vmul.f32 %v7202_v55, %v7158_v48  ;;  %v3401_v34 = vld [vmem:[%s7784_s5 + $0x60] sm:$0xff] }
 0x4a5   : > { %v3435_v19 = vsub.f32 %v3403_v37, %v3419_v11  ;;  %3724 = vst.msk [vmem:[#allocation3 + $0x58] sm:$0xff] %vm3718_vm5, %v8007_v35  ;;  %3725 = vst.msk [vmem:[#allocation3 + $0x68] sm:$0xff] %vm3718_vm5, %v8007_v35 }
 0x4a6   : > { %3576 = vperm.xlu0 %5078, %v3426_v40   ;;  %v3429_v14 = vsub.f32 %v3397_v59, %v3413_v51  ;;  %v3433_v40 = vsub.f32 %v3401_v34, %v3417_v18  ;;  %3726 = vst.msk [vmem:[#allocation3 + $0x78] sm:$0xff] %vm3718_vm5, %v8007_v35 }
 0x4a8   : > { %3556 = vperm.xlu1 %5079, %v3422_v2  }
 0x4aa   : > { %3586 = vperm.xlu0 %5078, %v3428_v5  }
 0x4ac   : > { %3561 = vperm.xlu1 %5079, %v3423_v33  }
 0x4ae   : > { %3596 = vperm.xlu0 %5078, %v3430_v24  }
 0x4b0   : > { %3566 = vperm.xlu1 %5079, %v3424_v22  }
 0x4b2   : > { %3606 = vperm.xlu0 %5078, %v3432_v25  }
 0x4b4   : > { %3571 = vperm.xlu1 %5079, %v3425_v61  }
 0x4b6   : > { %3616 = vperm.xlu0 %5078, %v3434_v38  }
 0x4b8   : > { %3581 = vperm.xlu1 %5079, %v3427_v60  }
 0x4ba   : > { %3626 = vperm.xlu0 %5078, %v3436_v57  }
 0x4bc   : > { %3591 = vperm.xlu1 %5079, %v3429_v14  }
 0x4c0   : > { %3601 = vperm.xlu1 %5079, %v3431_v10  }
 0x4c4   : > { %3611 = vperm.xlu1 %5079, %v3433_v40  }
 0x4c8   : > { %3621 = vperm.xlu1 %5079, %v3435_v19  }
 0x4e5   : > { %v3440_v55 = vpop.permute.xlu0 %3439 }
 0x4e6   : > { %v3517_v45 = vmul.f32 %v3440_v55, %v6867_v23  ;;  %v3518_v15 = vmul.f32 %v3440_v55, %v6869_v9 }
 0x4e9   : > { %v3445_v41 = vpop.permute.xlu1 %3444 }
 0x4ea   : > { %v3519_v16 = vmul.f32 %v3445_v41, %v6871_v62  ;;  %v3520_v26 = vmul.f32 %v3445_v41, %v6879_v52 }
 0x4ef   : > { %v3450_v48 = vpop.permute.xlu1 %3449 }
 0x4f0   : > { %v3521_v23 = vmul.f32 %v3450_v48, %v6895_v50  ;;  %v3522_v9 = vmul.f32 %v3450_v48, %v6888_v30 }
 0x4f3   : > { %v3455_v28 = vpop.permute.xlu1 %3454 }
 0x4f4   : > { %v3523_v62 = vmul.f32 %v3455_v28, %v6901_v54  ;;  %v3524_v52 = vmul.f32 %v3455_v28, %v6893_v7 }
 0x4f7   : > { %v3460_v32 = vpop.permute.xlu1 %3459 }
 0x4f8   : > { %v3525_v19 = vmul.f32 %v3460_v32, %v6919_v56  ;;  %v3526_v54 = vmul.f32 %v3460_v32, %v6914_v8 }
 0x4f9   : > { %v3465_v2 = vpop.permute.xlu0 %3464 }
 0x4fa   : > { %v3527_v50 = vmul.f32 %v3465_v2, %v6927_v17  ;;  %v3528_v30 = vmul.f32 %v3465_v2, %v6917_v44 }
 0x4ff   : > { %v3470_v5 = vpop.permute.xlu1 %3469 }
 0x501   : > { %v7307_v4 = vpop.permute.xlu0 %3474 }
 0x502   : > { %v3531_v44 = vmul.f32 %v7307_v4, %v6949_v29  ;;  %v3532_v56 = vmul.f32 %v7307_v4, %v6941_v12 }
 0x507   : > { %v7311_v36 = vpop.permute.xlu1 %3479 }
 0x509   : > { %v7309_v43 = vpop.permute.xlu0 %3484 }
 0x50a   : > { %v3535_v32 = vmul.f32 %v7309_v43, %v6973_v42 }
 0x50f   : > { %v7313_v33 = vpop.permute.xlu1 %3489 }
 0x511   : > { %v7315_v21 = vpop.permute.xlu0 %3494 }
 0x517   : > { %v7317_v0 = vpop.permute.xlu1 %3499 }
 0x519   : > { %v7319_v24 = vpop.permute.xlu0 %3504 }
 0x51f   : > { %v7321_v1 = vpop.permute.xlu1 %3509 }
 0x521   : > { %v7323_v39 = vpop.permute.xlu0 %3514 }
 0x523   : > { %v3552_v22 = vpop.permute.xlu1 %3551 }
 0x524   : > { %v3629_v61 = vadd.f32 %v3552_v22, %v3517_v45  ;;  %v3630_v53 = vadd.f32 %v3552_v22, %v3518_v15  ;;  %v3529_v15 = vmul.f32 %v3470_v5, %v6943_v3 }
 0x525   : > { %v3577_v25 = vpop.permute.xlu0 %3576 }
 0x526   : > { %v3661_v51 = vmax.f32 %v3629_v61, 0.0  ;;  %v3662_v59 = vmax.f32 %v3630_v53, 0.0  ;;  %v3639_v48 = vadd.f32 %v3577_v25, %v3527_v50  ;;  %v3640_v55 = vadd.f32 %v3577_v25, %v3528_v30 }
 0x527   : > { %v3557_v46 = vpop.permute.xlu1 %3556  ;;  %v3536_v25 = vmul.f32 %v7309_v43, %v6965_v20  ;;  %v3533_v20 = vmul.f32 %v7311_v36, %v6967_v27  ;;  %v3534_v43 = vmul.f32 %v7311_v36, %v6962_v13 }
 0x528   : > { %v3631_v38 = vadd.f32 %v3557_v46, %v3519_v16  ;;  %v3632_v63 = vadd.f32 %v3557_v46, %v3520_v26  ;;  %v3530_v16 = vmul.f32 %v3470_v5, %v6935_v31  ;;  %v3671_v53 = vmax.f32 %v3639_v48, 0.0 }
 0x529   : > { %v3587_v57 = vpop.permute.xlu0 %3586  ;;  %v3672_v31 = vmax.f32 %v3640_v55, 0.0 }
 0x52a   : > { %v3663_v58 = vmax.f32 %v3631_v38, 0.0  ;;  %v3664_v60 = vmax.f32 %v3632_v63, 0.0  ;;  %v3643_v5 = vadd.f32 %v3587_v57, %v3531_v44  ;;  %v3644_v46 = vadd.f32 %v3587_v57, %v3532_v56 }
 0x52b   : > { %v3562_v14 = vpop.permute.xlu1 %3561  ;;  %v3537_v57 = vmul.f32 %v7313_v33, %v6991_v49 }
 0x52c   : > { %v3694_v6 = vpack.c.bf16 %v3664_v60, %v3662_v59  ;;  %v3693_v47 = vpack.c.bf16 %v3663_v58, %v3661_v51  ;;  %v3633_v10 = vadd.f32 %v3562_v14, %v3521_v23  ;;  %v3634_v18 = vadd.f32 %v3562_v14, %v3522_v9  ;;  %v8008_v14 = vld [vmem:[#allocation53_spill] sm:$0xff] }
 0x52d   : > { %v3597_v37 = vpop.permute.xlu0 %3596  ;;  %v3538_v23 = vmul.f32 %v7313_v33, %v8008_v14  ;;  %v3675_v9 = vmax.f32 %v3643_v5, 0.0 }
 0x52e   : > { %3745 = vrot.lane.b32.xlu0 %v3694_v6, %s5141_s24  ;;  %3743 = vrot.lane.b32.xlu1 %v3693_v47, %s5141_s24  ;;  %v3665_v28 = vmax.f32 %v3633_v10, 0.0  ;;  %v3666_v22 = vmax.f32 %v3634_v18, 0.0  ;;  %v3647_v63 = vadd.f32 %v3597_v37, %v3535_v32  ;;  %v3648_v58 = vadd.f32 %v3597_v37, %v3536_v25  ;;  %v8015_v32 = vld [vmem:[#allocation63_spill] sm:$0xff] }
 0x52f   : > { %v3567_v34 = vpop.permute.xlu1 %3566  ;;  %v3676_v6 = vmax.f32 %v3644_v46, 0.0  ;;  %v3547_v25 = vmul.f32 %v7323_v39, %v8015_v32 }
 0x530   : > { %v3635_v40 = vadd.f32 %v3567_v34, %v3523_v62  ;;  %v3636_v11 = vadd.f32 %v3567_v34, %v3524_v52  ;;  %v8009_v62 = vld [vmem:[#allocation55_spill] sm:$0xff]  ;;  %v8010_v52 = vld [vmem:[#allocation54_spill] sm:$0xff]  ;;  %v3679_v18 = vmax.f32 %v3647_v63, 0.0  ;;  %v3680_v49 = vmax.f32 %v3648_v58, 0.0 }
 0x531   : > { %v3607_v38 = vpop.permute.xlu0 %3606  ;;  %v3539_v27 = vmul.f32 %v7315_v21, %v8009_v62  ;;  %v3540_v13 = vmul.f32 %v7315_v21, %v8010_v52 }
 0x532   : > { %v3667_v7 = vmax.f32 %v3635_v40, 0.0  ;;  %v3668_v41 = vmax.f32 %v3636_v11, 0.0 }
 0x533   : > { %v3572_v45 = vpop.permute.xlu1 %3571  ;;  %v3651_v11 = vadd.f32 %v3607_v38, %v3539_v27  ;;  %v3652_v50 = vadd.f32 %v3607_v38, %v3540_v13 }
 0x534   : > { %v3637_v26 = vadd.f32 %v3572_v45, %v3525_v19  ;;  %v3638_v17 = vadd.f32 %v3572_v45, %v3526_v54  ;;  %v3696_v8 = vpack.c.bf16 %v3668_v41, %v3666_v22  ;;  %v3695_v2 = vpack.c.bf16 %v3667_v7, %v3665_v28  ;;  %v8011_v19 = vld [vmem:[#allocation59_spill] sm:$0xff]  ;;  %v8012_v7 = vld [vmem:[#allocation57_spill] sm:$0xff]  ;;  %v8013_v45 = vld [vmem:[#allocation58_spill] sm:$0xff] }
 0x535   : > { %v3617_v34 = vpop.permute.xlu0 %3616  ;;  %v3543_v54 = vmul.f32 %v7319_v24, %v8011_v19  ;;  %v3544_v41 = vmul.f32 %v7319_v24, %v8012_v7  ;;  %v3683_v56 = vmax.f32 %v3651_v11, 0.0 }
 0x536   : > { %v3669_v61 = vmax.f32 %v3637_v26, 0.0  ;;  %v3670_v3 = vmax.f32 %v3638_v17, 0.0  ;;  %3749 = vrot.lane.b32.xlu0 %v3696_v8, %s5141_s24  ;;  %3747 = vrot.lane.b32.xlu1 %v3695_v2, %s5141_s24  ;;  %v3684_v8 = vmax.f32 %v3652_v50, 0.0 }
 0x537   : > { %v3582_v12 = vpop.permute.xlu1 %3581  ;;  %v3655_v17 = vadd.f32 %v3617_v34, %v3543_v54  ;;  %v3656_v44 = vadd.f32 %v3617_v34, %v3544_v41 }
 0x538   : > { %v3641_v29 = vadd.f32 %v3582_v12, %v3529_v15  ;;  %v3642_v4 = vadd.f32 %v3582_v12, %v3530_v16  ;;  %v3698_v42 = vpack.c.bf16 %v3672_v31, %v3670_v3  ;;  %v3697_v60 = vpack.c.bf16 %v3671_v53, %v3669_v61  ;;  %v8014_v16 = vld [vmem:[#allocation56_spill] sm:$0xff]  ;;  %v8016_v61 = vld [vmem:[#allocation61_spill] sm:$0xff]  ;;  %v8017_v12 = vld [vmem:[#allocation62_spill] sm:$0xff] }
 0x539   : > { %v3541_v15 = vmul.f32 %v7317_v0, %v8013_v45  ;;  %v3542_v26 = vmul.f32 %v7317_v0, %v8014_v16  ;;  %v3548_v3 = vmul.f32 %v7323_v39, %v8016_v61  ;;  %v3627_v53 = vpop.permute.xlu0 %3626  ;;  %v3687_v58 = vmax.f32 %v3655_v17, 0.0 }
 0x53a   : > { %v3673_v51 = vmax.f32 %v3641_v29, 0.0  ;;  %v3674_v59 = vmax.f32 %v3642_v4, 0.0  ;;  %3753 = vrot.lane.b32.xlu0 %v3698_v42, %s5141_s24  ;;  %3751 = vrot.lane.b32.xlu1 %v3697_v60, %s5141_s24  ;;  %v3545_v29 = vmul.f32 %v7321_v1, %v8017_v12  ;;  %v8018_v4 = vld [vmem:[#allocation60_spill] sm:$0xff]  ;;  %v3688_v42 = vmax.f32 %v3656_v44, 0.0  ;;  %v5082_v12 = vld [vmem:[%s7785_s6 + $0x8] sm:$0xff]  }
 0x53b   : > { %v3592_v47 = vpop.permute.xlu1 %3591  ;;  %v3546_v63 = vmul.f32 %v7321_v1, %v8018_v4  ;;  %v3659_v60 = vadd.f32 %v3627_v53, %v3547_v25  ;;  %v3660_v39 = vadd.f32 %v3627_v53, %v3548_v3  ;;  %v5084_v4 = vld [vmem:[%s7785_s6 + $0x10] sm:$0xff]  }
 0x53c   : > { %v3645_v36 = vadd.f32 %v3592_v47, %v3533_v20  ;;  %v3646_v10 = vadd.f32 %v3592_v47, %v3534_v43  ;;  %v3700_v40 = vpack.c.bf16 %v3676_v6, %v3674_v59  ;;  %v3699_v33 = vpack.c.bf16 %v3675_v9, %v3673_v51 }
 0x53d   : > { %v3691_v9 = vmax.f32 %v3659_v60, 0.0  ;;  %v3692_v6 = vmax.f32 %v3660_v39, 0.0  ;;  %v5088_v60 = vld [vmem:[%s7785_s6 + $0x20] sm:$0xff]   ;;  %v5089_v39 = vld [vmem:[%s7785_s6 + $0x68] sm:$0xff]  }
 0x53e   : > { %v3677_v30 = vmax.f32 %v3645_v36, 0.0  ;;  %v3678_v37 = vmax.f32 %v3646_v10, 0.0  ;;  %3757 = vrot.lane.b32.xlu0 %v3700_v40, %s5141_s24  ;;  %3755 = vrot.lane.b32.xlu1 %v3699_v33, %s5141_s24 }
 0x53f   : > { %v3602_v21 = vpop.permute.xlu1 %3601 }
 0x540   : > { %v3649_v48 = vadd.f32 %v3602_v21, %v3537_v57  ;;  %v3650_v55 = vadd.f32 %v3602_v21, %v3538_v23  ;;  %v3702_v28 = vpack.c.bf16 %v3680_v49, %v3678_v37  ;;  %v3701_v22 = vpack.c.bf16 %v3679_v18, %v3677_v30 }
 0x542   : > { %v3681_v24 = vmax.f32 %v3649_v48, 0.0  ;;  %v3682_v2 = vmax.f32 %v3650_v55, 0.0  ;;  %3761 = vrot.lane.b32.xlu0 %v3702_v28, %s5141_s24  ;;  %3759 = vrot.lane.b32.xlu1 %v3701_v22, %s5141_s24 }
 0x543   : > { %v3612_v31 = vpop.permute.xlu1 %3611 }
 0x544   : > { %v3653_v5 = vadd.f32 %v3612_v31, %v3541_v15  ;;  %v3654_v0 = vadd.f32 %v3612_v31, %v3542_v26  ;;  %v3704_v46 = vpack.c.bf16 %v3684_v8, %v3682_v2  ;;  %v3703_v38 = vpack.c.bf16 %v3683_v56, %v3681_v24 }
 0x546   : > { %v3685_v20 = vmax.f32 %v3653_v5, 0.0  ;;  %v3686_v43 = vmax.f32 %v3654_v0, 0.0  ;;  %3765 = vrot.lane.b32.xlu0 %v3704_v46, %s5141_s24  ;;  %3763 = vrot.lane.b32.xlu1 %v3703_v38, %s5141_s24  ;;  %v5080_v46 = vld [vmem:[%s7785_s6] sm:$0xff]   ;;  %v5081_v38 = vld [vmem:[%s7785_s6 + $0x48] sm:$0xff]  }
 0x547   : > { %v3622_v51 = vpop.permute.xlu1 %3621 }
 0x548   : > { %v3657_v59 = vadd.f32 %v3622_v51, %v3545_v29  ;;  %v3658_v57 = vadd.f32 %v3622_v51, %v3546_v63  ;;  %v3706_v14 = vpack.c.bf16 %v3688_v42, %v3686_v43  ;;  %v3705_v23 = vpack.c.bf16 %v3687_v58, %v3685_v20  ;;  %v5083_v29 = vld [vmem:[%s7785_s6 + $0x50] sm:$0xff]   ;;  %v5085_v63 = vld [vmem:[%s7785_s6 + $0x58] sm:$0xff]   ;;  %v5087_v42 = vld [vmem:[%s7785_s6 + $0x60] sm:$0xff]  }
 0x549   : > { %v5086_v58 = vld [vmem:[%s7785_s6 + $0x18] sm:$0xff]   ;;  %v5090_v20 = vld [vmem:[%s7785_s6 + $0x28] sm:$0xff]   ;;  %v5091_v43 = vld [vmem:[%s7785_s6 + $0x70] sm:$0xff]  }
 0x54a   : > { %v3689_v47 = vmax.f32 %v3657_v59, 0.0  ;;  %v3690_v62 = vmax.f32 %v3658_v57, 0.0  ;;  %3769 = vrot.lane.b32.xlu0 %v3706_v14, %s5141_s24  ;;  %3767 = vrot.lane.b32.xlu1 %v3705_v23, %s5141_s24  ;;  %v5092_v51 = vld [vmem:[%s7785_s6 + $0x30] sm:$0xff]   ;;  %v5093_v59 = vld [vmem:[%s7785_s6 + $0x78] sm:$0xff]  }
 0x54b   : > { %v5094_v57 = vld [vmem:[%s7785_s6 + $0x38] sm:$0xff]   ;;  %v5095_v14 = vld [vmem:[%s7785_s6 + $0x80] sm:$0xff]   ;;  %v5096_v23 = vld [vmem:[%s7785_s6 + $0x88] sm:$0xff]  }
 0x54c   : > { %v3708_v1 = vpack.c.bf16 %v3692_v6, %v3690_v62  ;;  %v3707_v27 = vpack.c.bf16 %v3691_v9, %v3689_v47  ;;  %v5097_v9 = vld [vmem:[%s7785_s6 + $0x40] sm:$0xff]   ;;  %v4462_v6 = vlaneseq }
 0x54e   : > { %3773 = vrot.lane.b32.xlu0 %v3708_v1, %s5141_s24  ;;  %3771 = vrot.lane.b32.xlu1 %v3707_v27, %s5141_s24  ;;  %v4463_v47 = vshrl.u32 %v4462_v6, 7  ;;  %v4191_v1 = vld [vmem:[%s7786_s7] ss:$2 sm:$0x3]  ;;  %s5143_s24 = smov 3  }
 0x550   : > { %v4464_v62 = vsub.s32 0, %v4463_v47  ;;  %v4468_v27 = vsub.s32 1, %v4463_v47 }
 0x5a0   : > { %v3744_v52 = vpop.permute.xlu1 %3743  ;;  %v3746_v13 = vpop.permute.xlu0 %3745 }
 0x5a1   : > { %3801 = vst.msk [vmem:[#allocation3] sm:$0xff] %vm3800_vm6, %v3744_v52  ;;  %v3776_v36 = vsel %vm3709_vm4, %v3744_v52, %v3746_v13  ;;  %v4465_v52 = vrot.slane %v4191_v1, %v4464_v62  ;;  %v4774_v13 = vld [vmem:[%s7786_s7 + $0x1] ss:$2 sm:$0x3] }
 0x5a2   : > { %3803 = vst.msk [vmem:[#allocation3 + $0x8] sm:$0xff] %vm3802_vm7, %v3776_v36  ;;  %v4535_v36 = vrot.slane %v4774_v13, %v4464_v62 }
 0x5a3   : > { %4470 = vrot.lane.b32.xlu1 %v4465_v52, %s5142_s21 }
 0x5a7   : > { %4540 = vrot.lane.b32.xlu1 %v4535_v36, %s5143_s24 }
 0x5a8   : > { %v3748_v10 = vpop.permute.xlu1 %3747  ;;  %v3750_v18 = vpop.permute.xlu0 %3749  ;;  %v3854_v40 = vld [vmem:[#allocation3] sm:$0xff] }
 0x5a9   : > { %3804 = vst.msk [vmem:[#allocation3 + $0x10] sm:$0xff] %vm3800_vm6, %v3748_v10  ;;  %v3777_v49 = vsel %vm3709_vm4, %v3748_v10, %v3750_v18  ;;  %v3855_v34 = vld [vmem:[#allocation3 + $0x8] sm:$0xff]  ;;  %v4539_v10 = vrot.slane %v4774_v13, %v4468_v27 }
 0x5aa   : > { %3805 = vst.msk [vmem:[#allocation3 + $0x18] sm:$0xff] %vm3802_vm7, %v3777_v49  ;;  %3978 = vmatprep.subr.bf16.mxu0 %v3855_v34  ;;  %4810 = vmatprep.subr.bf16.mxu1 %v3855_v34 }
 0x5ab   : > { %3979 = vmatpush1.bf16.msra.mxu0 %v3854_v40  ;;  %4818 = vmatpush1.bf16.msra.mxu1 %v3854_v40 }
 0x5ac   : > { %v3752_v33 = vpop.permute.xlu1 %3751  ;;  %v3754_v11 = vpop.permute.xlu0 %3753 }
 0x5ad   : > { %3806 = vst.msk [vmem:[#allocation3 + $0x20] sm:$0xff] %vm3800_vm6, %v3752_v33  ;;  %v3778_v50 = vsel %vm3709_vm4, %v3752_v33, %v3754_v11 }
 0x5ae   : > { %3807 = vst.msk [vmem:[#allocation3 + $0x28] sm:$0xff] %vm3802_vm7, %v3778_v50 }
 0x5b0   : > { %v3756_v30 = vpop.permute.xlu1 %3755  ;;  %v3758_v37 = vpop.permute.xlu0 %3757  ;;  %v3856_v7 = vld [vmem:[#allocation3 + $0x10] sm:$0xff] }
 0x5b1   : > { %3808 = vst.msk [vmem:[#allocation3 + $0x30] sm:$0xff] %vm3800_vm6, %v3756_v30  ;;  %v3779_v19 = vsel %vm3709_vm4, %v3756_v30, %v3758_v37  ;;  %v3857_v54 = vld [vmem:[#allocation3 + $0x18] sm:$0xff] }
 0x5b2   : > { %3809 = vst.msk [vmem:[#allocation3 + $0x38] sm:$0xff] %vm3802_vm7, %v3779_v19  ;;  %3980 = vmatprep.subr.bf16.mxu0 %v3857_v54  ;;  %4811 = vmatprep.subr.bf16.mxu1 %v3857_v54 }
 0x5b3   : > { %3981 = vmatpush1.bf16.msra.mxu0 %v3856_v7  ;;  %4819 = vmatpush1.bf16.msra.mxu1 %v3856_v7 }
 0x5b4   : > { %v3760_v41 = vpop.permute.xlu1 %3759  ;;  %v3762_v21 = vpop.permute.xlu0 %3761  ;;  %v3858_v28 = vld [vmem:[#allocation3 + $0x20] sm:$0xff] }
 0x5b5   : > { %3810 = vst.msk [vmem:[#allocation3 + $0x40] sm:$0xff] %vm3800_vm6, %v3760_v41  ;;  %v3780_v48 = vsel %vm3709_vm4, %v3760_v41, %v3762_v21  ;;  %v3859_v55 = vld [vmem:[#allocation3 + $0x28] sm:$0xff] }
 0x5b6   : > { %3811 = vst.msk [vmem:[#allocation3 + $0x48] sm:$0xff] %vm3802_vm7, %v3780_v48  ;;  %3982 = vmatprep.subr.bf16.mxu0 %v3859_v55  ;;  %4812 = vmatprep.subr.bf16.mxu1 %v3859_v55 }
 0x5b7   : > { %3983 = vmatpush1.bf16.msra.mxu0 %v3858_v28  ;;  %4820 = vmatpush1.bf16.msra.mxu1 %v3858_v28 }
 0x5b8   : > { %v3764_v22 = vpop.permute.xlu1 %3763  ;;  %v3766_v45 = vpop.permute.xlu0 %3765  ;;  %v3860_v26 = vld [vmem:[#allocation3 + $0x30] sm:$0xff] }
 0x5b9   : > { %3812 = vst.msk [vmem:[#allocation3 + $0x50] sm:$0xff] %vm3800_vm6, %v3764_v22  ;;  %v3781_v15 = vsel %vm3709_vm4, %v3764_v22, %v3766_v45  ;;  %v3861_v16 = vld [vmem:[#allocation3 + $0x38] sm:$0xff] }
 0x5ba   : > { %3813 = vst.msk [vmem:[#allocation3 + $0x58] sm:$0xff] %vm3802_vm7, %v3781_v15  ;;  %3984 = vmatprep.subr.bf16.mxu0 %v3861_v16  ;;  %4813 = vmatprep.subr.bf16.mxu1 %v3861_v16 }
 0x5bb   : > { %3985 = vmatpush1.bf16.msra.mxu0 %v3860_v26  ;;  %4821 = vmatpush1.bf16.msra.mxu1 %v3860_v26 }
 0x5bc   : > { %v3768_v17 = vpop.permute.xlu1 %3767  ;;  %v3770_v44 = vpop.permute.xlu0 %3769  ;;  %v3862_v24 = vld [vmem:[#allocation3 + $0x40] sm:$0xff] }
 0x5bd   : > { %3814 = vst.msk [vmem:[#allocation3 + $0x60] sm:$0xff] %vm3800_vm6, %v3768_v17  ;;  %v3782_v56 = vsel %vm3709_vm4, %v3768_v17, %v3770_v44  ;;  %v3863_v8 = vld [vmem:[#allocation3 + $0x48] sm:$0xff] }
 0x5be   : > { %3815 = vst.msk [vmem:[#allocation3 + $0x68] sm:$0xff] %vm3802_vm7, %v3782_v56  ;;  %3986 = vmatprep.subr.bf16.mxu0 %v3863_v8  ;;  %4814 = vmatprep.subr.bf16.mxu1 %v3863_v8 }
 0x5bf   : > { %3987 = vmatpush1.bf16.msra.mxu0 %v3862_v24  ;;  %4822 = vmatpush1.bf16.msra.mxu1 %v3862_v24 }
 0x5c0   : > { %v3772_v2 = vpop.permute.xlu1 %3771  ;;  %v3774_v32 = vpop.permute.xlu0 %3773  ;;  %v3864_v3 = vld [vmem:[#allocation3 + $0x50] sm:$0xff] }
 0x5c1   : > { %3816 = vst.msk [vmem:[#allocation3 + $0x70] sm:$0xff] %vm3800_vm6, %v3772_v2  ;;  %v3783_v25 = vsel %vm3709_vm4, %v3772_v2, %v3774_v32  ;;  %v3865_v61 = vld [vmem:[#allocation3 + $0x58] sm:$0xff] }
 0x5c2   : > { %3817 = vst.msk [vmem:[#allocation3 + $0x78] sm:$0xff] %vm3802_vm7, %v3783_v25  ;;  %3988 = vmatprep.subr.bf16.mxu0 %v3865_v61  ;;  %4815 = vmatprep.subr.bf16.mxu1 %v3865_v61 }
 0x5c3   : > { %3989 = vmatpush1.bf16.msra.mxu0 %v3864_v3  ;;  %4823 = vmatpush1.bf16.msra.mxu1 %v3864_v3 }
 0x5c4   : > { %v3866_v31 = vld [vmem:[#allocation3 + $0x60] sm:$0xff] }
 0x5c5   : > { %v3867_v53 = vld [vmem:[#allocation3 + $0x68] sm:$0xff] }
 0x5c6   : > { %3990 = vmatprep.subr.bf16.mxu0 %v3867_v53  ;;  %4816 = vmatprep.subr.bf16.mxu1 %v3867_v53 }
 0x5c7   : > { %3991 = vmatpush1.bf16.msra.mxu0 %v3866_v31  ;;  %4824 = vmatpush1.bf16.msra.mxu1 %v3866_v31 }
 0x5c8   : > { %v3868_v0 = vld [vmem:[#allocation3 + $0x70] sm:$0xff] }
 0x5c9   : > { %v3869_v5 = vld [vmem:[#allocation3 + $0x78] sm:$0xff] }
 0x5ca   : > { %3992 = vmatprep.subr.bf16.mxu0 %v3869_v5  ;;  %4817 = vmatprep.subr.bf16.mxu1 %v3869_v5 }
 0x5cb   : > { %3993 = vmatpush1.bf16.msra.mxu0 %v3868_v0  ;;  %4825 = vmatpush1.bf16.msra.mxu1 %v3868_v0 }
 0x5ce   : > { %4011 = vmatmul.mubr.bf16.vlgmr.msra.gmra.mrb[0].mxu0 %v5080_v46  ;;  %4101 = vmatmul.mubr.bf16.vlgmr.msra.gmra.mrb[0].mxu1 %v5081_v38 }
 0x5cf   : > { %4020 = vmatprep.mubr.bf16.mxu0 %v8007_v35  ;;  %4110 = vmatprep.mubr.bf16.mxu1 %v8007_v35 }
 0x5d6   : > { %4021 = vmatmul.mubr.bf16.gmra.mrb[4].mxu0 %v5082_v12  ;;  %4111 = vmatmul.mubr.bf16.gmra.mrb[4].mxu1 %v5083_v29 }
 0x5d7   : > { %4030 = vmatprep.mubr.bf16.mxu0 %v8007_v35  ;;  %4120 = vmatprep.mubr.bf16.mxu1 %v8007_v35 }
 0x5de   : > { %4031 = vmatmul.mubr.bf16.gmra.mrb[8].mxu0 %v5084_v4  ;;  %4121 = vmatmul.mubr.bf16.gmra.mrb[8].mxu1 %v5085_v63 }
 0x5df   : > { %4040 = vmatprep.mubr.bf16.mxu0 %v8007_v35  ;;  %4130 = vmatprep.mubr.bf16.mxu1 %v8007_v35 }
 0x5e6   : > { %4041 = vmatmul.mubr.bf16.gmra.mrb[12].mxu0 %v5086_v58  ;;  %4131 = vmatmul.mubr.bf16.gmra.mrb[12].mxu1 %v5087_v42 }
 0x5e7   : > { %4050 = vmatprep.mubr.bf16.mxu0 %v8007_v35  ;;  %4140 = vmatprep.mubr.bf16.mxu1 %v8007_v35 }
 0x5ee   : > { %4051 = vmatmul.mubr.bf16.gmra.mrb[16].mxu0 %v5088_v60  ;;  %4141 = vmatmul.mubr.bf16.gmra.mrb[16].mxu1 %v5089_v39 }
 0x5ef   : > { %4060 = vmatprep.mubr.bf16.mxu0 %v8007_v35  ;;  %4150 = vmatprep.mubr.bf16.mxu1 %v8007_v35 }
 0x5f6   : > { %4061 = vmatmul.mubr.bf16.gmra.mrb[20].mxu0 %v5090_v20  ;;  %4151 = vmatmul.mubr.bf16.gmra.mrb[20].mxu1 %v5091_v43 }
 0x5f7   : > { %4070 = vmatprep.mubr.bf16.mxu0 %v8007_v35  ;;  %4160 = vmatprep.mubr.bf16.mxu1 %v8007_v35 }
 0x5fe   : > { %4071 = vmatmul.mubr.bf16.gmra.mrb[24].mxu0 %v5092_v51  ;;  %4161 = vmatmul.mubr.bf16.gmra.mrb[24].mxu1 %v5093_v59 }
 0x5ff   : > { %4080 = vmatprep.mubr.bf16.mxu0 %v8007_v35  ;;  %4170 = vmatprep.mubr.bf16.mxu1 %v8007_v35 }
 0x606   : > { %4081 = vmatmul.mubr.bf16.gmra.mrb[28].mxu0 %v5094_v57  ;;  %4171 = vmatmul.mubr.bf16.gmra.mrb[28].mxu1 %v5095_v14 }
 0x607   : > { %4180 = vmatprep.mubr.bf16.mxu1 %v8007_v35  ;;  %4090 = vmatprep.mubr.bf16.mxu0 %v8007_v35  ;;  %v4469_v35 = vrot.slane %v4191_v1, %v4468_v27 }
 0x609   : > { %4472 = vrot.lane.b32.xlu0 %v4469_v35, %s5142_s21 }
 0x60d   : > { %4542 = vrot.lane.b32.xlu0 %v4539_v10, %s5143_s24 }
 0x60e   : > { %4181 = vmatmul.mubr.bf16.gmra.mrb[32].mxu1 %v5096_v23  ;;  %4091 = vmatmul.mubr.bf16.gmra.mrb[32].mxu0 %v5097_v9 }
 0x6a1   : > { %v7499_v18 = vpop.f32.mrb[0].mxu0  ;;  %v7501_v49 = vpop.f32.mrb[0].mxu1 }
 0x6a2   : > { %v7503_v34 = vpop.f32.mrb[1].mxu0  ;;  %v7505_v40 = vpop.f32.mrb[1].mxu1 }
 0x6a3   : > { %v7507_v33 = vpop.f32.mrb[2].mxu0  ;;  %v7509_v11 = vpop.f32.mrb[2].mxu1 }
 0x6a4   : > { %v7511_v50 = vpop.f32.mrb[3].mxu0  ;;  %v7513_v30 = vpop.f32.mrb[3].mxu1 }
 0x6a9   : > { %v7515_v37 = vpop.f32.mrb[4].mxu0  ;;  %v4112_v19 = vpop.f32.mrb[4].mxu1 }
 0x6aa   : > { %4381 = vrot.lane.b32.xlu1 %v4112_v19, %s5144_s25  ;;  %v7518_v54 = vpop.f32.mrb[5].mxu0  ;;  %v4114_v7 = vpop.f32.mrb[5].mxu1 }
 0x6ab   : > { %4383 = vrot.lane.b32.xlu0 %v4114_v7, %s5144_s25  ;;  %v7521_v41 = vpop.f32.mrb[6].mxu0  ;;  %v4116_v21 = vpop.f32.mrb[6].mxu1 }
 0x6ac   : > { %v7523_v48 = vpop.f32.mrb[7].mxu0  ;;  %v4118_v55 = vpop.f32.mrb[7].mxu1 }
 0x6ae   : > { %4385 = vrot.lane.b32.xlu1 %v4116_v21, %s5144_s25 }
 0x6af   : > { %4387 = vrot.lane.b32.xlu0 %v4118_v55, %s5144_s25 }
 0x6b1   : > { %v7527_v28 = vpop.f32.mrb[8].mxu0  ;;  %v4122_v22 = vpop.f32.mrb[8].mxu1 }
 0x6b2   : > { %4389 = vrot.lane.b32.xlu1 %v4122_v22, %s5144_s25  ;;  %v7530_v45 = vpop.f32.mrb[9].mxu0  ;;  %v4124_v15 = vpop.f32.mrb[9].mxu1 }
 0x6b3   : > { %4391 = vrot.lane.b32.xlu0 %v4124_v15, %s5144_s25  ;;  %v7533_v16 = vpop.f32.mrb[10].mxu0  ;;  %v4126_v26 = vpop.f32.mrb[10].mxu1 }
 0x6b4   : > { %v7535_v17 = vpop.f32.mrb[11].mxu0  ;;  %v4128_v44 = vpop.f32.mrb[11].mxu1 }
 0x6b6   : > { %4393 = vrot.lane.b32.xlu1 %v4126_v26, %s5144_s25 }
 0x6b7   : > { %4395 = vrot.lane.b32.xlu0 %v4128_v44, %s5144_s25 }
 0x6b9   : > { %v7539_v56 = vpop.f32.mrb[12].mxu0  ;;  %v4132_v8 = vpop.f32.mrb[12].mxu1 }
 0x6ba   : > { %4336 = vrot.lane.b32.xlu1 %v4132_v8, %s5145_s26  ;;  %v7542_v24 = vpop.f32.mrb[13].mxu0  ;;  %v4134_v2 = vpop.f32.mrb[13].mxu1 }
 0x6bb   : > { %4338 = vrot.lane.b32.xlu0 %v4134_v2, %s5145_s26  ;;  %v7545_v32 = vpop.f32.mrb[14].mxu0  ;;  %v4136_v25 = vpop.f32.mrb[14].mxu1 }
 0x6bc   : > { %v7547_v61 = vpop.f32.mrb[15].mxu0  ;;  %v4138_v3 = vpop.f32.mrb[15].mxu1 }
 0x6be   : > { %4340 = vrot.lane.b32.xlu1 %v4136_v25, %s5145_s26 }
 0x6bf   : > { %4342 = vrot.lane.b32.xlu0 %v4138_v3, %s5145_s26 }
 0x6c1   : > { %v7551_v53 = vpop.f32.mrb[16].mxu0  ;;  %v4142_v31 = vpop.f32.mrb[16].mxu1 }
 0x6c2   : > { %4344 = vrot.lane.b32.xlu1 %v4142_v31, %s5145_s26  ;;  %v7554_v5 = vpop.f32.mrb[17].mxu0  ;;  %v4144_v0 = vpop.f32.mrb[17].mxu1 }
 0x6c3   : > { %4346 = vrot.lane.b32.xlu0 %v4144_v0, %s5145_s26  ;;  %v7557_v46 = vpop.f32.mrb[18].mxu0  ;;  %v4146_v38 = vpop.f32.mrb[18].mxu1 }
 0x6c4   : > { %v7559_v12 = vpop.f32.mrb[19].mxu0  ;;  %v4148_v29 = vpop.f32.mrb[19].mxu1 }
 0x6c6   : > { %4348 = vrot.lane.b32.xlu1 %v4146_v38, %s5145_s26 }
 0x6c7   : > { %4350 = vrot.lane.b32.xlu0 %v4148_v29, %s5145_s26 }
 0x6c9   : > { %v7563_v4 = vpop.f32.mrb[20].mxu0  ;;  %v4152_v63 = vpop.f32.mrb[20].mxu1 }
 0x6ca   : > { %v7565_v58 = vpop.f32.mrb[21].mxu0  ;;  %v4154_v42 = vpop.f32.mrb[21].mxu1 }
 0x6cb   : > { %v7567_v60 = vpop.f32.mrb[22].mxu0  ;;  %v4156_v39 = vpop.f32.mrb[22].mxu1 }
 0x6cc   : > { %v7569_v20 = vpop.f32.mrb[23].mxu0  ;;  %v4158_v43 = vpop.f32.mrb[23].mxu1 }
 0x6d1   : > { %v4072_v51 = vpop.f32.mrb[24].mxu0  ;;  %v4162_v59 = vpop.f32.mrb[24].mxu1 }
 0x6d2   : > { %4292 = vrot.lane.b32.xlu1 %v4072_v51, %s5144_s25  ;;  %v4074_v57 = vpop.f32.mrb[25].mxu0  ;;  %v4164_v14 = vpop.f32.mrb[25].mxu1 }
 0x6d3   : > { %4294 = vrot.lane.b32.xlu0 %v4074_v57, %s5144_s25  ;;  %v4076_v23 = vpop.f32.mrb[26].mxu0  ;;  %v4166_v9 = vpop.f32.mrb[26].mxu1 }
 0x6d4   : > { %v4078_v6 = vpop.f32.mrb[27].mxu0  ;;  %v4168_v47 = vpop.f32.mrb[27].mxu1 }
 0x6d6   : > { %4296 = vrot.lane.b32.xlu1 %v4076_v23, %s5144_s25 }
 0x6d7   : > { %4298 = vrot.lane.b32.xlu0 %v4078_v6, %s5144_s25 }
 0x6d9   : > { %v4082_v62 = vpop.f32.mrb[28].mxu0  ;;  %v4172_v1 = vpop.f32.mrb[28].mxu1 }
 0x6da   : > { %4300 = vrot.lane.b32.xlu1 %v4082_v62, %s5144_s25  ;;  %v4084_v27 = vpop.f32.mrb[29].mxu0  ;;  %v4174_v52 = vpop.f32.mrb[29].mxu1 }
 0x6db   : > { %4302 = vrot.lane.b32.xlu0 %v4084_v27, %s5144_s25  ;;  %v4086_v35 = vpop.f32.mrb[30].mxu0  ;;  %v4176_v13 = vpop.f32.mrb[30].mxu1 }
 0x6dc   : > { %v4088_v36 = vpop.f32.mrb[31].mxu0  ;;  %v4178_v10 = vpop.f32.mrb[31].mxu1 }
 0x6de   : > { %4425 = vrot.lane.b32.xlu1 %v4172_v1, %s5145_s26 }
 0x6df   : > { %4427 = vrot.lane.b32.xlu0 %v4174_v52, %s5145_s26 }
 0x6e1   : > { %v4182_v19 = vpop.f32.mrb[32].mxu1  ;;  %v7581_v22 = vpop.f32.mrb[32].mxu0 }
 0x6e2   : > { %4304 = vrot.lane.b32.xlu1 %v4086_v35, %s5144_s25  ;;  %v4184_v7 = vpop.f32.mrb[33].mxu1  ;;  %v7583_v15 = vpop.f32.mrb[33].mxu0 }
 0x6e3   : > { %4306 = vrot.lane.b32.xlu0 %v4088_v36, %s5144_s25  ;;  %v4186_v21 = vpop.f32.mrb[34].mxu1  ;;  %v7587_v26 = vpop.f32.mrb[34].mxu0 }
 0x6e4   : > { %v4188_v55 = vpop.f32.mrb[35].mxu1  ;;  %v7589_v44 = vpop.f32.mrb[35].mxu0 }
 0x6e6   : > { %4429 = vrot.lane.b32.xlu1 %v4176_v13, %s5145_s26 }
 0x6e7   : > { %4431 = vrot.lane.b32.xlu0 %v4178_v10, %s5145_s26 }
 0x6ea   : > { %4433 = vrot.lane.b32.xlu1 %v4182_v19, %s5145_s26 }
 0x6eb   : > { %4435 = vrot.lane.b32.xlu0 %v4184_v7, %s5145_s26 }
 0x6ee   : > { %4437 = vrot.lane.b32.xlu1 %v4186_v21, %s5145_s26 }
 0x6ef   : > { %4439 = vrot.lane.b32.xlu0 %v4188_v55, %s5145_s26 }
 0x6f2   : > { %4202 = vrot.lane.b32.xlu1 %v7527_v28, %s5146_s28  ;;  %v7611_v28 = vpop.permute.xlu1 %4470 }
 0x6f3   : > { %4204 = vrot.lane.b32.xlu0 %v7530_v45, %s5146_s28  ;;  %v4473_v45 = vpop.permute.xlu0 %4472 }
 0x6f4   : > { %v7634_v62 = vsel %vm4474_vm10, %v7611_v28, %v4473_v45 }
 0x6f6   : > { %4206 = vrot.lane.b32.xlu1 %v7533_v16, %s5146_s28  ;;  %v7613_v16 = vpop.permute.xlu1 %4540 }
 0x6f7   : > { %4208 = vrot.lane.b32.xlu0 %v7535_v17, %s5146_s28  ;;  %v4543_v17 = vpop.permute.xlu0 %4542 }
 0x6fa   : > { %4210 = vrot.lane.b32.xlu1 %v7539_v56, %s5146_s28 }
 0x6fb   : > { %4212 = vrot.lane.b32.xlu0 %v7542_v24, %s5146_s28 }
 0x6fe   : > { %4214 = vrot.lane.b32.xlu1 %v7545_v32, %s5146_s28 }
 0x6ff   : > { %4216 = vrot.lane.b32.xlu0 %v7547_v61, %s5146_s28 }
 0x702   : > { %4247 = vrot.lane.b32.xlu1 %v4152_v63, %s5144_s25 }
 0x703   : > { %4249 = vrot.lane.b32.xlu0 %v4154_v42, %s5144_s25 }
 0x706   : > { %4251 = vrot.lane.b32.xlu1 %v4156_v39, %s5144_s25 }
 0x707   : > { %4253 = vrot.lane.b32.xlu0 %v4158_v43, %s5144_s25 }
 0x70a   : > { %4255 = vrot.lane.b32.xlu1 %v4162_v59, %s5144_s25 }
 0x70b   : > { %4257 = vrot.lane.b32.xlu0 %v4164_v14, %s5144_s25 }
 0x70e   : > { %4259 = vrot.lane.b32.xlu1 %v4166_v9, %s5144_s25 }
 0x70f   : > { %4261 = vrot.lane.b32.xlu0 %v4168_v47, %s5144_s25 }
 0x71c   : > { %v4382_v56 = vpop.permute.xlu1 %4381 }
 0x71d   : > { %v4384_v8 = vpop.permute.xlu0 %4383 }
 0x71e   : > { %v4397_v55 = vsel %vm4263_vm8, %v4382_v56, %v4384_v8 }
 0x720   : > { %v7615_v24 = vpop.permute.xlu1 %4385 }
 0x721   : > { %v7617_v2 = vpop.permute.xlu0 %4387 }
 0x724   : > { %v7619_v32 = vpop.permute.xlu1 %4389 }
 0x725   : > { %v7621_v25 = vpop.permute.xlu0 %4391 }
 0x728   : > { %v7623_v61 = vpop.permute.xlu1 %4393 }
 0x729   : > { %v7625_v3 = vpop.permute.xlu0 %4395 }
 0x72c   : > { %v4337_v31 = vpop.permute.xlu1 %4336 }
 0x72d   : > { %v4339_v0 = vpop.permute.xlu0 %4338 }
 0x72e   : > { %v4353_v9 = vsel %vm4352_vm9, %v4337_v31, %v4339_v0 }
 0x730   : > { %v4341_v38 = vpop.permute.xlu1 %4340 }
 0x731   : > { %v4343_v29 = vpop.permute.xlu0 %4342 }
 0x734   : > { %v4345_v63 = vpop.permute.xlu1 %4344 }
 0x735   : > { %v4347_v42 = vpop.permute.xlu0 %4346 }
 0x738   : > { %v4349_v39 = vpop.permute.xlu1 %4348 }
 0x739   : > { %v7627_v43 = vpop.permute.xlu0 %4350 }
 0x744   : > { %v4293_v51 = vpop.permute.xlu1 %4292 }
 0x745   : > { %v4295_v59 = vpop.permute.xlu0 %4294 }
 0x746   : > { %v4308_v57 = vsel %vm4263_vm8, %v4293_v51, %v4295_v59  ;;  %v4321_v14 = vadd.f32 %v4295_v59, %v7503_v34 }
 0x747   : > { %v4320_v23 = vadd.f32 %v4308_v57, %v7499_v18  ;;  %v4354_v18 = vsel %vm4352_vm9, %v4341_v38, %v4343_v29 }
 0x748   : > { %v4366_v6 = vadd.f32 %v4339_v0, %v4321_v14  ;;  %v4297_v47 = vpop.permute.xlu1 %4296  ;;  %v4545_v14 = vsel %vm4544_vm11, %v7613_v16, %v4543_v17 }
 0x749   : > { %v4365_v1 = vadd.f32 %v4353_v9, %v4320_v23  ;;  %v4299_v27 = vpop.permute.xlu0 %4298 }
 0x74a   : > { %v4479_v52 = vmul.f32 %v7634_v62, %v4366_v6  ;;  %v4309_v35 = vsel %vm4263_vm8, %v4297_v47, %v4299_v27  ;;  %v4323_v13 = vadd.f32 %v4299_v27, %v7511_v50 }
 0x74b   : > { %v4478_v36 = vmul.f32 %v7611_v28, %v4365_v1  ;;  %v4322_v34 = vadd.f32 %v4309_v35, %v7507_v33  ;;  %v4410_v33 = vadd.f32 %v4384_v8, %v7554_v5  ;;  %v4355_v5 = vsel %vm4352_vm9, %v4345_v63, %v4347_v42 }
 0x74c   : > { %v4368_v10 = vadd.f32 %v4343_v29, %v4323_v13  ;;  %v4301_v19 = vpop.permute.xlu1 %4300  ;;  %4496 = vrot.lane.b32.xlu0 %v4479_v52, %s5147_s29  ;;  %v4409_v29 = vadd.f32 %v4397_v55, %v7551_v53  ;;  %v4412_v63 = vadd.f32 %v7617_v2, %v7559_v12 }
 0x74d   : > { %v4367_v7 = vadd.f32 %v4354_v18, %v4322_v34  ;;  %4494 = vrot.lane.b32.xlu1 %v4478_v36, %s5147_s29  ;;  %v4303_v21 = vpop.permute.xlu0 %4302 }
 0x74e   : > { %v4481_v45 = vmul.f32 %v7634_v62, %v4368_v10  ;;  %v4310_v50 = vsel %vm4263_vm8, %v4301_v19, %v4303_v21  ;;  %v4325_v0 = vadd.f32 %v4303_v21, %v7518_v54  ;;  %v4414_v21 = vadd.f32 %v7621_v25, %v7565_v58 }
 0x74f   : > { %v4480_v31 = vmul.f32 %v7611_v28, %v4367_v7  ;;  %v4324_v51 = vadd.f32 %v4310_v50, %v7515_v37  ;;  %v4398_v37 = vsel %vm4263_vm8, %v7615_v24, %v7617_v2  ;;  %v4416_v58 = vadd.f32 %v7625_v3, %v7569_v20 }
 0x750   : > { %v4426_v38 = vpop.permute.xlu1 %4425  ;;  %4500 = vrot.lane.b32.xlu0 %v4481_v45, %s5147_s29  ;;  %v4370_v8 = vadd.f32 %v4347_v42, %v4325_v0  ;;  %v4356_v42 = vsel %vm4352_vm9, %v4349_v39, %v7627_v43  ;;  %v4411_v35 = vadd.f32 %v4398_v37, %v7557_v46 }
 0x751   : > { %4498 = vrot.lane.b32.xlu1 %v4480_v31, %s5147_s29  ;;  %v4428_v56 = vpop.permute.xlu0 %4427  ;;  %v4369_v6 = vadd.f32 %v4355_v5, %v4324_v51 }
 0x752   : > { %v4441_v59 = vsel %vm4352_vm9, %v4426_v38, %v4428_v56  ;;  %v4454_v57 = vadd.f32 %v4428_v56, %v4410_v33  ;;  %v4483_v27 = vmul.f32 %v7634_v62, %v4370_v8 }
 0x753   : > { %v4453_v23 = vadd.f32 %v4441_v59, %v4409_v29  ;;  %v4482_v13 = vmul.f32 %v7611_v28, %v4369_v6 }
 0x754   : > { %v4549_v54 = vmul.f32 %v4545_v14, %v4454_v57  ;;  %v4305_v9 = vpop.permute.xlu1 %4304 }
 0x755   : > { %v4548_v47 = vmul.f32 %v7613_v16, %v4453_v23  ;;  %v4307_v53 = vpop.permute.xlu0 %4306 }
 0x756   : > { %v4311_v1 = vsel %vm4263_vm8, %v4305_v9, %v4307_v53  ;;  %4566 = vrot.lane.b32.xlu0 %v4549_v54, %s5148_s30  ;;  %v4327_v52 = vadd.f32 %v4307_v53, %v7523_v48  ;;  %v4399_v48 = vsel %vm4263_vm8, %v7619_v32, %v7621_v25  ;;  %v4400_v32 = vsel %vm4263_vm8, %v7623_v61, %v7625_v3 }
 0x757   : > { %v4326_v17 = vadd.f32 %v4311_v1, %v7521_v41  ;;  %4564 = vrot.lane.b32.xlu1 %v4548_v47, %s5148_s30 }
 0x758   : > { %v4430_v24 = vpop.permute.xlu1 %4429  ;;  %v4372_v46 = vadd.f32 %v7627_v43, %v4327_v52 }
 0x759   : > { %v4371_v36 = vadd.f32 %v4356_v42, %v4326_v17  ;;  %v4432_v34 = vpop.permute.xlu0 %4431 }
 0x75a   : > { %v4442_v41 = vsel %vm4352_vm9, %v4430_v24, %v4432_v34  ;;  %v4456_v18 = vadd.f32 %v4432_v34, %v4412_v63  ;;  %4504 = vrot.lane.b32.xlu0 %v4483_v27, %s5147_s29  ;;  %v4485_v43 = vmul.f32 %v7634_v62, %v4372_v46 }
 0x75b   : > { %v4484_v12 = vmul.f32 %v7611_v28, %v4371_v36  ;;  %v4455_v2 = vadd.f32 %v4442_v41, %v4411_v35  ;;  %4502 = vrot.lane.b32.xlu1 %v4482_v13, %s5147_s29  ;;  %v4413_v28 = vadd.f32 %v4399_v48, %v7563_v4  ;;  %v4415_v4 = vadd.f32 %v4400_v32, %v7567_v60 }
 0x75c   : > { %v4551_v39 = vmul.f32 %v4545_v14, %v4456_v18  ;;  %v4434_v10 = vpop.permute.xlu1 %4433 }
 0x75d   : > { %v4550_v19 = vmul.f32 %v7613_v16, %v4455_v2  ;;  %v4436_v7 = vpop.permute.xlu0 %4435 }
 0x75e   : > { %v4443_v55 = vsel %vm4352_vm9, %v4434_v10, %v4436_v7  ;;  %4570 = vrot.lane.b32.xlu0 %v4551_v39, %s5148_s30  ;;  %v4458_v45 = vadd.f32 %v4436_v7, %v4414_v21 }
 0x75f   : > { %4568 = vrot.lane.b32.xlu1 %v4550_v19, %s5148_s30  ;;  %v4457_v31 = vadd.f32 %v4443_v55, %v4413_v28 }
 0x760   : > { %v4438_v50 = vpop.permute.xlu1 %4437  ;;  %v4553_v0 = vmul.f32 %v4545_v14, %v4458_v45 }
 0x761   : > { %v4440_v33 = vpop.permute.xlu0 %4439  ;;  %v4552_v61 = vmul.f32 %v7613_v16, %v4457_v31 }
 0x762   : > { %v4444_v25 = vsel %vm4352_vm9, %v4438_v50, %v4440_v33  ;;  %4508 = vrot.lane.b32.xlu0 %v4485_v43, %s5147_s29  ;;  %v4460_v38 = vadd.f32 %v4440_v33, %v4416_v58 }
 0x763   : > { %4506 = vrot.lane.b32.xlu1 %v4484_v12, %s5147_s29  ;;  %v4459_v62 = vadd.f32 %v4444_v25, %v4415_v4 }
 0x764   : > { %v4555_v29 = vmul.f32 %v4545_v14, %v4460_v38  ;;  %v4203_v60 = vpop.permute.xlu1 %4202 }
 0x765   : > { %v4554_v20 = vmul.f32 %v7613_v16, %v4459_v62  ;;  %v4205_v3 = vpop.permute.xlu0 %4204  ;;  %v4231_v42 = vadd.f32 %v4203_v60, %v7581_v22 }
 0x766   : > { %4574 = vrot.lane.b32.xlu0 %v4553_v0, %s5148_s30  ;;  %v4219_v17 = vsel %vm4218_vm12, %v4203_v60, %v4205_v3 }
 0x767   : > { %4572 = vrot.lane.b32.xlu1 %v4552_v61, %s5148_s30  ;;  %v4232_v52 = vadd.f32 %v4219_v17, %v7583_v15 }
 0x768   : > { %v4207_v56 = vpop.permute.xlu1 %4206 }
 0x769   : > { %v4209_v51 = vpop.permute.xlu0 %4208  ;;  %v4233_v15 = vadd.f32 %v4207_v56, %v7587_v26 }
 0x76a   : > { %4578 = vrot.lane.b32.xlu0 %v4555_v29, %s5148_s30  ;;  %v4220_v2 = vsel %vm4218_vm12, %v4207_v56, %v4209_v51 }
 0x76b   : > { %4576 = vrot.lane.b32.xlu1 %v4554_v20, %s5148_s30  ;;  %v4234_v19 = vadd.f32 %v4220_v2, %v7589_v44 }
 0x76c   : > { %v4211_v57 = vpop.permute.xlu1 %4210 }
 0x76d   : > { %v4213_v59 = vpop.permute.xlu0 %4212  ;;  %v4235_v44 = vadd.f32 %v4211_v57, %v7501_v49 }
 0x76e   : > { %v4221_v31 = vsel %vm4218_vm12, %v4211_v57, %v4213_v59 }
 0x76f   : > { %v4236_v0 = vadd.f32 %v4221_v31, %v7505_v40 }
 0x770   : > { %v7704_v5 = vpop.permute.xlu1 %4214 }
 0x771   : > { %v4217_v23 = vpop.permute.xlu0 %4216  ;;  %v4237_v49 = vadd.f32 %v7704_v5, %v7509_v11 }
 0x772   : > { %v4222_v61 = vsel %vm4218_vm12, %v7704_v5, %v4217_v23 }
 0x773   : > { %v4238_v40 = vadd.f32 %v4222_v61, %v7513_v30 }
 0x774   : > { %v4248_v54 = vpop.permute.xlu1 %4247 }
 0x775   : > { %v4250_v8 = vpop.permute.xlu0 %4249 }
 0x776   : > { %v4264_v63 = vsel %vm4263_vm8, %v4248_v54, %v4250_v8  ;;  %v4277_v36 = vadd.f32 %v4250_v8, %v4232_v52 }
 0x777   : > { %v4276_v35 = vadd.f32 %v4264_v63, %v4231_v42 }
 0x778   : > { %v4252_v6 = vpop.permute.xlu1 %4251 }
 0x779   : > { %v4254_v9 = vpop.permute.xlu0 %4253 }
 0x77a   : > { %v4265_v22 = vsel %vm4263_vm8, %v4252_v6, %v4254_v9  ;;  %v4279_v28 = vadd.f32 %v4254_v9, %v4234_v19 }
 0x77b   : > { %v4278_v21 = vadd.f32 %v4265_v22, %v4233_v15 }
 0x77c   : > { %v4256_v47 = vpop.permute.xlu1 %4255 }
 0x77d   : > { %v4258_v14 = vpop.permute.xlu0 %4257 }
 0x77e   : > { %v4266_v58 = vsel %vm4263_vm8, %v4256_v47, %v4258_v14  ;;  %v4281_v20 = vadd.f32 %v4258_v14, %v4236_v0 }
 0x77f   : > { %v4280_v62 = vadd.f32 %v4266_v58, %v4235_v44 }
 0x780   : > { %v4260_v53 = vpop.permute.xlu1 %4259 }
 0x781   : > { %v7706_v16 = vpop.permute.xlu0 %4261 }
 0x782   : > { %v4267_v3 = vsel %vm4263_vm8, %v4260_v53, %v7706_v16  ;;  %v4283_v9 = vadd.f32 %v7706_v16, %v4238_v40 }
 0x783   : > { %v4282_v57 = vadd.f32 %v4267_v3, %v4237_v49 }
 0x7be   : > { %v4497_v37 = vpop.permute.xlu0 %4496 }
 0x7bf   : > { %v4495_v1 = vpop.permute.xlu1 %4494 }
 0x7c0   : > { %v4511_v13 = vsel %vm4510_vm13, %v4495_v1, %v4497_v37  ;;  %v4523_v34 = vadd.f32 %v4495_v1, %v4276_v35 }
 0x7c1   : > { %v4524_v18 = vadd.f32 %v4511_v13, %v4277_v36 }
 0x7c2   : > { %v4501_v27 = vpop.permute.xlu0 %4500 }
 0x7c3   : > { %v4499_v24 = vpop.permute.xlu1 %4498 }
 0x7c4   : > { %v4512_v55 = vsel %vm4510_vm13, %v4499_v24, %v4501_v27  ;;  %v4525_v32 = vadd.f32 %v4499_v24, %v4278_v21 }
 0x7c5   : > { %v4526_v45 = vadd.f32 %v4512_v55, %v4279_v28 }
 0x7c8   : > { %v4567_v41 = vpop.permute.xlu0 %4566 }
 0x7c9   : > { %v4565_v12 = vpop.permute.xlu1 %4564 }
 0x7ca   : > { %v4581_v48 = vsel %vm4580_vm14, %v4565_v12, %v4567_v41  ;;  %v4593_v46 = vadd.f32 %v4565_v12, %v4523_v34 }
 0x7cb   : > { %v4594_v39 = vadd.f32 %v4581_v48, %v4524_v18 }
 0x7cc   : > { %4609 = vrot.lane.b32.xlu1 %v4593_v46, %s5149_s9  ;;  %v4505_v10 = vpop.permute.xlu0 %4504 }
 0x7cd   : > { %v4503_v7 = vpop.permute.xlu1 %4502  ;;  %4611 = vrot.lane.b32.xlu0 %v4594_v39, %s5149_s9 }
 0x7ce   : > { %v4513_v29 = vsel %vm4510_vm13, %v4503_v7, %v4505_v10  ;;  %v4527_v60 = vadd.f32 %v4503_v7, %v4280_v62 }
 0x7cf   : > { %v4528_v56 = vadd.f32 %v4513_v29, %v4281_v20 }
 0x7d0   : > { %v4571_v43 = vpop.permute.xlu0 %4570 }
 0x7d1   : > { %v4569_v50 = vpop.permute.xlu1 %4568 }
 0x7d2   : > { %v4582_v26 = vsel %vm4580_vm14, %v4569_v50, %v4571_v43  ;;  %v4595_v33 = vadd.f32 %v4569_v50, %v4525_v32 }
 0x7d3   : > { %v4596_v25 = vadd.f32 %v4582_v26, %v4526_v45 }
 0x7d4   : > { %4613 = vrot.lane.b32.xlu1 %v4595_v33, %s5149_s9  ;;  %v4509_v4 = vpop.permute.xlu0 %4508 }
 0x7d5   : > { %v4507_v38 = vpop.permute.xlu1 %4506  ;;  %4615 = vrot.lane.b32.xlu0 %v4596_v25, %s5149_s9 }
 0x7d6   : > { %v4514_v8 = vsel %vm4510_vm13, %v4507_v38, %v4509_v4  ;;  %v4529_v14 = vadd.f32 %v4507_v38, %v4282_v57 }
 0x7d7   : > { %v4530_v11 = vadd.f32 %v4514_v8, %v4283_v9 }
 0x7d8   : > { %v4575_v51 = vpop.permute.xlu0 %4574 }
 0x7d9   : > { %v4573_v59 = vpop.permute.xlu1 %4572 }
 0x7da   : > { %v4583_v23 = vsel %vm4580_vm14, %v4573_v59, %v4575_v51  ;;  %v4597_v54 = vadd.f32 %v4573_v59, %v4527_v60 }
 0x7db   : > { %v4598_v6 = vadd.f32 %v4583_v23, %v4528_v56 }
 0x7dc   : > { %4617 = vrot.lane.b32.xlu1 %v4597_v54, %s5149_s9  ;;  %v4579_v47 = vpop.permute.xlu0 %4578 }
 0x7dd   : > { %v4577_v5 = vpop.permute.xlu1 %4576  ;;  %4619 = vrot.lane.b32.xlu0 %v4598_v6, %s5149_s9 }
 0x7de   : > { %v4584_v30 = vsel %vm4580_vm14, %v4577_v5, %v4579_v47  ;;  %v4599_v53 = vadd.f32 %v4577_v5, %v4529_v14 }
 0x7df   : > { %v4600_v37 = vadd.f32 %v4584_v30, %v4530_v11 }
 0x7e0   : > { %4621 = vrot.lane.b32.xlu1 %v4599_v53, %s5149_s9 }
 0x7e1   : > { %4623 = vrot.lane.b32.xlu0 %v4600_v37, %s5149_s9 }
 0x83e   : > { %v4610_v1 = vpop.permute.xlu1 %4609 }
 0x83f   : > { %v4612_v16 = vpop.permute.xlu0 %4611 }
 0x840   : > { %v4626_v17 = vsel %vm4625_vm15, %v4610_v1, %v4612_v16  ;;  %4639 = vst.msk [vmem:[%s7787_s8 + $0x8] sm:$0xff] %vm502_vm1, %v4612_v16 }
 0x841   : > { %4638 = vst [vmem:[%s7787_s8] sm:$0xff] %v4626_v17 }
 0x846   : > { %v4614_v63 = vpop.permute.xlu1 %4613 }
 0x847   : > { %v4616_v42 = vpop.permute.xlu0 %4615 }
 0x848   : > { %v4627_v27 = vsel %vm4625_vm15, %v4614_v63, %v4616_v42  ;;  %4641 = vst.msk [vmem:[%s7787_s8 + $0x18] sm:$0xff] %vm502_vm1, %v4616_v42 }
 0x849   : > { %4640 = vst [vmem:[%s7787_s8 + $0x10] sm:$0xff] %v4627_v27 }
 0x84e   : > { %v4618_v52 = vpop.permute.xlu1 %4617 }
 0x84f   : > { %v4620_v24 = vpop.permute.xlu0 %4619 }
 0x850   : > { %v4628_v35 = vsel %vm4625_vm15, %v4618_v52, %v4620_v24  ;;  %4643 = vst.msk [vmem:[%s7787_s8 + $0x28] sm:$0xff] %vm502_vm1, %v4620_v24 }
 0x851   : > { %4642 = vst [vmem:[%s7787_s8 + $0x20] sm:$0xff] %v4628_v35 }
 0x852   : > { %v4622_v13 = vpop.permute.xlu1 %4621 }
 0x853   : > { %v4624_v36 = vpop.permute.xlu0 %4623 }
 0x854   : > { %v4629_v34 = vsel %vm4625_vm15, %v4622_v13, %v4624_v36  ;;  %4645 = vst.msk [vmem:[%s7787_s8 + $0x38] sm:$0xff] %vm502_vm1, %v4624_v36 }
 0x855   : > { %4644 = vst [vmem:[%s7787_s8 + $0x30] sm:$0xff] %v4629_v34 }
 0x856 PF: > { %s18_s27 = sadd.s32 1, %s5136_s27  }
 0x857   : > { %p15_p6 = scmp.ge.s32.totalorder %s18_s27, 6  }
 0x859   :  { %17 = sbr.rel (!%p15_p6) target bundleno = 1 (0x1), region = 96 }

</bundles_post_ra>
